<compile_context>
chip_gen: v6e
topology: v6e:2x2x1
jax: 0.10.0
libtpu: 0.0.40
codegen_flags: <defaults>
</compile_context>

<pallas_src>
import functools

import jax
import jax.numpy as jnp
from jax import lax
from jax.experimental import pallas as pl
from jax.experimental.pallas import tpu as pltpu


# ---------------------------------------------------------------------------
# Kernel
# ---------------------------------------------------------------------------
def _interaction_attention_kernel(x_ref, mask_ref, wq_ref, bq_ref, wk_ref,
                                  bk_ref, wvo_ref, bo_ref, out_ref, *,
                                  num_heads):
    # x_ref:    (BN, Din)        f32   flattened tokens (BN = seq_len*num_agents)
    # mask_ref: (BN, BN)         f32   additive block-diagonal mask (0 / -1e9)
    # wq_ref:   (H, Din, hd)     f32   per-head Q weight, 1/sqrt(hd) folded in
    # bq_ref:   (H, 1, hd)       f32   per-head Q bias, scale folded in
    # wk_ref:   (H, Din, hd)     f32
    # bk_ref:   (H, 1, hd)       f32
    # wvo_ref:  (H, Din, E)      f32   fused value*output weight per head
    # bo_ref:   (1, E)           f32   output bias (+ Wo @ bv folded in)
    # out_ref:  (BN, E)          f32
    x = x_ref[...]                               # (BN, Din)
    mask = mask_ref[...]                         # (BN, BN)
    nt_dims = (((1,), (1,)), ((), ()))           # contract minor dims (q @ k^T)

    acc = None
    for h in range(num_heads):                   # H = 4, static unroll
        qh = jnp.dot(x, wq_ref[h], preferred_element_type=jnp.float32) + bq_ref[h]   # (BN, hd)
        kh = jnp.dot(x, wk_ref[h], preferred_element_type=jnp.float32) + bk_ref[h]   # (BN, hd)

        # Block-diagonal logits over all tokens; softmax is full-128-lane work.
        s = lax.dot_general(qh, kh, nt_dims,
                            preferred_element_type=jnp.float32) + mask               # (BN, BN)
        s = s - jnp.max(s, axis=-1, keepdims=True)
        p = jnp.exp(s)
        p = p / jnp.sum(p, axis=-1, keepdims=True)                                    # exact

        # Value and output projections fused offline: ctx_h directly lands in
        # the final embedding space -> heads combine by accumulation (no
        # lane-axis concat), and the P@V contraction has K = BN = 128.
        voh = jnp.dot(x, wvo_ref[h], preferred_element_type=jnp.float32)              # (BN, E)
        ctx = jnp.dot(p, voh, preferred_element_type=jnp.float32)                     # (BN, E)
        acc = ctx if acc is None else acc + ctx

    out_ref[...] = acc + bo_ref[...]


# ---------------------------------------------------------------------------
# One-time parameter preprocessing (cache the result; reuse across calls)
# ---------------------------------------------------------------------------
def prepare_interaction_params(params, *, num_heads, seq_len, num_agents):
    """Regroup/fuse the PyTorch MHA weights once; returns kernel-ready arrays."""
    wqkv = jnp.asarray(params["wqkv"], jnp.float32)   # (3E, Din) torch Linear (out, in)
    bqkv = jnp.asarray(params["bqkv"], jnp.float32)   # (3E,)
    wo = jnp.asarray(params["wo"], jnp.float32)       # (E, E)   (out, in)
    bo = jnp.asarray(params["bo"], jnp.float32)       # (E,)

    E = wo.shape[0]
    H = num_heads
    hd = E // H
    din = wqkv.shape[1]

    # Fused-QKV rows are per-head interleaved: row h*3*hd + which*hd + d.
    w3 = wqkv.reshape(H, 3, hd, din)                  # [h, q/k/v, d, i]
    b3 = bqkv.reshape(H, 3, hd)

    scale = 1.0 / float(hd) ** 0.5
    wq = jnp.transpose(w3[:, 0], (0, 2, 1)) * scale   # (H, Din, hd), scale folded
    bq = (b3[:, 0] * scale).reshape(H, 1, hd)
    wk = jnp.transpose(w3[:, 1], (0, 2, 1))           # (H, Din, hd)
    bk = b3[:, 1].reshape(H, 1, hd)
    wv = w3[:, 2]                                     # (H, hd, Din)
    bv = b3[:, 2]                                     # (H, hd)

    # Fuse Wo into the value projection:  wvo[h, i, f] = sum_d Wv[h,d,i] * Wo[f, h*hd+d]
    wo_h = wo.reshape(E, H, hd)                       # Wo[f, h*hd+d] = wo_h[f, h, d]
    wvo = jnp.einsum("hdi,fhd->hif", wv, wo_h)        # (H, Din, E)

    # Value bias passes through the softmax (rows sum to 1), so it folds into
    # the output bias exactly: bo_eff = bo + Wo @ bv_headmajor.
    bo_eff = (bo + wo @ bv.reshape(E)).reshape(1, E)

    # Additive block-diagonal mask over flattened tokens (attention only
    # within the same timestep).
    bn = seq_len * num_agents
    tok_t = jnp.arange(bn) // num_agents
    mask = jnp.where(tok_t[:, None] == tok_t[None, :], 0.0, -1e9).astype(jnp.float32)

    prep = dict(wq=wq, bq=bq, wk=wk, bk=bk, wvo=wvo, bo=bo_eff, mask=mask)
    return jax.tree_util.tree_map(jnp.asarray, prep)


# ---------------------------------------------------------------------------
# Forward wrapper (jit once, call many times with cached `prep`)
# ---------------------------------------------------------------------------
# If this layer is invoked repeatedly (per rollout step / per layer), stack
# the inputs along the timestep axis and make one call to amortize dispatch.
@jax.jit
def interaction_net_forward(x, prep):
    """x: (seq_len, num_agents, num_agents) f32 -> (seq_len, num_agents*E) f32."""
    B, N, din = x.shape
    H, _, hd = prep["wq"].shape
    E = prep["bo"].shape[1]
    bn = B * N

    x2 = x.astype(jnp.float32).reshape(bn, din)       # free, contiguous

    vmem = pl.BlockSpec(memory_space=pltpu.MemorySpace.VMEM)
    out2 = pl.pallas_call(
        functools.partial(_interaction_attention_kernel, num_heads=H),
        out_shape=jax.ShapeDtypeStruct((bn, E), jnp.float32),
        in_specs=[vmem] * 8,
        out_specs=vmem,
        cost_estimate=pl.CostEstimate(
            flops=6_300_000, transcendentals=65_536, bytes_accessed=103_000),
    )(x2, prep["mask"], prep["wq"], prep["bq"], prep["wk"], prep["bk"],
      prep["wvo"], prep["bo"])

    # flatten(start_dim=1) — contiguous, free host-side reshape.
    return out2.reshape(B, N * E)


# ---------------------------------------------------------------------------
# Pure-JAX f32 reference (PyTorch MHA semantics)
# ---------------------------------------------------------------------------
def _reference_forward(x, params, *, num_heads):
    B, N, din = x.shape
    wqkv, bqkv, wo, bo = params["wqkv"], params["bqkv"], params["wo"], params["bo"]
    E = wo.shape[0]
    hd = E // num_heads
    qkv = jnp.einsum("bnd,ed->bne", x, wqkv) + bqkv                    # (B,N,3E)
    qkv = qkv.reshape(B, N, num_heads, 3 * hd).transpose(0, 2, 1, 3)   # (B,H,N,3hd)
    q, k, v = jnp.split(qkv, 3, axis=-1)
    logits = jnp.einsum("bhnd,bhmd->bhnm", q, k) / jnp.sqrt(jnp.float32(hd))
    attn = jax.nn.softmax(logits, axis=-1)
    vals = jnp.einsum("bhnm,bhmd->bhnd", attn, v)
    vals = vals.transpose(0, 2, 1, 3).reshape(B, N, E)
    o = jnp.einsum("bne,fe->bnf", vals, wo) + bo
    return o.reshape(B, N * E)


if __name__ == "__main__":
    # Shapes implied by the forward: x is (seq_len, num_agents, num_agents).
    seq_len, num_agents = 8, 16
    embed_dim, num_heads = 32, 4

    key = jax.random.PRNGKey(0)
    kx, k1, k2, k3, k4 = jax.random.split(key, 5)

    x = jax.random.normal(kx, (seq_len, num_agents, num_agents), dtype=jnp.float32)

    # Deterministic synthetic parameters (PyTorch Linear layout: (out, in)).
    params = {
        "wqkv": 0.1 * jax.random.normal(k1, (3 * embed_dim, num_agents), jnp.float32),
        "bqkv": 0.1 * jax.random.normal(k2, (3 * embed_dim,), jnp.float32),
        "wo": 0.1 * jax.random.normal(k3, (embed_dim, embed_dim), jnp.float32),
        "bo": 0.1 * jax.random.normal(k4, (embed_dim,), jnp.float32),
    }

    # One-time prep (cache this across forward calls).
    prep = prepare_interaction_params(
        params, num_heads=num_heads, seq_len=seq_len, num_agents=num_agents)
    prep = jax.block_until_ready(prep)

    out = interaction_net_forward(x, prep)
    out = jax.block_until_ready(out)

    ref = _reference_forward(x, params, num_heads=num_heads)
    assert out.shape == (seq_len, num_agents * embed_dim), out.shape

    # Tolerance tightened vs. the bf16 version: everything is f32 now; small
    # residual differences come from the offline Wv@Wo fusion / bias fold and
    # MXU f32 rounding.
    err = float(jnp.max(jnp.abs(out - ref)))
    assert jnp.allclose(out, ref, atol=2e-3, rtol=2e-3), err

    print("KERNEL_OK")
</pallas_src>

<mosaic_0001>
module attributes {stable_mosaic.version = 11 : i64} {
  func.func @_interaction_attention_kernel(%arg0: memref<128x16xf32, #tpu.memory_space<vmem>>, %arg1: memref<128x128xf32, #tpu.memory_space<vmem>>, %arg2: memref<4x16x8xf32, #tpu.memory_space<vmem>>, %arg3: memref<4x1x8xf32, #tpu.memory_space<vmem>>, %arg4: memref<4x16x8xf32, #tpu.memory_space<vmem>>, %arg5: memref<4x1x8xf32, #tpu.memory_space<vmem>>, %arg6: memref<4x16x32xf32, #tpu.memory_space<vmem>>, %arg7: memref<1x32xf32, #tpu.memory_space<vmem>>, %arg8: memref<128x32xf32, #tpu.memory_space<vmem>>) attributes {dimension_semantics = [], scalar_prefetch = 0 : i64, scratch_operands = 0 : i64, tpu.core_type = #tpu.core_type<tc>} {
    %c0 = arith.constant 0 : index
    %c0_0 = arith.constant 0 : index
    %0 = vector.load %arg0[%c0, %c0_0] : memref<128x16xf32, #tpu.memory_space<vmem>>, vector<128x16xf32>
    %c0_1 = arith.constant 0 : index
    %c0_2 = arith.constant 0 : index
    %1 = vector.load %arg1[%c0_1, %c0_2] : memref<128x128xf32, #tpu.memory_space<vmem>>, vector<128x128xf32>
    %c0_3 = arith.constant 0 : index
    %c0_4 = arith.constant 0 : index
    %c0_5 = arith.constant 0 : index
    %2 = vector.load %arg2[%c0_3, %c0_4, %c0_5] : memref<4x16x8xf32, #tpu.memory_space<vmem>>, vector<1x16x8xf32>
    %3 = vector.shape_cast %2 : vector<1x16x8xf32> to vector<16x8xf32>
    %cst = arith.constant dense<0.000000e+00> : vector<128x8xf32>
    %4 = tpu.matmul %0, %3, %cst {dimension_numbers = #tpu.dot_dimension_numbers<[1], [0], [0], [1], [0, 0, 1, 1], [], []>} : vector<128x16xf32>, vector<16x8xf32>, vector<128x8xf32> -> vector<128x8xf32>
    %c0_6 = arith.constant 0 : index
    %c0_7 = arith.constant 0 : index
    %c0_8 = arith.constant 0 : index
    %5 = vector.load %arg3[%c0_6, %c0_7, %c0_8] : memref<4x1x8xf32, #tpu.memory_space<vmem>>, vector<1x1x8xf32>
    %6 = vector.shape_cast %5 : vector<1x1x8xf32> to vector<1x8xf32>
    %7 = vector.broadcast %6 : vector<1x8xf32> to vector<128x8xf32>
    %8 = arith.addf %4, %7 : vector<128x8xf32>
    %c0_9 = arith.constant 0 : index
    %c0_10 = arith.constant 0 : index
    %c0_11 = arith.constant 0 : index
    %9 = vector.load %arg4[%c0_9, %c0_10, %c0_11] : memref<4x16x8xf32, #tpu.memory_space<vmem>>, vector<1x16x8xf32>
    %10 = vector.shape_cast %9 : vector<1x16x8xf32> to vector<16x8xf32>
    %cst_12 = arith.constant dense<0.000000e+00> : vector<128x8xf32>
    %11 = tpu.matmul %0, %10, %cst_12 {dimension_numbers = #tpu.dot_dimension_numbers<[1], [0], [0], [1], [0, 0, 1, 1], [], []>} : vector<128x16xf32>, vector<16x8xf32>, vector<128x8xf32> -> vector<128x8xf32>
    %c0_13 = arith.constant 0 : index
    %c0_14 = arith.constant 0 : index
    %c0_15 = arith.constant 0 : index
    %12 = vector.load %arg5[%c0_13, %c0_14, %c0_15] : memref<4x1x8xf32, #tpu.memory_space<vmem>>, vector<1x1x8xf32>
    %13 = vector.shape_cast %12 : vector<1x1x8xf32> to vector<1x8xf32>
    %14 = vector.broadcast %13 : vector<1x8xf32> to vector<128x8xf32>
    %15 = arith.addf %11, %14 : vector<128x8xf32>
    %cst_16 = arith.constant dense<0.000000e+00> : vector<128x128xf32>
    %16 = tpu.matmul %8, %15, %cst_16 {dimension_numbers = #tpu.dot_dimension_numbers<[1], [1], [0], [0], [0, 0, 1, 0], [], []>} : vector<128x8xf32>, vector<128x8xf32>, vector<128x128xf32> -> vector<128x128xf32>
    %17 = arith.addf %16, %1 : vector<128x128xf32>
    %cst_17 = arith.constant dense<0xFF800000> : vector<128xf32>
    %18 = vector.multi_reduction <maximumf>, %17, %cst_17 [1] : vector<128x128xf32> to vector<128xf32>
    %19 = vector.shape_cast %18 : vector<128xf32> to vector<128x1xf32>
    %20 = vector.broadcast %19 : vector<128x1xf32> to vector<128x128xf32>
    %21 = arith.subf %17, %20 : vector<128x128xf32>
    %22 = math.exp %21 : vector<128x128xf32>
    %cst_18 = arith.constant dense<0.000000e+00> : vector<128xf32>
    %23 = vector.multi_reduction <add>, %22, %cst_18 [1] : vector<128x128xf32> to vector<128xf32>
    %24 = vector.shape_cast %23 : vector<128xf32> to vector<128x1xf32>
    %25 = vector.broadcast %24 : vector<128x1xf32> to vector<128x128xf32>
    %26 = arith.divf %22, %25 : vector<128x128xf32>
    %c0_19 = arith.constant 0 : index
    %c0_20 = arith.constant 0 : index
    %c0_21 = arith.constant 0 : index
    %27 = vector.load %arg6[%c0_19, %c0_20, %c0_21] : memref<4x16x32xf32, #tpu.memory_space<vmem>>, vector<1x16x32xf32>
    %28 = vector.shape_cast %27 : vector<1x16x32xf32> to vector<16x32xf32>
    %cst_22 = arith.constant dense<0.000000e+00> : vector<128x32xf32>
    %29 = tpu.matmul %0, %28, %cst_22 {dimension_numbers = #tpu.dot_dimension_numbers<[1], [0], [0], [1], [0, 0, 1, 1], [], []>} : vector<128x16xf32>, vector<16x32xf32>, vector<128x32xf32> -> vector<128x32xf32>
    %cst_23 = arith.constant dense<0.000000e+00> : vector<128x32xf32>
    %30 = tpu.matmul %26, %29, %cst_23 {dimension_numbers = #tpu.dot_dimension_numbers<[1], [0], [0], [1], [0, 0, 1, 1], [], []>} : vector<128x128xf32>, vector<128x32xf32>, vector<128x32xf32> -> vector<128x32xf32>
    %c1 = arith.constant 1 : index
    %c0_24 = arith.constant 0 : index
    %c0_25 = arith.constant 0 : index
    %31 = vector.load %arg2[%c1, %c0_24, %c0_25] : memref<4x16x8xf32, #tpu.memory_space<vmem>>, vector<1x16x8xf32>
    %32 = vector.shape_cast %31 : vector<1x16x8xf32> to vector<16x8xf32>
    %cst_26 = arith.constant dense<0.000000e+00> : vector<128x8xf32>
    %33 = tpu.matmul %0, %32, %cst_26 {dimension_numbers = #tpu.dot_dimension_numbers<[1], [0], [0], [1], [0, 0, 1, 1], [], []>} : vector<128x16xf32>, vector<16x8xf32>, vector<128x8xf32> -> vector<128x8xf32>
    %c1_27 = arith.constant 1 : index
    %c0_28 = arith.constant 0 : index
    %c0_29 = arith.constant 0 : index
    %34 = vector.load %arg3[%c1_27, %c0_28, %c0_29] : memref<4x1x8xf32, #tpu.memory_space<vmem>>, vector<1x1x8xf32>
    %35 = vector.shape_cast %34 : vector<1x1x8xf32> to vector<1x8xf32>
    %36 = vector.broadcast %35 : vector<1x8xf32> to vector<128x8xf32>
    %37 = arith.addf %33, %36 : vector<128x8xf32>
    %c1_30 = arith.constant 1 : index
    %c0_31 = arith.constant 0 : index
    %c0_32 = arith.constant 0 : index
    %38 = vector.load %arg4[%c1_30, %c0_31, %c0_32] : memref<4x16x8xf32, #tpu.memory_space<vmem>>, vector<1x16x8xf32>
    %39 = vector.shape_cast %38 : vector<1x16x8xf32> to vector<16x8xf32>
    %cst_33 = arith.constant dense<0.000000e+00> : vector<128x8xf32>
    %40 = tpu.matmul %0, %39, %cst_33 {dimension_numbers = #tpu.dot_dimension_numbers<[1], [0], [0], [1], [0, 0, 1, 1], [], []>} : vector<128x16xf32>, vector<16x8xf32>, vector<128x8xf32> -> vector<128x8xf32>
    %c1_34 = arith.constant 1 : index
    %c0_35 = arith.constant 0 : index
    %c0_36 = arith.constant 0 : index
    %41 = vector.load %arg5[%c1_34, %c0_35, %c0_36] : memref<4x1x8xf32, #tpu.memory_space<vmem>>, vector<1x1x8xf32>
    %42 = vector.shape_cast %41 : vector<1x1x8xf32> to vector<1x8xf32>
    %43 = vector.broadcast %42 : vector<1x8xf32> to vector<128x8xf32>
    %44 = arith.addf %40, %43 : vector<128x8xf32>
    %cst_37 = arith.constant dense<0.000000e+00> : vector<128x128xf32>
    %45 = tpu.matmul %37, %44, %cst_37 {dimension_numbers = #tpu.dot_dimension_numbers<[1], [1], [0], [0], [0, 0, 1, 0], [], []>} : vector<128x8xf32>, vector<128x8xf32>, vector<128x128xf32> -> vector<128x128xf32>
    %46 = arith.addf %45, %1 : vector<128x128xf32>
    %cst_38 = arith.constant dense<0xFF800000> : vector<128xf32>
    %47 = vector.multi_reduction <maximumf>, %46, %cst_38 [1] : vector<128x128xf32> to vector<128xf32>
    %48 = vector.shape_cast %47 : vector<128xf32> to vector<128x1xf32>
    %49 = vector.broadcast %48 : vector<128x1xf32> to vector<128x128xf32>
    %50 = arith.subf %46, %49 : vector<128x128xf32>
    %51 = math.exp %50 : vector<128x128xf32>
    %cst_39 = arith.constant dense<0.000000e+00> : vector<128xf32>
    %52 = vector.multi_reduction <add>, %51, %cst_39 [1] : vector<128x128xf32> to vector<128xf32>
    %53 = vector.shape_cast %52 : vector<128xf32> to vector<128x1xf32>
    %54 = vector.broadcast %53 : vector<128x1xf32> to vector<128x128xf32>
    %55 = arith.divf %51, %54 : vector<128x128xf32>
    %c1_40 = arith.constant 1 : index
    %c0_41 = arith.constant 0 : index
    %c0_42 = arith.constant 0 : index
    %56 = vector.load %arg6[%c1_40, %c0_41, %c0_42] : memref<4x16x32xf32, #tpu.memory_space<vmem>>, vector<1x16x32xf32>
    %57 = vector.shape_cast %56 : vector<1x16x32xf32> to vector<16x32xf32>
    %cst_43 = arith.constant dense<0.000000e+00> : vector<128x32xf32>
    %58 = tpu.matmul %0, %57, %cst_43 {dimension_numbers = #tpu.dot_dimension_numbers<[1], [0], [0], [1], [0, 0, 1, 1], [], []>} : vector<128x16xf32>, vector<16x32xf32>, vector<128x32xf32> -> vector<128x32xf32>
    %cst_44 = arith.constant dense<0.000000e+00> : vector<128x32xf32>
    %59 = tpu.matmul %55, %58, %cst_44 {dimension_numbers = #tpu.dot_dimension_numbers<[1], [0], [0], [1], [0, 0, 1, 1], [], []>} : vector<128x128xf32>, vector<128x32xf32>, vector<128x32xf32> -> vector<128x32xf32>
    %60 = arith.addf %30, %59 : vector<128x32xf32>
    %c2 = arith.constant 2 : index
    %c0_45 = arith.constant 0 : index
    %c0_46 = arith.constant 0 : index
    %61 = vector.load %arg2[%c2, %c0_45, %c0_46] : memref<4x16x8xf32, #tpu.memory_space<vmem>>, vector<1x16x8xf32>
    %62 = vector.shape_cast %61 : vector<1x16x8xf32> to vector<16x8xf32>
    %cst_47 = arith.constant dense<0.000000e+00> : vector<128x8xf32>
    %63 = tpu.matmul %0, %62, %cst_47 {dimension_numbers = #tpu.dot_dimension_numbers<[1], [0], [0], [1], [0, 0, 1, 1], [], []>} : vector<128x16xf32>, vector<16x8xf32>, vector<128x8xf32> -> vector<128x8xf32>
    %c2_48 = arith.constant 2 : index
    %c0_49 = arith.constant 0 : index
    %c0_50 = arith.constant 0 : index
    %64 = vector.load %arg3[%c2_48, %c0_49, %c0_50] : memref<4x1x8xf32, #tpu.memory_space<vmem>>, vector<1x1x8xf32>
    %65 = vector.shape_cast %64 : vector<1x1x8xf32> to vector<1x8xf32>
    %66 = vector.broadcast %65 : vector<1x8xf32> to vector<128x8xf32>
    %67 = arith.addf %63, %66 : vector<128x8xf32>
    %c2_51 = arith.constant 2 : index
    %c0_52 = arith.constant 0 : index
    %c0_53 = arith.constant 0 : index
    %68 = vector.load %arg4[%c2_51, %c0_52, %c0_53] : memref<4x16x8xf32, #tpu.memory_space<vmem>>, vector<1x16x8xf32>
    %69 = vector.shape_cast %68 : vector<1x16x8xf32> to vector<16x8xf32>
    %cst_54 = arith.constant dense<0.000000e+00> : vector<128x8xf32>
    %70 = tpu.matmul %0, %69, %cst_54 {dimension_numbers = #tpu.dot_dimension_numbers<[1], [0], [0], [1], [0, 0, 1, 1], [], []>} : vector<128x16xf32>, vector<16x8xf32>, vector<128x8xf32> -> vector<128x8xf32>
    %c2_55 = arith.constant 2 : index
    %c0_56 = arith.constant 0 : index
    %c0_57 = arith.constant 0 : index
    %71 = vector.load %arg5[%c2_55, %c0_56, %c0_57] : memref<4x1x8xf32, #tpu.memory_space<vmem>>, vector<1x1x8xf32>
    %72 = vector.shape_cast %71 : vector<1x1x8xf32> to vector<1x8xf32>
    %73 = vector.broadcast %72 : vector<1x8xf32> to vector<128x8xf32>
    %74 = arith.addf %70, %73 : vector<128x8xf32>
    %cst_58 = arith.constant dense<0.000000e+00> : vector<128x128xf32>
    %75 = tpu.matmul %67, %74, %cst_58 {dimension_numbers = #tpu.dot_dimension_numbers<[1], [1], [0], [0], [0, 0, 1, 0], [], []>} : vector<128x8xf32>, vector<128x8xf32>, vector<128x128xf32> -> vector<128x128xf32>
    %76 = arith.addf %75, %1 : vector<128x128xf32>
    %cst_59 = arith.constant dense<0xFF800000> : vector<128xf32>
    %77 = vector.multi_reduction <maximumf>, %76, %cst_59 [1] : vector<128x128xf32> to vector<128xf32>
    %78 = vector.shape_cast %77 : vector<128xf32> to vector<128x1xf32>
    %79 = vector.broadcast %78 : vector<128x1xf32> to vector<128x128xf32>
    %80 = arith.subf %76, %79 : vector<128x128xf32>
    %81 = math.exp %80 : vector<128x128xf32>
    %cst_60 = arith.constant dense<0.000000e+00> : vector<128xf32>
    %82 = vector.multi_reduction <add>, %81, %cst_60 [1] : vector<128x128xf32> to vector<128xf32>
    %83 = vector.shape_cast %82 : vector<128xf32> to vector<128x1xf32>
    %84 = vector.broadcast %83 : vector<128x1xf32> to vector<128x128xf32>
    %85 = arith.divf %81, %84 : vector<128x128xf32>
    %c2_61 = arith.constant 2 : index
    %c0_62 = arith.constant 0 : index
    %c0_63 = arith.constant 0 : index
    %86 = vector.load %arg6[%c2_61, %c0_62, %c0_63] : memref<4x16x32xf32, #tpu.memory_space<vmem>>, vector<1x16x32xf32>
    %87 = vector.shape_cast %86 : vector<1x16x32xf32> to vector<16x32xf32>
    %cst_64 = arith.constant dense<0.000000e+00> : vector<128x32xf32>
    %88 = tpu.matmul %0, %87, %cst_64 {dimension_numbers = #tpu.dot_dimension_numbers<[1], [0], [0], [1], [0, 0, 1, 1], [], []>} : vector<128x16xf32>, vector<16x32xf32>, vector<128x32xf32> -> vector<128x32xf32>
    %cst_65 = arith.constant dense<0.000000e+00> : vector<128x32xf32>
    %89 = tpu.matmul %85, %88, %cst_65 {dimension_numbers = #tpu.dot_dimension_numbers<[1], [0], [0], [1], [0, 0, 1, 1], [], []>} : vector<128x128xf32>, vector<128x32xf32>, vector<128x32xf32> -> vector<128x32xf32>
    %90 = arith.addf %60, %89 : vector<128x32xf32>
    %c3 = arith.constant 3 : index
    %c0_66 = arith.constant 0 : index
    %c0_67 = arith.constant 0 : index
    %91 = vector.load %arg2[%c3, %c0_66, %c0_67] : memref<4x16x8xf32, #tpu.memory_space<vmem>>, vector<1x16x8xf32>
    %92 = vector.shape_cast %91 : vector<1x16x8xf32> to vector<16x8xf32>
    %cst_68 = arith.constant dense<0.000000e+00> : vector<128x8xf32>
    %93 = tpu.matmul %0, %92, %cst_68 {dimension_numbers = #tpu.dot_dimension_numbers<[1], [0], [0], [1], [0, 0, 1, 1], [], []>} : vector<128x16xf32>, vector<16x8xf32>, vector<128x8xf32> -> vector<128x8xf32>
    %c3_69 = arith.constant 3 : index
    %c0_70 = arith.constant 0 : index
    %c0_71 = arith.constant 0 : index
    %94 = vector.load %arg3[%c3_69, %c0_70, %c0_71] : memref<4x1x8xf32, #tpu.memory_space<vmem>>, vector<1x1x8xf32>
    %95 = vector.shape_cast %94 : vector<1x1x8xf32> to vector<1x8xf32>
    %96 = vector.broadcast %95 : vector<1x8xf32> to vector<128x8xf32>
    %97 = arith.addf %93, %96 : vector<128x8xf32>
    %c3_72 = arith.constant 3 : index
    %c0_73 = arith.constant 0 : index
    %c0_74 = arith.constant 0 : index
    %98 = vector.load %arg4[%c3_72, %c0_73, %c0_74] : memref<4x16x8xf32, #tpu.memory_space<vmem>>, vector<1x16x8xf32>
    %99 = vector.shape_cast %98 : vector<1x16x8xf32> to vector<16x8xf32>
    %cst_75 = arith.constant dense<0.000000e+00> : vector<128x8xf32>
    %100 = tpu.matmul %0, %99, %cst_75 {dimension_numbers = #tpu.dot_dimension_numbers<[1], [0], [0], [1], [0, 0, 1, 1], [], []>} : vector<128x16xf32>, vector<16x8xf32>, vector<128x8xf32> -> vector<128x8xf32>
    %c3_76 = arith.constant 3 : index
    %c0_77 = arith.constant 0 : index
    %c0_78 = arith.constant 0 : index
    %101 = vector.load %arg5[%c3_76, %c0_77, %c0_78] : memref<4x1x8xf32, #tpu.memory_space<vmem>>, vector<1x1x8xf32>
    %102 = vector.shape_cast %101 : vector<1x1x8xf32> to vector<1x8xf32>
    %103 = vector.broadcast %102 : vector<1x8xf32> to vector<128x8xf32>
    %104 = arith.addf %100, %103 : vector<128x8xf32>
    %cst_79 = arith.constant dense<0.000000e+00> : vector<128x128xf32>
    %105 = tpu.matmul %97, %104, %cst_79 {dimension_numbers = #tpu.dot_dimension_numbers<[1], [1], [0], [0], [0, 0, 1, 0], [], []>} : vector<128x8xf32>, vector<128x8xf32>, vector<128x128xf32> -> vector<128x128xf32>
    %106 = arith.addf %105, %1 : vector<128x128xf32>
    %cst_80 = arith.constant dense<0xFF800000> : vector<128xf32>
    %107 = vector.multi_reduction <maximumf>, %106, %cst_80 [1] : vector<128x128xf32> to vector<128xf32>
    %108 = vector.shape_cast %107 : vector<128xf32> to vector<128x1xf32>
    %109 = vector.broadcast %108 : vector<128x1xf32> to vector<128x128xf32>
    %110 = arith.subf %106, %109 : vector<128x128xf32>
    %111 = math.exp %110 : vector<128x128xf32>
    %cst_81 = arith.constant dense<0.000000e+00> : vector<128xf32>
    %112 = vector.multi_reduction <add>, %111, %cst_81 [1] : vector<128x128xf32> to vector<128xf32>
    %113 = vector.shape_cast %112 : vector<128xf32> to vector<128x1xf32>
    %114 = vector.broadcast %113 : vector<128x1xf32> to vector<128x128xf32>
    %115 = arith.divf %111, %114 : vector<128x128xf32>
    %c3_82 = arith.constant 3 : index
    %c0_83 = arith.constant 0 : index
    %c0_84 = arith.constant 0 : index
    %116 = vector.load %arg6[%c3_82, %c0_83, %c0_84] : memref<4x16x32xf32, #tpu.memory_space<vmem>>, vector<1x16x32xf32>
    %117 = vector.shape_cast %116 : vector<1x16x32xf32> to vector<16x32xf32>
    %cst_85 = arith.constant dense<0.000000e+00> : vector<128x32xf32>
    %118 = tpu.matmul %0, %117, %cst_85 {dimension_numbers = #tpu.dot_dimension_numbers<[1], [0], [0], [1], [0, 0, 1, 1], [], []>} : vector<128x16xf32>, vector<16x32xf32>, vector<128x32xf32> -> vector<128x32xf32>
    %cst_86 = arith.constant dense<0.000000e+00> : vector<128x32xf32>
    %119 = tpu.matmul %115, %118, %cst_86 {dimension_numbers = #tpu.dot_dimension_numbers<[1], [0], [0], [1], [0, 0, 1, 1], [], []>} : vector<128x128xf32>, vector<128x32xf32>, vector<128x32xf32> -> vector<128x32xf32>
    %120 = arith.addf %90, %119 : vector<128x32xf32>
    %c0_87 = arith.constant 0 : index
    %c0_88 = arith.constant 0 : index
    %121 = vector.load %arg7[%c0_87, %c0_88] : memref<1x32xf32, #tpu.memory_space<vmem>>, vector<1x32xf32>
    %122 = vector.broadcast %121 : vector<1x32xf32> to vector<128x32xf32>
    %123 = arith.addf %120, %122 : vector<128x32xf32>
    %c0_89 = arith.constant 0 : index
    %c0_90 = arith.constant 0 : index
    %124 = vector.load %arg8[%c0_89, %c0_90] : memref<128x32xf32, #tpu.memory_space<vmem>>, vector<128x32xf32>
    tpu.vector_store %arg8[%c0_89, %c0_90], %123 {strides = array<i32>} : memref<128x32xf32, #tpu.memory_space<vmem>>, vector<128x32xf32>,
    return
  }
}

</mosaic_0001>

<bundles_post_ra>
// kernel: interaction_net_forward.1
= control target key start
LH: loop header
LB: loop body
LE: loop exit
PB: predicated region body
PF: predicated region fallthrough
CT: control target
= control target key end

     0   :  { %13 = vsyncpa [#allocation3], 0  ;;  %s8202_s0 = inlined_call_operand.vmem [shape: f32[128,16], index: 0, kind: input, shape index: {}]   ;;  %s8203_s1 = inlined_call_operand.hbm [shape: f32[128,128], index: 1, kind: input, shape index: {}]   ;;  %s8204_s2 = inlined_call_operand.vmem [shape: f32[4,16,8], index: 2, kind: input, shape index: {}]   ;;  %s8205_s3 = inlined_call_operand.vmem [shape: f32[4,1,8], index: 3, kind: input, shape index: {}]   ;;  %s8206_s4 = inlined_call_operand.vmem [shape: f32[4,16,8], index: 4, kind: input, shape index: {}]   ;;  %s8207_s5 = inlined_call_operand.hbm [shape: f32[4,1,8], index: 5, kind: input, shape index: {}]   ;;  %s8208_s6 = inlined_call_operand.vmem [shape: f32[4,16,32], index: 6, kind: input, shape index: {}]   ;;  %s8209_s7 = inlined_call_operand.vmem [shape: f32[1,32], index: 7, kind: input, shape index: {}]   ;;  %s8210_s8 = inlined_call_operand.vmem [shape: f32[128,32], index: 8, kind: output, shape index: {}]  }
   0x1   :  { %14 = vsyncpa [#allocation5], 0  ;;  %s6132_s27 = smov [#allocation2]  }
   0x2   :  { %s22_s28 = sshll.u32 %s6132_s27, 4  ;;  %s23_s28 = int_to_ptr.vmem [resolvable:$true] %s22_s28 }
   0x3   :  { %s6096_s29 = scalar_lea.vmem %s23_s28, 2048  ;;  %p6101_p1 = scmp.lt.s32.totalorder %s23_s28, %s23_s28 }
   0x4   :  { %p6097_p0 = scmp.ne.s32.totalorder %s23_s28, %s6096_s29  ;;  %p6102_p2 = scmp.lt.s32.totalorder %s6096_s29, %s6096_s29 }
   0x6   :  { %p6103_p3 = por %p6102_p2, %p6101_p1 }
   0x8   :  { %p6104_p4 = pnand %p6103_p3, %p6097_p0 }
   0xa   :  { %6107 = shalt.err (!%p6104_p4)
}
   0xb   :  { %s6133_s30 = smov 128   ;;  %s6134_s9 = smov 8  }
   0xc   :  { %28 = dma.hbm_to_vmem [thread:$0]  %s8203_s1, 2048, %s23_s28, [#allocation3], %s6133_s30, %s6133_s30, %s6134_s9  }
   0xd   :  { %s6135_s12 = smov [#allocation4]  }
   0xe   :  { %s40_s13 = sshll.u32 %s6135_s12, 4  ;;  %s41_s13 = int_to_ptr.vmem [resolvable:$true] %s40_s13 }
   0xf   :  { %s6116_s14 = scalar_lea.vmem %s41_s13, 64  ;;  %p6121_p6 = scmp.lt.s32.totalorder %s41_s13, %s41_s13 }
  0x10   :  { %p6117_p5 = scmp.ne.s32.totalorder %s41_s13, %s6116_s14  ;;  %p6122_p7 = scmp.lt.s32.totalorder %s6116_s14, %s6116_s14 }
  0x12   :  { %p6123_p8 = por %p6122_p7, %p6121_p6 }
  0x14   :  { %p6124_p9 = pnand %p6123_p8, %p6117_p5 }
  0x16   :  { %6127 = shalt.err (!%p6124_p9)
}
  0x17   :  { %s6136_s15 = smov 16   ;;  %s6137_s16 = smov 1  }
  0x18   :  { %46 = dma.hbm_to_vmem [thread:$0]  %s8207_s5, 64, %s41_s13, [#allocation5], %s6136_s15, %s6136_s15, %s6137_s16  }
  0x19   :  { %6128 = dma.done.wait [#allocation3], 2048  }
  0x1a   :  { %6129 = vsyncadd [#allocation3], 4294965248 }
  0x1b   :  { %6130 = dma.done.wait [#allocation5], 64  }
  0x1c   :  { %6131 = vsyncadd [#allocation5], 4294967232  ;;  %vm98_vm0 = vcmask 130048   ;;  %v293_v0 = vld [vmem:[%s8206_s4 + $0x8] sm:$0xff]  ;;  %v292_v1 = vld [vmem:[%s8206_s4] sm:$0xff]  ;;  %vm446_vm1 = vcmask 64512  }
  0x1d   :  { %v6198_v2 = vld [vmem:[%s8202_s0] sm:$0xff]  ;;  %5022 = vmatprep.subr.mxu1 %v293_v0  ;;  %v6205_v3 = vld [vmem:[%s8202_s0 + $0x8] sm:$0xff]  ;;  %v6212_v4 = vld [vmem:[%s8202_s0 + $0x10] sm:$0xff]  ;;  %vm4149_vm2 = vcmask 261120  }
  0x1e   :  { %5026 = vmatprep.mubr.msk.f32.mxu1 %vm98_vm0, %v6198_v2  ;;  %5023 = vmatpush3.msra.mxu1 %v293_v0  ;;  %v6221_v5 = vld [vmem:[%s8202_s0 + $0x18] sm:$0xff]  ;;  %v90_v6 = vld [vmem:[%s8204_s2 + $0x8] sm:$0xff]  ;;  %v89_v7 = vld [vmem:[%s8204_s2] sm:$0xff] }
  0x1f   :  { %4998 = vmatprep.mubr.msk.f32.mxu0 %vm98_vm0, %v6198_v2  ;;  %5024 = vmatprep.subr.mxu1 %v292_v1  ;;  %v6232_v8 = vld [vmem:[%s8202_s0 + $0x20] sm:$0xff]  ;;  %v6241_v9 = vld [vmem:[%s8202_s0 + $0x28] sm:$0xff]  ;;  %v6246_v10 = vld [vmem:[%s8202_s0 + $0x30] sm:$0xff] }
  0x20   :  { %5025 = vmatpush3.msra.mxu1 %v292_v1  ;;  %4994 = vmatprep.subr.mxu0 %v90_v6  ;;  %v6259_v11 = vld [vmem:[%s8202_s0 + $0x38] sm:$0xff]  ;;  %v6264_v12 = vld [vmem:[%s8202_s0 + $0x40] sm:$0xff]  ;;  %v6277_v13 = vld [vmem:[%s8202_s0 + $0x48] sm:$0xff] }
  0x21   :  { %5027 = vmatmul.mubr.msk.f32.vlgmr.msra.gmra.mxu1 %vm98_vm0, %v6205_v3  ;;  %4995 = vmatpush3.msra.mxu0 %v90_v6  ;;  %v6282_v14 = vld [vmem:[%s8202_s0 + $0x50] sm:$0xff]  ;;  %v6295_v15 = vld [vmem:[%s8202_s0 + $0x58] sm:$0xff]  ;;  %v6300_v16 = vld [vmem:[%s8202_s0 + $0x60] sm:$0xff] }
  0x22   :  { %5029 = vmatprep.mubr.msk.f32.mxu1 %vm98_vm0, %v6212_v4  ;;  %4996 = vmatprep.subr.mxu0 %v89_v7  ;;  %v6313_v17 = vld [vmem:[%s8202_s0 + $0x68] sm:$0xff]  ;;  %v6318_v18 = vld [vmem:[%s8202_s0 + $0x70] sm:$0xff]  ;;  %v6331_v19 = vld [vmem:[%s8202_s0 + $0x78] sm:$0xff] }
  0x23   :  { %4997 = vmatpush3.msra.mxu0 %v89_v7  ;;  %v6356_v23 = vld [vmem:[%s8205_s3] ss:$0 sm:$0xff]  ;;  %v833_v37 = vld [vmem:[%s8208_s6 + $0x8] sm:$0xff]  ;;  %v4255_v41 = vld [vmem:[%s8204_s2 + $0x18] sm:$0xff] }
  0x24   :  { %4999 = vmatmul.mubr.msk.f32.vlgmr.msra.gmra.mxu0 %vm98_vm0, %v6205_v3  ;;  %5106 = vmatprep.subr.mxu1 %v833_v37  ;;  %v832_v40 = vld [vmem:[%s8208_s6] sm:$0xff]  ;;  %v4254_v46 = vld [vmem:[%s8204_s2 + $0x10] sm:$0xff] }
  0x25   :  { %5030 = vmatmul.mubr.msk.f32.gmra.mxu1 %vm98_vm0, %v6221_v5  ;;  %5001 = vmatprep.mubr.msk.f32.mxu0 %vm98_vm0, %v6212_v4  ;;  %v6380_v42 = vld [vmem:[#allocation4] ss:$0 sm:$0xff] }
  0x26   :  { %5032 = vmatprep.mubr.msk.f32.mxu1 %vm98_vm0, %v6232_v8  ;;  %5107 = vmatpush3.msra.mxu1 %v833_v37 }
  0x27   :  { %5108 = vmatprep.subr.mxu1 %v832_v40 }
  0x28   :  { %5002 = vmatmul.mubr.msk.f32.gmra.mxu0 %vm98_vm0, %v6221_v5  ;;  %5109 = vmatpush3.msra.mxu1 %v832_v40 }
  0x29   :  { %5033 = vmatmul.mubr.msk.f32.gmra.mxu1 %vm98_vm0, %v6241_v9  ;;  %5004 = vmatprep.mubr.msk.f32.mxu0 %vm98_vm0, %v6232_v8 }
  0x2a   :  { %5035 = vmatprep.mubr.msk.f32.mxu1 %vm98_vm0, %v6246_v10  ;;  %5134 = vmatprep.subr.mxu1 %v4255_v41 }
  0x2c   :  { %5005 = vmatmul.mubr.msk.f32.gmra.mxu0 %vm98_vm0, %v6241_v9 }
  0x2d   :  { %5036 = vmatmul.mubr.msk.f32.gmra.mxu1 %vm98_vm0, %v6259_v11  ;;  %5007 = vmatprep.mubr.msk.f32.mxu0 %vm98_vm0, %v6246_v10 }
  0x2e   :  { %5038 = vmatprep.mubr.msk.f32.mxu1 %vm98_vm0, %v6264_v12 }
  0x30   :  { %5008 = vmatmul.mubr.msk.f32.gmra.mxu0 %vm98_vm0, %v6259_v11 }
  0x31   :  { %5039 = vmatmul.mubr.msk.f32.gmra.mxu1 %vm98_vm0, %v6277_v13  ;;  %5010 = vmatprep.mubr.msk.f32.mxu0 %vm98_vm0, %v6264_v12 }
  0x32   :  { %5041 = vmatprep.mubr.msk.f32.mxu1 %vm98_vm0, %v6282_v14 }
  0x34   :  { %5011 = vmatmul.mubr.msk.f32.gmra.mxu0 %vm98_vm0, %v6277_v13 }
  0x35   :  { %5042 = vmatmul.mubr.msk.f32.gmra.mxu1 %vm98_vm0, %v6295_v15  ;;  %5013 = vmatprep.mubr.msk.f32.mxu0 %vm98_vm0, %v6282_v14 }
  0x36   :  { %5044 = vmatprep.mubr.msk.f32.mxu1 %vm98_vm0, %v6300_v16 }
  0x38   :  { %5014 = vmatmul.mubr.msk.f32.gmra.mxu0 %vm98_vm0, %v6295_v15 }
  0x39   :  { %5045 = vmatmul.mubr.msk.f32.gmra.mxu1 %vm98_vm0, %v6313_v17  ;;  %5016 = vmatprep.mubr.msk.f32.mxu0 %vm98_vm0, %v6300_v16 }
  0x3a   :  { %5047 = vmatprep.mubr.msk.f32.mxu1 %vm98_vm0, %v6318_v18 }
  0x3c   :  { %5017 = vmatmul.mubr.msk.f32.gmra.mxu0 %vm98_vm0, %v6313_v17 }
  0x3d   :  { %5048 = vmatmul.mubr.msk.f32.gmra.mxu1 %vm98_vm0, %v6331_v19  ;;  %5019 = vmatprep.mubr.msk.f32.mxu0 %vm98_vm0, %v6318_v18 }
  0x3e   :  { %5110 = vmatprep.mubr.msk.f32.mxu1 %vm98_vm0, %v6198_v2 }
  0x40   :  { %5020 = vmatmul.mubr.msk.f32.gmra.mxu0 %vm98_vm0, %v6331_v19 }
  0x41   :  { %5111 = vmatmul.mubr.msk.f32.vlgmr.msra.gmra.mxu1 %vm98_vm0, %v6205_v3 }
  0x42   :  { %5135 = vmatpush3.msra.mxu1 %v4255_v41  ;;  %5113 = vmatprep.mubr.msk.f32.mxu1 %vm98_vm0, %v6212_v4 }
  0x43   :  { %5136 = vmatprep.subr.mxu1 %v4254_v46 }
  0x44   :  { %5137 = vmatpush3.msra.mxu1 %v4254_v46 }
  0x45   :  { %5114 = vmatmul.mubr.msk.f32.gmra.mxu1 %vm98_vm0, %v6221_v5 }
  0x46   :  { %5116 = vmatprep.mubr.msk.f32.mxu1 %vm98_vm0, %v6232_v8 }
  0x49   :  { %5117 = vmatmul.mubr.msk.f32.gmra.mxu1 %vm98_vm0, %v6241_v9 }
  0x4a   :  { %5119 = vmatprep.mubr.msk.f32.mxu1 %vm98_vm0, %v6246_v10 }
  0x4d   :  { %5120 = vmatmul.mubr.msk.f32.gmra.mxu1 %vm98_vm0, %v6259_v11 }
  0x4e   :  { %5122 = vmatprep.mubr.msk.f32.mxu1 %vm98_vm0, %v6264_v12 }
  0x51   :  { %5123 = vmatmul.mubr.msk.f32.gmra.mxu1 %vm98_vm0, %v6277_v13 }
  0x52   :  { %5125 = vmatprep.mubr.msk.f32.mxu1 %vm98_vm0, %v6282_v14 }
  0x55   :  { %5126 = vmatmul.mubr.msk.f32.gmra.mxu1 %vm98_vm0, %v6295_v15 }
  0x56   :  { %5128 = vmatprep.mubr.msk.f32.mxu1 %vm98_vm0, %v6300_v16 }
  0x59   :  { %5129 = vmatmul.mubr.msk.f32.gmra.mxu1 %vm98_vm0, %v6313_v17 }
  0x5a   :  { %5131 = vmatprep.mubr.msk.f32.mxu1 %vm98_vm0, %v6318_v18 }
  0x5d   :  { %5132 = vmatmul.mubr.msk.f32.gmra.mxu1 %vm98_vm0, %v6331_v19 }
  0x5e   :  { %5138 = vmatprep.mubr.msk.f32.mxu1 %vm98_vm0, %v6198_v2 }
  0x61   :  { %5139 = vmatmul.mubr.msk.f32.vlgmr.msra.gmra.mxu1 %vm98_vm0, %v6205_v3 }
  0x62   :  { %5141 = vmatprep.mubr.msk.f32.mxu1 %vm98_vm0, %v6212_v4 }
  0x65   :  { %5142 = vmatmul.mubr.msk.f32.gmra.mxu1 %vm98_vm0, %v6221_v5 }
  0x66   :  { %5144 = vmatprep.mubr.msk.f32.mxu1 %vm98_vm0, %v6232_v8 }
  0x69   :  { %5145 = vmatmul.mubr.msk.f32.gmra.mxu1 %vm98_vm0, %v6241_v9 }
  0x6a   :  { %5147 = vmatprep.mubr.msk.f32.mxu1 %vm98_vm0, %v6246_v10 }
  0x6d   :  { %5148 = vmatmul.mubr.msk.f32.gmra.mxu1 %vm98_vm0, %v6259_v11 }
  0x6e   :  { %5150 = vmatprep.mubr.msk.f32.mxu1 %vm98_vm0, %v6264_v12 }
  0x71   :  { %5151 = vmatmul.mubr.msk.f32.gmra.mxu1 %vm98_vm0, %v6277_v13 }
  0x72   :  { %5153 = vmatprep.mubr.msk.f32.mxu1 %vm98_vm0, %v6282_v14 }
  0x75   :  { %5154 = vmatmul.mubr.msk.f32.gmra.mxu1 %vm98_vm0, %v6295_v15 }
  0x76   :  { %5156 = vmatprep.mubr.msk.f32.mxu1 %vm98_vm0, %v6300_v16 }
  0x79   :  { %5157 = vmatmul.mubr.msk.f32.gmra.mxu1 %vm98_vm0, %v6313_v17 }
  0x7a   :  { %5159 = vmatprep.mubr.msk.f32.mxu1 %vm98_vm0, %v6318_v18 }
  0x7d   :  { %5160 = vmatmul.mubr.msk.f32.gmra.mxu1 %vm98_vm0, %v6331_v19 }
  0xe1   :  { %v6347_v20 = vpop.f32.mrf.mxu1 }
  0xe2   :  { %v373_v6 = vadd.f32 %v6347_v20, %v6380_v42 }
  0xe3   :  { %v6349_v21 = vpop.f32.mrf.mxu1 }
  0xe4   :  { %v5000_v25 = vpop.f32.mrf.mxu0 }
  0xe5   :  { %v6351_v22 = vpop.f32.mrf.mxu1  ;;  %v6361_v26 = vadd.f32 %v5000_v25, %v6356_v23 }
  0xe6   :  { %v213_v28 = vpop.f32.mrf.mxu0  ;;  %v383_v62 = vadd.f32 %v6351_v22, %v6380_v42  ;;  %v368_v22 = vadd.f32 %v6380_v42, %v6349_v21 }
  0xe7   :  { %v6358_v24 = vpop.f32.mrf.mxu1  ;;  %v214_v29 = vadd.f32 %v6356_v23, %v213_v28 }
  0xe8   :  { %v5003_v55 = vpop.f32.mrf.mxu0  ;;  %v378_v0 = vadd.f32 %v6380_v42, %v6358_v24  ;;  %v4275_v24 = vld [vmem:[%s8206_s4 + $0x18] sm:$0xff] }
  0xe9   :  { %v6363_v27 = vpop.f32.mrf.mxu1  ;;  %5082 = vmatprep.mubr.msk.f32.mxu0 %vm446_vm1, %v214_v29  ;;  %v229_v29 = vadd.f32 %v5003_v55, %v6356_v23  ;;  %v6621_v55 = vld [vmem:[#allocation2 + $0x10] sm:$0xff] }
  0xea   :  { %v223_v57 = vpop.f32.mrf.mxu0  ;;  %v393_v58 = vadd.f32 %v6363_v27, %v6380_v42  ;;  %v4274_v27 = vld [vmem:[%s8206_s4 + $0x10] sm:$0xff] }
  0xeb   :  { %v6366_v30 = vpop.f32.mrf.mxu1  ;;  %v224_v25 = vadd.f32 %v6356_v23, %v223_v57 }
  0xec   :  { %v5006_v59 = vpop.f32.mrf.mxu0  ;;  %v388_v60 = vadd.f32 %v6380_v42, %v6366_v30 }
  0xed   :  { %v5037_v31 = vpop.f32.mrf.mxu1 }
  0xee   :  { %v403_v54 = vadd.f32 %v5037_v31, %v6380_v42  ;;  %v233_v61 = vpop.f32.mrf.mxu0 }
  0xef   :  { %v6369_v32 = vpop.f32.mrf.mxu1  ;;  %v234_v28 = vadd.f32 %v6356_v23, %v233_v61  ;;  %v6632_v61 = vld [vmem:[#allocation2 + $0x20] sm:$0xff] }
  0xf0   :  { %v398_v56 = vadd.f32 %v6380_v42, %v6369_v32  ;;  %v5009_v63 = vpop.f32.mrf.mxu0  ;;  %v239_v32 = vadd.f32 %v5006_v59, %v6356_v23  ;;  %v6630_v59 = vld [vmem:[#allocation2 + $0x18] sm:$0xff] }
  0xf1   :  { %v5040_v33 = vpop.f32.mrf.mxu1 }
  0xf2   :  { %v413_v52 = vadd.f32 %v5040_v33, %v6380_v42  ;;  %v243_v1 = vpop.f32.mrf.mxu0 }
  0xf3   :  { %v407_v34 = vpop.f32.mrf.mxu1  ;;  %v244_v31 = vadd.f32 %v6356_v23, %v243_v1  ;;  %v6642_v1 = vld [vmem:[#allocation2 + $0x28] sm:$0xff] }
  0xf4   :  { %v408_v53 = vadd.f32 %v6380_v42, %v407_v34  ;;  %v5012_v7 = vpop.f32.mrf.mxu0  ;;  %v249_v34 = vadd.f32 %v5009_v63, %v6356_v23 }
  0xf5   :  { %v5043_v35 = vpop.f32.mrf.mxu1  ;;  %v259_v37 = vadd.f32 %v5012_v7, %v6356_v23  ;;  %v6644_v7 = vld [vmem:[#allocation2 + $0x30] sm:$0xff] }
  0xf6   :  { %v423_v50 = vadd.f32 %v5043_v35, %v6380_v42  ;;  %v253_v20 = vpop.f32.mrf.mxu0 }
  0xf7   :  { %v417_v36 = vpop.f32.mrf.mxu1 }
  0xf8   :  { %v418_v51 = vadd.f32 %v6380_v42, %v417_v36  ;;  %v5015_v21 = vpop.f32.mrf.mxu0 }
  0xf9   :  { %v5046_v38 = vpop.f32.mrf.mxu1  ;;  %v269_v40 = vadd.f32 %v5015_v21, %v6356_v23 }
  0xfa   :  { %v433_v48 = vadd.f32 %v5046_v38, %v6380_v42  ;;  %v263_v30 = vpop.f32.mrf.mxu0 }
  0xfb   :  { %v427_v39 = vpop.f32.mrf.mxu1  ;;  %v264_v36 = vadd.f32 %v6356_v23, %v263_v30 }
  0xfc   :  { %v428_v49 = vadd.f32 %v6380_v42, %v427_v39  ;;  %v5018_v33 = vpop.f32.mrf.mxu0 }
  0xfd   :  { %v5049_v43 = vpop.f32.mrf.mxu1 }
  0xfe   :  { %v443_v44 = vadd.f32 %v5049_v43, %v6380_v42  ;;  %v273_v35 = vpop.f32.mrf.mxu0  ;;  %v279_v43 = vadd.f32 %v5018_v33, %v6356_v23  ;;  %v6668_v33 = vld [vmem:[#allocation2 + $0x50] sm:$0xff] }
  0xff   :  { %v437_v45 = vpop.f32.mrf.mxu1  ;;  %v274_v39 = vadd.f32 %v6356_v23, %v273_v35  ;;  %8237 = vst [vmem:[#allocation10_spill] sm:$0xff] %v6668_v33 }
 0x100   :  { %v438_v47 = vadd.f32 %v6380_v42, %v437_v45  ;;  %5050 = vmatprep.subr.msk.mxu0 %vm446_vm1, %v443_v44  ;;  %v5021_v38 = vpop.f32.mrf.mxu0 }
 0x101   :  { %5051 = vmatpush3.xpose.msk.msra.mxu0 %vm446_vm1, %v443_v44  ;;  %v289_v44 = vadd.f32 %v5021_v38, %v6356_v23  ;;  %v6680_v38 = vld [vmem:[#allocation2 + $0x60] sm:$0xff] }
 0x102   :  { %5052 = vmatprep.subr.msk.mxu0 %vm446_vm1, %v438_v47  ;;  %v283_v41 = vpop.f32.mrf.mxu0  ;;  %8239 = vst [vmem:[#allocation12_spill] sm:$0xff] %v6680_v38 }
 0x103   :  { %v284_v42 = vadd.f32 %v6356_v23, %v283_v41 }
 0x105   :  { %5053 = vmatpush3.xpose.msk.msra.mxu0 %vm446_vm1, %v438_v47 }
 0x106   :  { %5054 = vmatprep.subr.msk.mxu0 %vm446_vm1, %v433_v48 }
 0x109   :  { %5055 = vmatpush3.xpose.msk.msra.mxu0 %vm446_vm1, %v433_v48 }
 0x10a   :  { %5056 = vmatprep.subr.msk.mxu0 %vm446_vm1, %v428_v49 }
 0x10d   :  { %5057 = vmatpush3.xpose.msk.msra.mxu0 %vm446_vm1, %v428_v49 }
 0x10e   :  { %5058 = vmatprep.subr.msk.mxu0 %vm446_vm1, %v423_v50 }
 0x111   :  { %5059 = vmatpush3.xpose.msk.msra.mxu0 %vm446_vm1, %v423_v50  ;;  %v6614_v50 = vld [vmem:[#allocation2] sm:$0xff] }
 0x112   :  { %5060 = vmatprep.subr.msk.mxu0 %vm446_vm1, %v418_v51 }
 0x115   :  { %5061 = vmatpush3.xpose.msk.msra.mxu0 %vm446_vm1, %v418_v51 }
 0x116   :  { %5062 = vmatprep.subr.msk.mxu0 %vm446_vm1, %v413_v52 }
 0x119   :  { %5063 = vmatpush3.xpose.msk.msra.mxu0 %vm446_vm1, %v413_v52 }
 0x11a   :  { %5064 = vmatprep.subr.msk.mxu0 %vm446_vm1, %v408_v53 }
 0x11d   :  { %5065 = vmatpush3.xpose.msk.msra.mxu0 %vm446_vm1, %v408_v53  ;;  %v6619_v53 = vld [vmem:[#allocation2 + $0x8] sm:$0xff] }
 0x11e   :  { %5066 = vmatprep.subr.msk.mxu0 %vm446_vm1, %v403_v54 }
 0x121   :  { %5067 = vmatpush3.xpose.msk.msra.mxu0 %vm446_vm1, %v403_v54 }
 0x122   :  { %5068 = vmatprep.subr.msk.mxu0 %vm446_vm1, %v398_v56 }
 0x125   :  { %5069 = vmatpush3.xpose.msk.msra.mxu0 %vm446_vm1, %v398_v56 }
 0x126   :  { %5070 = vmatprep.subr.msk.mxu0 %vm446_vm1, %v393_v58 }
 0x129   :  { %5071 = vmatpush3.xpose.msk.msra.mxu0 %vm446_vm1, %v393_v58 }
 0x12a   :  { %5072 = vmatprep.subr.msk.mxu0 %vm446_vm1, %v388_v60 }
 0x12d   :  { %5073 = vmatpush3.xpose.msk.msra.mxu0 %vm446_vm1, %v388_v60 }
 0x12e   :  { %5074 = vmatprep.subr.msk.mxu0 %vm446_vm1, %v383_v62 }
 0x131   :  { %5075 = vmatpush3.xpose.msk.msra.mxu0 %vm446_vm1, %v383_v62 }
 0x132   :  { %5076 = vmatprep.subr.msk.mxu0 %vm446_vm1, %v378_v0 }
 0x135   :  { %5077 = vmatpush3.xpose.msk.msra.mxu0 %vm446_vm1, %v378_v0 }
 0x136   :  { %5078 = vmatprep.subr.msk.mxu0 %vm446_vm1, %v373_v6 }
 0x139   :  { %5079 = vmatpush3.xpose.msk.msra.mxu0 %vm446_vm1, %v373_v6 }
 0x13a   :  { %5080 = vmatprep.subr.msk.mxu0 %vm446_vm1, %v368_v22 }
 0x13d   :  { %5081 = vmatpush3.xpose.msk.msra.mxu0 %vm446_vm1, %v368_v22 }
 0x13e   :  { %5162 = vmatprep.subr.mxu0 %v4275_v24 }
 0x140   :  { %5083 = vmatmul.mubr.msk.f32.vlgmr.msra.gmra.mxu0 %vm446_vm1, %v6361_v26  ;;  %v254_v26 = vadd.f32 %v6356_v23, %v253_v20  ;;  %v6607_v23 = vld [vmem:[%s8205_s3 + $0x1] ss:$0 sm:$0xff] }
 0x141   :  { %5163 = vmatpush3.msra.mxu0 %v4275_v24  ;;  %5085 = vmatprep.mubr.msk.f32.mxu0 %vm446_vm1, %v224_v25  ;;  %v6654_v25 = vld [vmem:[#allocation2 + $0x38] sm:$0xff] }
 0x142   :  { %5164 = vmatprep.subr.mxu0 %v4274_v27 }
 0x143   :  { %5165 = vmatpush3.msra.mxu0 %v4274_v27  ;;  %v6656_v27 = vld [vmem:[#allocation2 + $0x40] sm:$0xff] }
 0x144   :  { %5086 = vmatmul.mubr.msk.f32.gmra.mxu0 %vm446_vm1, %v229_v29  ;;  %8235 = vst [vmem:[#allocation8_spill] sm:$0xff] %v6656_v27 }
 0x145   :  { %5088 = vmatprep.mubr.msk.f32.mxu0 %vm446_vm1, %v234_v28 }
 0x148   :  { %5089 = vmatmul.mubr.msk.f32.gmra.mxu0 %vm446_vm1, %v239_v32 }
 0x149   :  { %5091 = vmatprep.mubr.msk.f32.mxu0 %vm446_vm1, %v244_v31  ;;  %v6666_v31 = vld [vmem:[#allocation2 + $0x48] sm:$0xff] }
 0x14a   :  { %8236 = vst [vmem:[#allocation9_spill] sm:$0xff] %v6666_v31 }
 0x14c   :  { %5092 = vmatmul.mubr.msk.f32.gmra.mxu0 %vm446_vm1, %v249_v34 }
 0x14d   :  { %5094 = vmatprep.mubr.msk.f32.mxu0 %vm446_vm1, %v254_v26 }
 0x150   :  { %5095 = vmatmul.mubr.msk.f32.gmra.mxu0 %vm446_vm1, %v259_v37 }
 0x151   :  { %5097 = vmatprep.mubr.msk.f32.mxu0 %vm446_vm1, %v264_v36  ;;  %v6678_v36 = vld [vmem:[#allocation2 + $0x58] sm:$0xff] }
 0x152   :  { %8238 = vst [vmem:[#allocation11_spill] sm:$0xff] %v6678_v36 }
 0x154   :  { %5098 = vmatmul.mubr.msk.f32.gmra.mxu0 %vm446_vm1, %v269_v40 }
 0x155   :  { %5100 = vmatprep.mubr.msk.f32.mxu0 %vm446_vm1, %v274_v39 }
 0x158   :  { %5101 = vmatmul.mubr.msk.f32.gmra.mxu0 %vm446_vm1, %v279_v43 }
 0x159   :  { %5103 = vmatprep.mubr.msk.f32.mxu0 %vm446_vm1, %v284_v42  ;;  %v6690_v42 = vld [vmem:[#allocation2 + $0x68] sm:$0xff] }
 0x15a   :  { %8240 = vst [vmem:[#allocation13_spill] sm:$0xff] %v6690_v42 }
 0x15c   :  { %5104 = vmatmul.mubr.msk.f32.gmra.mxu0 %vm446_vm1, %v289_v44  ;;  %v6692_v44 = vld [vmem:[#allocation2 + $0x70] sm:$0xff] }
 0x15d   :  { %5166 = vmatprep.mubr.msk.f32.mxu0 %vm98_vm0, %v6198_v2  ;;  %8241 = vst [vmem:[#allocation14_spill] sm:$0xff] %v6692_v44 }
 0x160   :  { %5167 = vmatmul.mubr.msk.f32.vlgmr.msra.gmra.mxu0 %vm98_vm0, %v6205_v3  ;;  %v6572_v3 = vpop.f32.mrf.mxu1 }
 0x161   :  { %5169 = vmatprep.mubr.msk.f32.mxu0 %vm98_vm0, %v6212_v4 }
 0x162   :  { %v6574_v4 = vpop.f32.mrf.mxu1 }
 0x164   :  { %5170 = vmatmul.mubr.msk.f32.gmra.mxu0 %vm98_vm0, %v6221_v5  ;;  %v6576_v5 = vpop.f32.mrf.mxu1 }
 0x165   :  { %5172 = vmatprep.mubr.msk.f32.mxu0 %vm98_vm0, %v6232_v8 }
 0x166   :  { %v6578_v8 = vpop.f32.mrf.mxu1 }
 0x168   :  { %5173 = vmatmul.mubr.msk.f32.gmra.mxu0 %vm98_vm0, %v6241_v9  ;;  %v6580_v9 = vpop.f32.mrf.mxu1 }
 0x169   :  { %5175 = vmatprep.mubr.msk.f32.mxu0 %vm98_vm0, %v6246_v10 }
 0x16a   :  { %v6582_v10 = vpop.f32.mrf.mxu1 }
 0x16c   :  { %5176 = vmatmul.mubr.msk.f32.gmra.mxu0 %vm98_vm0, %v6259_v11  ;;  %v6584_v11 = vpop.f32.mrf.mxu1 }
 0x16d   :  { %5178 = vmatprep.mubr.msk.f32.mxu0 %vm98_vm0, %v6264_v12 }
 0x16e   :  { %v6586_v12 = vpop.f32.mrf.mxu1 }
 0x170   :  { %5179 = vmatmul.mubr.msk.f32.gmra.mxu0 %vm98_vm0, %v6277_v13  ;;  %v6588_v13 = vpop.f32.mrf.mxu1 }
 0x171   :  { %5181 = vmatprep.mubr.msk.f32.mxu0 %vm98_vm0, %v6282_v14 }
 0x172   :  { %v6590_v14 = vpop.f32.mrf.mxu1 }
 0x174   :  { %5182 = vmatmul.mubr.msk.f32.gmra.mxu0 %vm98_vm0, %v6295_v15 }
 0x175   :  { %5184 = vmatprep.mubr.msk.f32.mxu0 %vm98_vm0, %v6300_v16 }
 0x178   :  { %5185 = vmatmul.mubr.msk.f32.gmra.mxu0 %vm98_vm0, %v6313_v17 }
 0x179   :  { %5187 = vmatprep.mubr.msk.f32.mxu0 %vm98_vm0, %v6318_v18 }
 0x17c   :  { %5188 = vmatmul.mubr.msk.f32.gmra.mxu0 %vm98_vm0, %v6331_v19 }
 0x17d   :  { %5250 = vmatprep.mubr.msk.f32.mxu0 %vm98_vm0, %v6198_v2  ;;  %v6592_v2 = vpop.f32.mrf.mxu1 }
 0x17f   :  { %v6594_v15 = vpop.f32.mrf.mxu1 }
 0x181   :  { %v6596_v16 = vpop.f32.mrf.mxu1 }
 0x183   :  { %v6598_v17 = vpop.f32.mrf.mxu1 }
 0x185   :  { %v6600_v18 = vpop.f32.mrf.mxu1 }
 0x187   :  { %v6602_v19 = vpop.f32.mrf.mxu1 }
 0x189   :  { %v5140_v45 = vpop.f32.mrf.mxu1 }
 0x18a   :  { %v6610_v46 = vadd.f32 %v5140_v45, %v6607_v23 }
 0x18b   :  { %v1056_v47 = vpop.f32.mrf.mxu1 }
 0x18c   :  { %v1057_v48 = vadd.f32 %v6607_v23, %v1056_v47 }
 0x18e   :  { %5222 = vmatprep.mubr.msk.f32.mxu1 %vm446_vm1, %v1057_v48 }
 0x200   :  { %v5084_v49 = vpop.f32.mrf.mxu0 }
 0x201   :  { %v6625_v57 = vadd.f32 %v5084_v49, %v6619_v53  ;;  %v6702_v49 = vld [vmem:[#allocation2 + $0x78] sm:$0xff] }
 0x202   :  { %v609_v51 = vpop.f32.mrf.mxu0  ;;  %8242 = vst [vmem:[#allocation15_spill] sm:$0xff] %v6702_v49 }
 0x203   :  { %v6617_v52 = vadd.f32 %v609_v51, %v6614_v50 }
 0x204   :  { %v5087_v54 = vpop.f32.mrf.mxu0 }
 0x205   :  { %688 = vmax.xlane.f32.xlu0 %v6617_v52  ;;  %v6637_v63 = vadd.f32 %v5087_v54, %v6630_v59 }
 0x206   :  { %v619_v56 = vpop.f32.mrf.mxu0 }
 0x207   :  { %v6628_v58 = vadd.f32 %v619_v56, %v6621_v55 }
 0x208   :  { %v5090_v60 = vpop.f32.mrf.mxu0 }
 0x209   :  { %692 = vmax.xlane.f32.xlu1 %v6628_v58  ;;  %690 = vmax.xlane.f32.xlu0 %v6625_v57  ;;  %v6649_v20 = vadd.f32 %v5090_v60, %v6642_v1 }
 0x20a   :  { %v629_v62 = vpop.f32.mrf.mxu0 }
 0x20b   :  { %v6640_v0 = vadd.f32 %v629_v62, %v6632_v61 }
 0x20c   :  { %v5093_v6 = vpop.f32.mrf.mxu0 }
 0x20d   :  { %694 = vmax.xlane.f32.xlu1 %v6637_v63  ;;  %696 = vmax.xlane.f32.xlu0 %v6640_v0  ;;  %v6661_v29 = vadd.f32 %v5093_v6, %v6654_v25 }
 0x20e   :  { %v639_v22 = vpop.f32.mrf.mxu0 }
 0x20f   :  { %v6652_v24 = vadd.f32 %v639_v22, %v6644_v7 }
 0x210   :  { %v5096_v21 = vpop.f32.mrf.mxu0 }
 0x211   :  { %698 = vmax.xlane.f32.xlu1 %v6649_v20  ;;  %700 = vmax.xlane.f32.xlu0 %v6652_v24  ;;  %v6673_v34 = vadd.f32 %v5096_v21, %v6666_v31 }
 0x212   :  { %v649_v28 = vpop.f32.mrf.mxu0 }
 0x213   :  { %v6664_v30 = vadd.f32 %v649_v28, %v6656_v27 }
 0x214   :  { %v5099_v32 = vpop.f32.mrf.mxu0 }
 0x215   :  { %702 = vmax.xlane.f32.xlu1 %v6661_v29  ;;  %704 = vmax.xlane.f32.xlu0 %v6664_v30  ;;  %v6685_v40 = vadd.f32 %v5099_v32, %v6678_v36 }
 0x216   :  { %v659_v26 = vpop.f32.mrf.mxu0 }
 0x217   :  { %v6676_v35 = vadd.f32 %v659_v26, %v6668_v33 }
 0x218   :  { %v5102_v37 = vpop.f32.mrf.mxu0 }
 0x219   :  { %706 = vmax.xlane.f32.xlu1 %v6673_v34  ;;  %708 = vmax.xlane.f32.xlu0 %v6676_v35  ;;  %v6697_v47 = vadd.f32 %v5102_v37, %v6690_v42 }
 0x21a   :  { %v669_v39 = vpop.f32.mrf.mxu0 }
 0x21b   :  { %v6688_v41 = vadd.f32 %v669_v39, %v6680_v38  ;;  %v4276_v38 = vld [vmem:[#allocation4 + $0x1] ss:$0 sm:$0xff] }
 0x21c   :  { %v5105_v43 = vpop.f32.mrf.mxu0 }
 0x21d   :  { %710 = vmax.xlane.f32.xlu1 %v6685_v40  ;;  %712 = vmax.xlane.f32.xlu0 %v6688_v41  ;;  %v6711_v56 = vadd.f32 %v5105_v43, %v6702_v49 }
 0x21e   :  { %v679_v45 = vpop.f32.mrf.mxu0 }
 0x21f   :  { %v6700_v48 = vadd.f32 %v679_v45, %v6692_v44 }
 0x220   :  { %v6704_v51 = vpop.f32.mrf.mxu0 }
 0x221   :  { %714 = vmax.xlane.f32.xlu1 %v6697_v47  ;;  %716 = vmax.xlane.f32.xlu0 %v6700_v48 }
 0x222   :  { %v6708_v54 = vpop.f32.mrf.mxu0 }
 0x224   :  { %v5171_v60 = vpop.f32.mrf.mxu0 }
 0x225   :  { %718 = vmax.xlane.f32.xlu1 %v6711_v56 }
 0x226   :  { %v1222_v62 = vpop.f32.mrf.mxu0 }
 0x228   :  { %v5174_v6 = vpop.f32.mrf.mxu0 }
 0x22a   :  { %v1232_v22 = vpop.f32.mrf.mxu0 }
 0x22c   :  { %v5177_v21 = vpop.f32.mrf.mxu0 }
 0x22e   :  { %v1242_v28 = vpop.f32.mrf.mxu0 }
 0x230   :  { %v5180_v32 = vpop.f32.mrf.mxu0 }
 0x232   :  { %v1252_v26 = vpop.f32.mrf.mxu0 }
 0x234   :  { %v5183_v37 = vpop.f32.mrf.mxu0 }
 0x235   :  { %v1268_v31 = vadd.f32 %v5183_v37, %v4276_v38  ;;  %v1233_v37 = vadd.f32 %v4276_v38, %v1232_v22 }
 0x236   :  { %v1262_v39 = vpop.f32.mrf.mxu0 }
 0x238   :  { %v5186_v45 = vpop.f32.mrf.mxu0 }
 0x239   :  { %v1278_v49 = vadd.f32 %v5186_v45, %v4276_v38  ;;  %v1223_v45 = vadd.f32 %v4276_v38, %v1222_v62 }
 0x23a   :  { %v1272_v44 = vpop.f32.mrf.mxu0 }
 0x23b   :  { %v1273_v27 = vadd.f32 %v4276_v38, %v1272_v44  ;;  %v1248_v44 = vadd.f32 %v5177_v21, %v4276_v38 }
 0x23c   :  { %v5189_v42 = vpop.f32.mrf.mxu0 }
 0x23d   :  { %v1288_v33 = vadd.f32 %v5189_v42, %v4276_v38  ;;  %v1253_v42 = vadd.f32 %v4276_v38, %v1252_v26 }
 0x23e   :  { %v1282_v36 = vpop.f32.mrf.mxu0 }
 0x23f   :  { %v1283_v43 = vadd.f32 %v4276_v38, %v1282_v36  ;;  %5190 = vmatprep.subr.msk.mxu1 %vm446_vm1, %v1288_v33  ;;  %v1263_v36 = vadd.f32 %v4276_v38, %v1262_v39  ;;  %v1228_v39 = vadd.f32 %v5171_v60, %v4276_v38  ;;  %v1213_v60 = vadd.f32 %v4276_v38, %v6708_v54 }
 0x240   :  { %5191 = vmatpush3.xpose.msk.msra.mxu1 %vm446_vm1, %v1288_v33  ;;  %v1258_v33 = vadd.f32 %v5180_v32, %v4276_v38  ;;  %v1238_v32 = vadd.f32 %v5174_v6, %v4276_v38 }
 0x241   :  { %5192 = vmatprep.subr.msk.mxu1 %vm446_vm1, %v1283_v43 }
 0x244   :  { %5193 = vmatpush3.xpose.msk.msra.mxu1 %vm446_vm1, %v1283_v43  ;;  %v1218_v43 = vadd.f32 %v6704_v51, %v4276_v38 }
 0x245   :  { %5194 = vmatprep.subr.msk.mxu1 %vm446_vm1, %v1278_v49 }
 0x248   :  { %5195 = vmatpush3.xpose.msk.msra.mxu1 %vm446_vm1, %v1278_v49  ;;  %v1243_v49 = vadd.f32 %v4276_v38, %v1242_v28 }
 0x249   :  { %5196 = vmatprep.subr.msk.mxu1 %vm446_vm1, %v1273_v27 }
 0x24c   :  { %5197 = vmatpush3.xpose.msk.msra.mxu1 %vm446_vm1, %v1273_v27  ;;  %v5143_v27 = vpop.f32.mrf.mxu1 }
 0x24d   :  { %5198 = vmatprep.subr.msk.mxu1 %vm446_vm1, %v1268_v31  ;;  %v1072_v51 = vadd.f32 %v5143_v27, %v6607_v23 }
 0x250   :  { %5199 = vmatpush3.xpose.msk.msra.mxu1 %vm446_vm1, %v1268_v31  ;;  %v1066_v31 = vpop.f32.mrf.mxu1 }
 0x251   :  { %5200 = vmatprep.subr.msk.mxu1 %vm446_vm1, %v1263_v36  ;;  %v1067_v62 = vadd.f32 %v6607_v23, %v1066_v31 }
 0x252   :  { %v5146_v26 = vpop.f32.mrf.mxu1 }
 0x254   :  { %5201 = vmatpush3.xpose.msk.msra.mxu1 %vm446_vm1, %v1263_v36  ;;  %v1076_v21 = vpop.f32.mrf.mxu1 }
 0x255   :  { %5202 = vmatprep.subr.msk.mxu1 %vm446_vm1, %v1258_v33  ;;  %v1077_v38 = vadd.f32 %v6607_v23, %v1076_v21 }
 0x256   :  { %v5149_v28 = vpop.f32.mrf.mxu1 }
 0x258   :  { %5203 = vmatpush3.xpose.msk.msra.mxu1 %vm446_vm1, %v1258_v33  ;;  %v1086_v6 = vpop.f32.mrf.mxu1 }
 0x259   :  { %5204 = vmatprep.subr.msk.mxu1 %vm446_vm1, %v1253_v42 }
 0x25a   :  { %v5152_v22 = vpop.f32.mrf.mxu1 }
 0x25c   :  { %5205 = vmatpush3.xpose.msk.msra.mxu1 %vm446_vm1, %v1253_v42  ;;  %v1096_v36 = vpop.f32.mrf.mxu1 }
 0x25d   :  { %5206 = vmatprep.subr.msk.mxu1 %vm446_vm1, %v1248_v44 }
 0x25e   :  { %v5155_v33 = vpop.f32.mrf.mxu1 }
 0x25f   :  { %v1112_v31 = vadd.f32 %v5155_v33, %v6607_v23 }
 0x260   :  { %5207 = vmatpush3.xpose.msk.msra.mxu1 %vm446_vm1, %v1248_v44  ;;  %v1106_v54 = vpop.f32.mrf.mxu1 }
 0x261   :  { %5208 = vmatprep.subr.msk.mxu1 %vm446_vm1, %v1243_v49 }
 0x262   :  { %v5158_v42 = vpop.f32.mrf.mxu1 }
 0x264   :  { %5209 = vmatpush3.xpose.msk.msra.mxu1 %vm446_vm1, %v1243_v49  ;;  %v1116_v44 = vpop.f32.mrf.mxu1 }
 0x265   :  { %5210 = vmatprep.subr.msk.mxu1 %vm446_vm1, %v1238_v32 }
 0x266   :  { %v5161_v27 = vpop.f32.mrf.mxu1 }
 0x268   :  { %5211 = vmatpush3.xpose.msk.msra.mxu1 %vm446_vm1, %v1238_v32 }
 0x269   :  { %5212 = vmatprep.subr.msk.mxu1 %vm446_vm1, %v1233_v37 }
 0x26c   :  { %5213 = vmatpush3.xpose.msk.msra.mxu1 %vm446_vm1, %v1233_v37 }
 0x26d   :  { %5214 = vmatprep.subr.msk.mxu1 %vm446_vm1, %v1228_v39 }
 0x270   :  { %5215 = vmatpush3.xpose.msk.msra.mxu1 %vm446_vm1, %v1228_v39  ;;  %v1122_v39 = vadd.f32 %v5158_v42, %v6607_v23 }
 0x271   :  { %5216 = vmatprep.subr.msk.mxu1 %vm446_vm1, %v1223_v45 }
 0x274   :  { %5217 = vmatpush3.xpose.msk.msra.mxu1 %vm446_vm1, %v1223_v45 }
 0x275   :  { %5218 = vmatprep.subr.msk.mxu1 %vm446_vm1, %v1218_v43 }
 0x278   :  { %5219 = vmatpush3.xpose.msk.msra.mxu1 %vm446_vm1, %v1218_v43 }
 0x279   :  { %5220 = vmatprep.subr.msk.mxu1 %vm446_vm1, %v1213_v60 }
 0x27c   :  { %5221 = vmatpush3.xpose.msk.msra.mxu1 %vm446_vm1, %v1213_v60 }
 0x27d   :  { %5330 = vmatprep.subr.mxu1 %v6600_v18 }
 0x27f   :  { %5223 = vmatmul.mubr.msk.f32.vlgmr.msra.gmra.mxu1 %vm446_vm1, %v6610_v46  ;;  %v1082_v46 = vadd.f32 %v5146_v26, %v6607_v23  ;;  %v1126_v26 = vpop.f32.mrf.mxu1 }
 0x280   :  { %5331 = vmatpush3.msra.mxu1 %v6600_v18  ;;  %5225 = vmatprep.mubr.msk.f32.mxu1 %vm446_vm1, %v1067_v62  ;;  %v1087_v18 = vadd.f32 %v6607_v23, %v1086_v6 }
 0x281   :  { %5332 = vmatprep.subr.mxu1 %v6602_v19 }
 0x282   :  { %5333 = vmatpush3.msra.mxu1 %v6602_v19  ;;  %v1092_v19 = vadd.f32 %v5149_v28, %v6607_v23 }
 0x283   :  { %5226 = vmatmul.mubr.msk.f32.gmra.mxu1 %vm446_vm1, %v1072_v51  ;;  %5334 = vmatprep.subr.mxu1 %v6596_v16 }
 0x284   :  { %5335 = vmatpush3.msra.mxu1 %v6596_v16  ;;  %5228 = vmatprep.mubr.msk.f32.mxu1 %vm446_vm1, %v1077_v38  ;;  %v1097_v16 = vadd.f32 %v6607_v23, %v1096_v36 }
 0x285   :  { %5336 = vmatprep.subr.mxu1 %v6598_v17 }
 0x286   :  { %5337 = vmatpush3.msra.mxu1 %v6598_v17  ;;  %v1102_v17 = vadd.f32 %v5152_v22, %v6607_v23 }
 0x287   :  { %5229 = vmatmul.mubr.msk.f32.gmra.mxu1 %vm446_vm1, %v1082_v46  ;;  %5338 = vmatprep.subr.mxu1 %v6592_v2 }
 0x288   :  { %5339 = vmatpush3.msra.mxu1 %v6592_v2  ;;  %5231 = vmatprep.mubr.msk.f32.mxu1 %vm446_vm1, %v1087_v18  ;;  %v1107_v2 = vadd.f32 %v6607_v23, %v1106_v54 }
 0x289   :  { %5340 = vmatprep.subr.mxu1 %v6594_v15 }
 0x28a   :  { %5341 = vmatpush3.msra.mxu1 %v6594_v15 }
 0x28b   :  { %5232 = vmatmul.mubr.msk.f32.gmra.mxu1 %vm446_vm1, %v1092_v19  ;;  %5342 = vmatprep.subr.mxu1 %v6588_v13 }
 0x28c   :  { %5343 = vmatpush3.msra.mxu1 %v6588_v13  ;;  %5234 = vmatprep.mubr.msk.f32.mxu1 %vm446_vm1, %v1097_v16  ;;  %v1117_v13 = vadd.f32 %v6607_v23, %v1116_v44 }
 0x28d   :  { %5344 = vmatprep.subr.mxu1 %v6590_v14 }
 0x28e   :  { %5345 = vmatpush3.msra.mxu1 %v6590_v14  ;;  %v689_v49 = vpop.xlane.xlu0 %688 }
 0x28f   :  { %v720_v15 = vsub.f32 %v6617_v52, %v689_v49  ;;  %5235 = vmatmul.mubr.msk.f32.gmra.mxu1 %vm446_vm1, %v1102_v17  ;;  %5346 = vmatprep.subr.mxu1 %v6584_v11 }
 0x290   :  { %5347 = vmatpush3.msra.mxu1 %v6584_v11  ;;  %5237 = vmatprep.mubr.msk.f32.mxu1 %vm446_vm1, %v1107_v2  ;;  %v1127_v11 = vadd.f32 %v6607_v23, %v1126_v26 }
 0x291   :  { %v736_v32 = vmul.f32 1.442695, %v720_v15  ;;  %5348 = vmatprep.subr.mxu1 %v6586_v12 }
 0x292   :  { %5349 = vmatpush3.msra.mxu1 %v6586_v12  ;;  %v693_v14 = vpop.xlane.xlu1 %692  ;;  %v691_v52 = vpop.xlane.xlu0 %690 }
 0x293   :  { %5784 = vpow2.f32 %v736_v32  ;;  %v722_v37 = vsub.f32 %v6628_v58, %v693_v14  ;;  %v721_v21 = vsub.f32 %v6625_v57, %v691_v52  ;;  %5238 = vmatmul.mubr.msk.f32.gmra.mxu1 %vm446_vm1, %v1112_v31  ;;  %5350 = vmatprep.subr.mxu1 %v6580_v9 }
 0x294   :  { %5351 = vmatpush3.msra.mxu1 %v6580_v9  ;;  %5240 = vmatprep.mubr.msk.f32.mxu1 %vm446_vm1, %v1117_v13  ;;  %v1132_v9 = vadd.f32 %v5161_v27, %v6607_v23 }
 0x295   :  { %v740_v12 = vmul.f32 1.442695, %v722_v37  ;;  %v738_v28 = vmul.f32 1.442695, %v721_v21  ;;  %5352 = vmatprep.subr.mxu1 %v6582_v10 }
 0x296   :  { %5353 = vmatpush3.msra.mxu1 %v6582_v10  ;;  %v695_v58 = vpop.xlane.xlu1 %694  ;;  %v697_v57 = vpop.xlane.xlu0 %696 }
 0x297   :  { %5786 = vpow2.f32 %v740_v12  ;;  %v723_v45 = vsub.f32 %v6637_v63, %v695_v58  ;;  %v724_v6 = vsub.f32 %v6640_v0, %v697_v57  ;;  %5241 = vmatmul.mubr.msk.f32.gmra.mxu1 %vm446_vm1, %v1122_v39  ;;  %5354 = vmatprep.subr.mxu1 %v6576_v5  ;;  %v4326_v58 = vld [vmem:[%s8208_s6 + $0x18] sm:$0xff]  ;;  %v4325_v57 = vld [vmem:[%s8208_s6 + $0x10] sm:$0xff] }
 0x298   :  { %5788 = vpow2.f32 %v738_v28  ;;  %5355 = vmatpush3.msra.mxu1 %v6576_v5  ;;  %5243 = vmatprep.mubr.msk.f32.mxu1 %vm446_vm1, %v1127_v11 }
 0x299   :  { %v742_v43 = vmul.f32 1.442695, %v723_v45  ;;  %v744_v10 = vmul.f32 1.442695, %v724_v6  ;;  %5356 = vmatprep.subr.mxu1 %v6578_v8  ;;  %5246 = vmatprep.subr.mxu0 %v4326_v58  ;;  %v6883_v45 = vld [vmem:[%s8202_s0 + $0x8] sm:$0xff]  ;;  %v6890_v6 = vld [vmem:[%s8202_s0 + $0x10] sm:$0xff] }
 0x29a   :  { %5357 = vmatpush3.msra.mxu1 %v6578_v8  ;;  %v699_v63 = vpop.xlane.xlu1 %698  ;;  %v701_v22 = vpop.xlane.xlu0 %700  ;;  %5247 = vmatpush3.msra.mxu0 %v4326_v58 }
 0x29b   :  { %5790 = vpow2.f32 %v742_v43  ;;  %v725_v0 = vsub.f32 %v6649_v20, %v699_v63  ;;  %v726_v60 = vsub.f32 %v6652_v24, %v701_v22  ;;  %5244 = vmatmul.mubr.msk.f32.gmra.mxu1 %vm446_vm1, %v1132_v9  ;;  %5358 = vmatprep.subr.mxu1 %v6572_v3  ;;  %v6897_v9 = vld [vmem:[%s8202_s0 + $0x18] sm:$0xff]  ;;  %v6904_v43 = vld [vmem:[%s8202_s0 + $0x20] sm:$0xff]  ;;  %v6918_v63 = vld [vmem:[%s8202_s0 + $0x30] sm:$0xff] }
 0x29c   :  { %5792 = vpow2.f32 %v744_v10  ;;  %5359 = vmatpush3.msra.mxu1 %v6572_v3  ;;  %5248 = vmatprep.subr.mxu0 %v4325_v57  ;;  %v6911_v10 = vld [vmem:[%s8202_s0 + $0x28] sm:$0xff]  ;;  %v6925_v22 = vld [vmem:[%s8202_s0 + $0x38] sm:$0xff] }
 0x29d   :  { %v746_v5 = vmul.f32 1.442695, %v725_v0  ;;  %v748_v23 = vmul.f32 1.442695, %v726_v60  ;;  %5360 = vmatprep.subr.mxu1 %v6574_v4  ;;  %5249 = vmatpush3.msra.mxu0 %v4325_v57  ;;  %v6932_v0 = vld [vmem:[%s8202_s0 + $0x40] sm:$0xff]  ;;  %v6939_v60 = vld [vmem:[%s8202_s0 + $0x48] sm:$0xff] }
 0x29e   :  { %5361 = vmatpush3.msra.mxu1 %v6574_v4  ;;  %v703_v8 = vpop.xlane.xlu1 %702  ;;  %v705_v36 = vpop.xlane.xlu0 %704  ;;  %5251 = vmatmul.mubr.msk.f32.vlgmr.msra.gmra.mxu0 %vm98_vm0, %v6883_v45 }
 0x29f   :  { %5794 = vpow2.f32 %v746_v5  ;;  %v727_v20 = vsub.f32 %v6661_v29, %v703_v8  ;;  %v728_v24 = vsub.f32 %v6664_v30, %v705_v36  ;;  %5253 = vmatprep.mubr.msk.f32.mxu0 %vm98_vm0, %v6890_v6  ;;  %v6946_v5 = vld [vmem:[%s8202_s0 + $0x50] sm:$0xff]  ;;  %v6960_v8 = vld [vmem:[%s8202_s0 + $0x60] sm:$0xff]  ;;  %v6967_v36 = vld [vmem:[%s8202_s0 + $0x68] sm:$0xff] }
 0x2a0   :  { %v6819_v62 = vpop.eup %5784  ;;  %5796 = vpow2.f32 %v748_v23  ;;  %v6953_v23 = vld [vmem:[%s8202_s0 + $0x58] sm:$0xff] }
 0x2a1   :  { %v750_v33 = vmul.f32 1.442695, %v727_v20  ;;  %v752_v38 = vmul.f32 1.442695, %v728_v24  ;;  %768 = vadd.xlane.f32.xlu0 %v6819_v62  ;;  %v6974_v20 = vld [vmem:[%s8202_s0 + $0x70] sm:$0xff]  ;;  %v6981_v24 = vld [vmem:[%s8202_s0 + $0x78] sm:$0xff] }
 0x2a2   :  { %v707_v3 = vpop.xlane.xlu1 %706  ;;  %v709_v51 = vpop.xlane.xlu0 %708  ;;  %5254 = vmatmul.mubr.msk.f32.gmra.mxu0 %vm98_vm0, %v6897_v9 }
 0x2a3   :  { %5798 = vpow2.f32 %v750_v33  ;;  %v729_v54 = vsub.f32 %v6673_v34, %v707_v3  ;;  %v730_v4 = vsub.f32 %v6676_v35, %v709_v51  ;;  %5256 = vmatprep.mubr.msk.f32.mxu0 %vm98_vm0, %v6904_v43 }
 0x2a4   :  { %v6824_v18 = vpop.eup %5786  ;;  %5800 = vpow2.f32 %v752_v38 }
 0x2a5   :  { %v6826_v29 = vpop.eup %5788  ;;  %v754_v30 = vmul.f32 1.442695, %v729_v54  ;;  %v756_v46 = vmul.f32 1.442695, %v730_v4  ;;  %772 = vadd.xlane.f32.xlu0 %v6824_v18 }
 0x2a6   :  { %770 = vadd.xlane.f32.xlu1 %v6826_v29  ;;  %v711_v42 = vpop.xlane.xlu1 %710  ;;  %v713_v16 = vpop.xlane.xlu0 %712  ;;  %5257 = vmatmul.mubr.msk.f32.gmra.mxu0 %vm98_vm0, %v6911_v10 }
 0x2a7   :  { %5802 = vpow2.f32 %v754_v30  ;;  %v731_v19 = vsub.f32 %v6685_v40, %v711_v42  ;;  %v732_v34 = vsub.f32 %v6688_v41, %v713_v16  ;;  %5259 = vmatprep.mubr.msk.f32.mxu0 %vm98_vm0, %v6918_v63 }
 0x2a8   :  { %v6832_v44 = vpop.eup %5790  ;;  %5804 = vpow2.f32 %v756_v46 }
 0x2a9   :  { %v6834_v35 = vpop.eup %5792  ;;  %v758_v2 = vmul.f32 1.442695, %v731_v19  ;;  %v760_v17 = vmul.f32 1.442695, %v732_v34 }
 0x2aa   :  { %774 = vadd.xlane.f32.xlu1 %v6832_v44  ;;  %776 = vadd.xlane.f32.xlu0 %v6834_v35  ;;  %v715_v27 = vpop.xlane.xlu1 %714  ;;  %v717_v49 = vpop.xlane.xlu0 %716 }
 0x2ab   :  { %5806 = vpow2.f32 %v758_v2  ;;  %v733_v15 = vsub.f32 %v6697_v47, %v715_v27  ;;  %v734_v40 = vsub.f32 %v6700_v48, %v717_v49  ;;  %5260 = vmatmul.mubr.msk.f32.gmra.mxu0 %vm98_vm0, %v6925_v22 }
 0x2ac   :  { %v6840_v13 = vpop.eup %5794  ;;  %5808 = vpow2.f32 %v760_v17  ;;  %5262 = vmatprep.mubr.msk.f32.mxu0 %vm98_vm0, %v6932_v0 }
 0x2ad   :  { %v6842_v41 = vpop.eup %5796  ;;  %v762_v31 = vmul.f32 1.442695, %v733_v15  ;;  %v764_v32 = vmul.f32 1.442695, %v734_v40 }
 0x2ae   :  { %778 = vadd.xlane.f32.xlu1 %v6840_v13  ;;  %780 = vadd.xlane.f32.xlu0 %v6842_v41  ;;  %v719_v26 = vpop.xlane.xlu1 %718 }
 0x2af   :  { %5810 = vpow2.f32 %v762_v31  ;;  %v735_v14 = vsub.f32 %v6711_v56, %v719_v26  ;;  %5263 = vmatmul.mubr.msk.f32.gmra.mxu0 %vm98_vm0, %v6939_v60 }
 0x2b0   :  { %v6847_v52 = vpop.eup %5798  ;;  %5812 = vpow2.f32 %v764_v32  ;;  %5265 = vmatprep.mubr.msk.f32.mxu0 %vm98_vm0, %v6946_v5 }
 0x2b1   :  { %v6849_v47 = vpop.eup %5800  ;;  %v766_v48 = vmul.f32 1.442695, %v735_v14 }
 0x2b2   :  { %782 = vadd.xlane.f32.xlu1 %v6847_v52  ;;  %784 = vadd.xlane.f32.xlu0 %v6849_v47 }
 0x2b3   :  { %5814 = vpow2.f32 %v766_v48  ;;  %5266 = vmatmul.mubr.msk.f32.gmra.mxu0 %vm98_vm0, %v6953_v23 }
 0x2b4   :  { %v6853_v37 = vpop.eup %5802  ;;  %5268 = vmatprep.mubr.msk.f32.mxu0 %vm98_vm0, %v6960_v8 }
 0x2b5   :  { %v6855_v21 = vpop.eup %5804 }
 0x2b6   :  { %786 = vadd.xlane.f32.xlu1 %v6853_v37  ;;  %788 = vadd.xlane.f32.xlu0 %v6855_v21 }
 0x2b7   :  { %5269 = vmatmul.mubr.msk.f32.gmra.mxu0 %vm98_vm0, %v6967_v36 }
 0x2b8   :  { %v6859_v56 = vpop.eup %5806  ;;  %5271 = vmatprep.mubr.msk.f32.mxu0 %vm98_vm0, %v6974_v20 }
 0x2b9   :  { %v6861_v11 = vpop.eup %5808 }
 0x2ba   :  { %790 = vadd.xlane.f32.xlu1 %v6859_v56  ;;  %792 = vadd.xlane.f32.xlu0 %v6861_v11 }
 0x2bb   :  { %5272 = vmatmul.mubr.msk.f32.gmra.mxu0 %vm98_vm0, %v6981_v24 }
 0x2bc   :  { %v6865_v39 = vpop.eup %5810 }
 0x2bd   :  { %v6867_v12 = vpop.eup %5812 }
 0x2be   :  { %794 = vadd.xlane.f32.xlu1 %v6865_v39  ;;  %796 = vadd.xlane.f32.xlu0 %v6867_v12 }
 0x2c0   :  { %v6871_v28 = vpop.eup %5814 }
 0x2c2   :  { %798 = vadd.xlane.f32.xlu1 %v6871_v28 }
 0x32a   :  { %v769_v33 = vpop.xlane.xlu0 %768 }
 0x32b   :  { %5816 = vrcp.f32 %v769_v33 }
 0x32e   :  { %v773_v38 = vpop.xlane.xlu0 %772 }
 0x32f   :  { %v771_v3 = vpop.xlane.xlu1 %770  ;;  %5818 = vrcp.f32 %v773_v38 }
 0x330   :  { %5820 = vrcp.f32 %v771_v3 }
 0x333   :  { %v775_v51 = vpop.xlane.xlu1 %774  ;;  %v777_v54 = vpop.xlane.xlu0 %776 }
 0x334   :  { %5822 = vrcp.f32 %v775_v51 }
 0x335   :  { %5824 = vrcp.f32 %v777_v54 }
 0x337   :  { %v779_v4 = vpop.xlane.xlu1 %778  ;;  %v781_v30 = vpop.xlane.xlu0 %780 }
 0x338   :  { %v5817_v46 = vpop.eup %5816  ;;  %5826 = vrcp.f32 %v779_v4 }
 0x339   :  { %5828 = vrcp.f32 %v781_v30  ;;  %v801_v42 = vmul.f32 %v5817_v46, %v6819_v62 }
 0x33b   :  { %v783_v16 = vpop.xlane.xlu1 %782  ;;  %v785_v19 = vpop.xlane.xlu0 %784  ;;  %5362 = vmatprep.mubr.f32.mxu1 %v801_v42 }
 0x33c   :  { %v5819_v34 = vpop.eup %5818  ;;  %5830 = vrcp.f32 %v783_v16 }
 0x33d   :  { %v5821_v2 = vpop.eup %5820  ;;  %5832 = vrcp.f32 %v785_v19  ;;  %v805_v17 = vmul.f32 %v5819_v34, %v6824_v18 }
 0x33e   :  { %v803_v27 = vmul.f32 %v5821_v2, %v6826_v29 }
 0x33f   :  { %v787_v49 = vpop.xlane.xlu1 %786  ;;  %v789_v15 = vpop.xlane.xlu0 %788 }
 0x340   :  { %5834 = vrcp.f32 %v787_v49  ;;  %v5224_v40 = vpop.f32.mrf.mxu1  ;;  %5363 = vmatmul.mubr.f32.vlgmr.msra.gmra.mxu1 %v803_v27 }
 0x341   :  { %v5823_v31 = vpop.eup %5822  ;;  %5836 = vrcp.f32 %v789_v15  ;;  %v6989_v62 = vadd.f32 %v5224_v40, %v6619_v53  ;;  %5365 = vmatprep.mubr.f32.mxu1 %v805_v17  ;;  %v8243_v15 = vld [vmem:[#allocation9_spill] sm:$0xff] }
 0x342   :  { %v5825_v32 = vpop.eup %5824  ;;  %v1453_v26 = vpop.f32.mrf.mxu1  ;;  %v807_v14 = vmul.f32 %v5823_v31, %v6832_v44 }
 0x343   :  { %1534 = vmax.xlane.f32.xlu1 %v6989_v62  ;;  %v791_v18 = vpop.xlane.xlu1 %790  ;;  %v793_v48 = vpop.xlane.xlu0 %792  ;;  %v6994_v29 = vadd.f32 %v1453_v26, %v6614_v50  ;;  %v809_v58 = vmul.f32 %v5825_v32, %v6834_v35  ;;  %v8244_v32 = vld [vmem:[#allocation8_spill] sm:$0xff] }
 0x344   :  { %5838 = vrcp.f32 %v791_v18  ;;  %v5227_v57 = vpop.f32.mrf.mxu1  ;;  %5366 = vmatmul.mubr.f32.gmra.mxu1 %v807_v14  ;;  %v8245_v18 = vld [vmem:[#allocation11_spill] sm:$0xff] }
 0x345   :  { %v5827_v33 = vpop.eup %5826  ;;  %5840 = vrcp.f32 %v793_v48  ;;  %v6998_v53 = vadd.f32 %v5227_v57, %v6630_v59  ;;  %1532 = vmax.xlane.f32.xlu0 %v6994_v29  ;;  %5368 = vmatprep.mubr.f32.mxu1 %v809_v58 }
 0x346   :  { %v5829_v44 = vpop.eup %5828  ;;  %v1463_v38 = vpop.f32.mrf.mxu1  ;;  %v811_v3 = vmul.f32 %v5827_v33, %v6840_v13  ;;  %v8246_v33 = vld [vmem:[#allocation10_spill] sm:$0xff] }
 0x347   :  { %1538 = vmax.xlane.f32.xlu1 %v6998_v53  ;;  %v795_v50 = vpop.xlane.xlu1 %794  ;;  %v797_v51 = vpop.xlane.xlu0 %796  ;;  %v7004_v35 = vadd.f32 %v1463_v38, %v6621_v55  ;;  %v813_v54 = vmul.f32 %v5829_v44, %v6842_v41 }
 0x348   :  { %5842 = vrcp.f32 %v795_v50  ;;  %v5230_v4 = vpop.f32.mrf.mxu1  ;;  %5369 = vmatmul.mubr.f32.gmra.mxu1 %v811_v3  ;;  %v8247_v50 = vld [vmem:[#allocation13_spill] sm:$0xff] }
 0x349   :  { %v5831_v59 = vpop.eup %5830  ;;  %5844 = vrcp.f32 %v797_v51  ;;  %v7008_v30 = vadd.f32 %v5230_v4, %v6642_v1  ;;  %1536 = vmax.xlane.f32.xlu0 %v7004_v35  ;;  %5371 = vmatprep.mubr.f32.mxu1 %v813_v54 }
 0x34a   :  { %v5833_v13 = vpop.eup %5832  ;;  %v1473_v46 = vpop.f32.mrf.mxu1  ;;  %v815_v42 = vmul.f32 %v5831_v59, %v6847_v52 }
 0x34b   :  { %1542 = vmax.xlane.f32.xlu1 %v7008_v30  ;;  %v799_v55 = vpop.xlane.xlu1 %798  ;;  %v7014_v41 = vadd.f32 %v1473_v46, %v6632_v61  ;;  %v817_v16 = vmul.f32 %v5833_v13, %v6849_v47 }
 0x34c   :  { %5846 = vrcp.f32 %v799_v55  ;;  %v5233_v19 = vpop.f32.mrf.mxu1  ;;  %5372 = vmatmul.mubr.f32.gmra.mxu1 %v815_v42  ;;  %v7063_v42 = vld [vmem:[%s8202_s0] sm:$0xff]  ;;  %v8250_v55 = vld [vmem:[#allocation14_spill] sm:$0xff] }
 0x34d   :  { %v5835_v1 = vpop.eup %5834  ;;  %v7018_v34 = vadd.f32 %v5233_v19, %v6654_v25  ;;  %1540 = vmax.xlane.f32.xlu0 %v7014_v41  ;;  %5374 = vmatprep.mubr.f32.mxu1 %v817_v16  ;;  %v4364_v19 = vld [vmem:[%s8206_s4 + $0x28] sm:$0xff] }
 0x34e   :  { %v5837_v2 = vpop.eup %5836  ;;  %v1483_v52 = vpop.f32.mrf.mxu1  ;;  %v819_v17 = vmul.f32 %v5835_v1, %v6853_v37  ;;  %5414 = vmatprep.subr.mxu1 %v4364_v19  ;;  %v4363_v1 = vld [vmem:[%s8206_s4 + $0x20] sm:$0xff] }
 0x34f   :  { %1546 = vmax.xlane.f32.xlu1 %v7018_v34  ;;  %v7024_v61 = vadd.f32 %v1483_v52, %v6644_v7  ;;  %v821_v47 = vmul.f32 %v5837_v2, %v6855_v21  ;;  %5415 = vmatpush3.msra.mxu1 %v4364_v19 }
 0x350   :  { %v5236_v27 = vpop.f32.mrf.mxu1  ;;  %5375 = vmatmul.mubr.f32.gmra.mxu1 %v819_v17  ;;  %5416 = vmatprep.subr.mxu1 %v4363_v1 }
 0x351   :  { %v5839_v49 = vpop.eup %5838  ;;  %v7028_v25 = vadd.f32 %v5236_v27, %v8243_v15  ;;  %1544 = vmax.xlane.f32.xlu0 %v7024_v61  ;;  %5377 = vmatprep.mubr.f32.mxu1 %v821_v47 }
 0x352   :  { %v5841_v40 = vpop.eup %5840  ;;  %v1493_v31 = vpop.f32.mrf.mxu1  ;;  %v823_v37 = vmul.f32 %v5839_v49, %v6859_v56  ;;  %5417 = vmatpush3.msra.mxu1 %v4363_v1 }
 0x353   :  { %1550 = vmax.xlane.f32.xlu1 %v7028_v25  ;;  %v7034_v7 = vadd.f32 %v1493_v31, %v8244_v32  ;;  %v825_v21 = vmul.f32 %v5841_v40, %v6861_v11 }
 0x354   :  { %v5239_v26 = vpop.f32.mrf.mxu1  ;;  %5378 = vmatmul.mubr.f32.gmra.mxu1 %v823_v37 }
 0x355   :  { %v5843_v14 = vpop.eup %5842  ;;  %v7038_v48 = vadd.f32 %v5239_v26, %v8245_v18  ;;  %1548 = vmax.xlane.f32.xlu0 %v7034_v7  ;;  %5380 = vmatprep.mubr.f32.mxu1 %v825_v21 }
 0x356   :  { %v5845_v58 = vpop.eup %5844  ;;  %v1503_v57 = vpop.f32.mrf.mxu1  ;;  %v827_v56 = vmul.f32 %v5843_v14, %v6865_v39  ;;  %v8248_v39 = vld [vmem:[#allocation12_spill] sm:$0xff] }
 0x357   :  { %1554 = vmax.xlane.f32.xlu1 %v7038_v48  ;;  %v7044_v44 = vadd.f32 %v1503_v57, %v8246_v33  ;;  %v829_v11 = vmul.f32 %v5845_v58, %v6867_v12  ;;  %v8249_v12 = vld [vmem:[#allocation15_spill] sm:$0xff] }
 0x358   :  { %v5242_v38 = vpop.f32.mrf.mxu1  ;;  %5381 = vmatmul.mubr.f32.gmra.mxu1 %v827_v56 }
 0x359   :  { %v5847_v3 = vpop.eup %5846  ;;  %v7048_v51 = vadd.f32 %v5242_v38, %v8247_v50  ;;  %1552 = vmax.xlane.f32.xlu0 %v7044_v44  ;;  %5383 = vmatprep.mubr.f32.mxu1 %v829_v11 }
 0x35a   :  { %v1513_v54 = vpop.f32.mrf.mxu1  ;;  %v831_v4 = vmul.f32 %v5847_v3, %v6871_v28 }
 0x35b   :  { %1558 = vmax.xlane.f32.xlu1 %v7048_v51  ;;  %v7054_v59 = vadd.f32 %v1513_v54, %v8248_v39 }
 0x35c   :  { %v5245_v13 = vpop.f32.mrf.mxu1  ;;  %5384 = vmatmul.mubr.f32.gmra.mxu1 %v831_v4 }
 0x35d   :  { %v7057_v46 = vadd.f32 %v5245_v13, %v8249_v12  ;;  %1556 = vmax.xlane.f32.xlu0 %v7054_v59  ;;  %5418 = vmatprep.mubr.msk.f32.mxu1 %vm98_vm0, %v7063_v42 }
 0x35e   :  { %v1523_v28 = vpop.f32.mrf.mxu1  ;;  %v5252_v2 = vpop.f32.mrf.mxu0 }
 0x35f   :  { %1562 = vmax.xlane.f32.xlu1 %v7057_v46  ;;  %v7069_v16 = vadd.f32 %v1523_v28, %v8250_v55 }
 0x360   :  { %5419 = vmatmul.mubr.msk.f32.vlgmr.msra.gmra.mxu1 %vm98_vm0, %v6883_v45  ;;  %v1745_v52 = vpop.f32.mrf.mxu0 }
 0x361   :  { %1560 = vmax.xlane.f32.xlu0 %v7069_v16  ;;  %5421 = vmatprep.mubr.msk.f32.mxu1 %vm98_vm0, %v6890_v6 }
 0x362   :  { %v5255_v17 = vpop.f32.mrf.mxu0 }
 0x364   :  { %5422 = vmatmul.mubr.msk.f32.gmra.mxu1 %vm98_vm0, %v6897_v9  ;;  %v1755_v47 = vpop.f32.mrf.mxu0 }
 0x365   :  { %5424 = vmatprep.mubr.msk.f32.mxu1 %vm98_vm0, %v6904_v43 }
 0x366   :  { %v5258_v27 = vpop.f32.mrf.mxu0 }
 0x368   :  { %5425 = vmatmul.mubr.msk.f32.gmra.mxu1 %vm98_vm0, %v6911_v10  ;;  %v1765_v49 = vpop.f32.mrf.mxu0 }
 0x369   :  { %5427 = vmatprep.mubr.msk.f32.mxu1 %vm98_vm0, %v6918_v63 }
 0x36b   :  { %v5261_v15 = vpop.f32.mrf.mxu0 }
 0x36c   :  { %5428 = vmatmul.mubr.msk.f32.gmra.mxu1 %vm98_vm0, %v6925_v22 }
 0x36d   :  { %5430 = vmatprep.mubr.msk.f32.mxu1 %vm98_vm0, %v6932_v0  ;;  %v1775_v40 = vpop.f32.mrf.mxu0 }
 0x36f   :  { %v5264_v31 = vpop.f32.mrf.mxu0 }
 0x370   :  { %5431 = vmatmul.mubr.msk.f32.gmra.mxu1 %vm98_vm0, %v6939_v60 }
 0x371   :  { %5433 = vmatprep.mubr.msk.f32.mxu1 %vm98_vm0, %v6946_v5  ;;  %v1785_v37 = vpop.f32.mrf.mxu0 }
 0x373   :  { %v5267_v32 = vpop.f32.mrf.mxu0 }
 0x374   :  { %5434 = vmatmul.mubr.msk.f32.gmra.mxu1 %vm98_vm0, %v6953_v23 }
 0x375   :  { %5436 = vmatprep.mubr.msk.f32.mxu1 %vm98_vm0, %v6960_v8  ;;  %v1795_v21 = vpop.f32.mrf.mxu0 }
 0x377   :  { %v5270_v26 = vpop.f32.mrf.mxu0 }
 0x378   :  { %5437 = vmatmul.mubr.msk.f32.gmra.mxu1 %vm98_vm0, %v6967_v36 }
 0x379   :  { %5439 = vmatprep.mubr.msk.f32.mxu1 %vm98_vm0, %v6974_v20  ;;  %v1805_v14 = vpop.f32.mrf.mxu0 }
 0x37b   :  { %v5273_v18 = vpop.f32.mrf.mxu0 }
 0x37c   :  { %5440 = vmatmul.mubr.msk.f32.gmra.mxu1 %vm98_vm0, %v6981_v24  ;;  %5274 = vmatprep.subr.mxu0 %v5273_v18 }
 0x37d   :  { %5502 = vmatprep.mubr.msk.f32.mxu1 %vm98_vm0, %v7063_v42  ;;  %v1815_v58 = vpop.f32.mrf.mxu0  ;;  %5275 = vmatpush3.msra.mxu0 %v5273_v18 }
 0x37e   :  { %5276 = vmatprep.subr.mxu0 %v1815_v58 }
 0x37f   :  { %5277 = vmatpush3.msra.mxu0 %v1815_v58 }
 0x380   :  { %5278 = vmatprep.subr.mxu0 %v5270_v26 }
 0x381   :  { %5279 = vmatpush3.msra.mxu0 %v5270_v26 }
 0x382   :  { %5280 = vmatprep.subr.mxu0 %v1805_v14 }
 0x383   :  { %5281 = vmatpush3.msra.mxu0 %v1805_v14 }
 0x384   :  { %5282 = vmatprep.subr.mxu0 %v5267_v32 }
 0x385   :  { %5283 = vmatpush3.msra.mxu0 %v5267_v32 }
 0x386   :  { %5284 = vmatprep.subr.mxu0 %v1795_v21 }
 0x387   :  { %5285 = vmatpush3.msra.mxu0 %v1795_v21 }
 0x388   :  { %5286 = vmatprep.subr.mxu0 %v5264_v31 }
 0x389   :  { %5287 = vmatpush3.msra.mxu0 %v5264_v31 }
 0x38a   :  { %5288 = vmatprep.subr.mxu0 %v1785_v37 }
 0x38b   :  { %5289 = vmatpush3.msra.mxu0 %v1785_v37 }
 0x38c   :  { %5290 = vmatprep.subr.mxu0 %v5261_v15 }
 0x38d   :  { %5291 = vmatpush3.msra.mxu0 %v5261_v15 }
 0x38e   :  { %5292 = vmatprep.subr.mxu0 %v1775_v40 }
 0x38f   :  { %5293 = vmatpush3.msra.mxu0 %v1775_v40 }
 0x390   :  { %5294 = vmatprep.subr.mxu0 %v5258_v27 }
 0x391   :  { %5295 = vmatpush3.msra.mxu0 %v5258_v27 }
 0x392   :  { %5296 = vmatprep.subr.mxu0 %v1765_v49 }
 0x393   :  { %5297 = vmatpush3.msra.mxu0 %v1765_v49 }
 0x394   :  { %5298 = vmatprep.subr.mxu0 %v5255_v17 }
 0x395   :  { %5299 = vmatpush3.msra.mxu0 %v5255_v17 }
 0x396   :  { %5300 = vmatprep.subr.mxu0 %v1755_v47 }
 0x397   :  { %5301 = vmatpush3.msra.mxu0 %v1755_v47 }
 0x398   :  { %5302 = vmatprep.subr.mxu0 %v5252_v2 }
 0x399   :  { %5303 = vmatpush3.msra.mxu0 %v5252_v2 }
 0x39a   :  { %5304 = vmatprep.subr.mxu0 %v1745_v52 }
 0x39b   :  { %5305 = vmatpush3.msra.mxu0 %v1745_v52 }
 0x3cc   :  { %v1535_v57 = vpop.xlane.xlu1 %1534 }
 0x3cd   :  { %v1565_v56 = vsub.f32 %v6989_v62, %v1535_v57 }
 0x3ce   :  { %v1533_v33 = vpop.xlane.xlu0 %1532 }
 0x3cf   :  { %v1582_v11 = vmul.f32 1.442695, %v1565_v56  ;;  %v1564_v38 = vsub.f32 %v6994_v29, %v1533_v33 }
 0x3d0   :  { %v1539_v3 = vpop.xlane.xlu1 %1538 }
 0x3d1   :  { %5848 = vpow2.f32 %v1582_v11  ;;  %v1580_v50 = vmul.f32 1.442695, %v1564_v38  ;;  %v1567_v54 = vsub.f32 %v6998_v53, %v1539_v3 }
 0x3d2   :  { %v1537_v4 = vpop.xlane.xlu0 %1536 }
 0x3d3   :  { %5850 = vpow2.f32 %v1580_v50  ;;  %v1586_v39 = vmul.f32 1.442695, %v1567_v54  ;;  %v1566_v13 = vsub.f32 %v7004_v35, %v1537_v4 }
 0x3d4   :  { %v1543_v12 = vpop.xlane.xlu1 %1542 }
 0x3d5   :  { %5852 = vpow2.f32 %v1586_v39  ;;  %v1584_v28 = vmul.f32 1.442695, %v1566_v13  ;;  %v1569_v55 = vsub.f32 %v7008_v30, %v1543_v12 }
 0x3d6   :  { %v1541_v62 = vpop.xlane.xlu0 %1540 }
 0x3d7   :  { %5854 = vpow2.f32 %v1584_v28  ;;  %v1590_v19 = vmul.f32 1.442695, %v1569_v55  ;;  %v1568_v29 = vsub.f32 %v7014_v41, %v1541_v62 }
 0x3d8   :  { %v1547_v1 = vpop.xlane.xlu1 %1546 }
 0x3d9   :  { %5856 = vpow2.f32 %v1590_v19  ;;  %v1588_v2 = vmul.f32 1.442695, %v1568_v29  ;;  %v1571_v53 = vsub.f32 %v7018_v34, %v1547_v1  ;;  %v7174_v19 = vld [vmem:[%s8204_s2 + $0x28] sm:$0xff] }
 0x3da   :  { %v1545_v52 = vpop.xlane.xlu0 %1544  ;;  %5386 = vmatprep.subr.mxu0 %v7174_v19 }
 0x3db   :  { %5858 = vpow2.f32 %v1588_v2  ;;  %v1594_v17 = vmul.f32 1.442695, %v1571_v53  ;;  %v1570_v35 = vsub.f32 %v7024_v61, %v1545_v52 }
 0x3dc   :  { %v1551_v47 = vpop.xlane.xlu1 %1550 }
 0x3dd   :  { %5860 = vpow2.f32 %v1594_v17  ;;  %v1592_v27 = vmul.f32 1.442695, %v1570_v35  ;;  %v1573_v30 = vsub.f32 %v7028_v25, %v1551_v47 }
 0x3de   :  { %v7119_v49 = vpop.eup %5848  ;;  %v1549_v15 = vpop.xlane.xlu0 %1548 }
 0x3df   :  { %5862 = vpow2.f32 %v1592_v27  ;;  %v1598_v41 = vmul.f32 1.442695, %v1573_v30  ;;  %v1572_v40 = vsub.f32 %v7034_v7, %v1549_v15  ;;  %1614 = vadd.xlane.f32.xlu1 %v7119_v49 }
 0x3e0   :  { %v7123_v34 = vpop.eup %5850  ;;  %v1555_v31 = vpop.xlane.xlu1 %1554 }
 0x3e1   :  { %5864 = vpow2.f32 %v1598_v41  ;;  %v1596_v37 = vmul.f32 1.442695, %v1572_v40  ;;  %v1575_v61 = vsub.f32 %v7038_v48, %v1555_v31  ;;  %1612 = vadd.xlane.f32.xlu0 %v7123_v34 }
 0x3e2   :  { %v7127_v32 = vpop.eup %5852  ;;  %v1553_v25 = vpop.xlane.xlu0 %1552 }
 0x3e3   :  { %5866 = vpow2.f32 %v1596_v37  ;;  %v1602_v21 = vmul.f32 1.442695, %v1575_v61  ;;  %v1574_v26 = vsub.f32 %v7044_v44, %v1553_v25  ;;  %1618 = vadd.xlane.f32.xlu1 %v7127_v32 }
 0x3e4   :  { %v7131_v7 = vpop.eup %5854  ;;  %v1559_v14 = vpop.xlane.xlu1 %1558 }
 0x3e5   :  { %5868 = vpow2.f32 %v1602_v21  ;;  %v1600_v18 = vmul.f32 1.442695, %v1574_v26  ;;  %v1577_v58 = vsub.f32 %v7048_v51, %v1559_v14  ;;  %1616 = vadd.xlane.f32.xlu0 %v7131_v7  ;;  %v7212_v26 = vld [vmem:[#allocation4 + $0x2] ss:$0 sm:$0xff] }
 0x3e6   :  { %v7135_v48 = vpop.eup %5856  ;;  %v1557_v57 = vpop.xlane.xlu0 %1556 }
 0x3e7   :  { %5870 = vpow2.f32 %v1600_v18  ;;  %v1606_v56 = vmul.f32 1.442695, %v1577_v58  ;;  %v1576_v33 = vsub.f32 %v7054_v59, %v1557_v57  ;;  %1622 = vadd.xlane.f32.xlu1 %v7135_v48 }
 0x3e8   :  { %v7139_v44 = vpop.eup %5858  ;;  %v1563_v11 = vpop.xlane.xlu1 %1562 }
 0x3e9   :  { %5872 = vpow2.f32 %v1606_v56  ;;  %v1604_v38 = vmul.f32 1.442695, %v1576_v33  ;;  %v1579_v3 = vsub.f32 %v7057_v46, %v1563_v11  ;;  %1620 = vadd.xlane.f32.xlu0 %v7139_v44 }
 0x3ea   :  { %v7143_v51 = vpop.eup %5860  ;;  %v1561_v50 = vpop.xlane.xlu0 %1560 }
 0x3eb   :  { %5874 = vpow2.f32 %v1604_v38  ;;  %v1610_v54 = vmul.f32 1.442695, %v1579_v3  ;;  %v1578_v4 = vsub.f32 %v7069_v16, %v1561_v50  ;;  %1626 = vadd.xlane.f32.xlu1 %v7143_v51 }
 0x3ec   :  { %v7147_v59 = vpop.eup %5862 }
 0x3ed   :  { %5876 = vpow2.f32 %v1610_v54  ;;  %v1608_v39 = vmul.f32 1.442695, %v1578_v4  ;;  %1624 = vadd.xlane.f32.xlu0 %v7147_v59 }
 0x3ee   :  { %v7150_v13 = vpop.eup %5864 }
 0x3ef   :  { %5878 = vpow2.f32 %v1608_v39  ;;  %1630 = vadd.xlane.f32.xlu1 %v7150_v13 }
 0x3f0   :  { %v7153_v46 = vpop.eup %5866 }
 0x3f1   :  { %1628 = vadd.xlane.f32.xlu0 %v7153_v46 }
 0x3f2   :  { %v7156_v12 = vpop.eup %5868 }
 0x3f3   :  { %1634 = vadd.xlane.f32.xlu1 %v7156_v12 }
 0x3f4   :  { %v7159_v16 = vpop.eup %5870 }
 0x3f5   :  { %1632 = vadd.xlane.f32.xlu0 %v7159_v16 }
 0x3f6   :  { %v7162_v28 = vpop.eup %5872 }
 0x3f7   :  { %1638 = vadd.xlane.f32.xlu1 %v7162_v28 }
 0x3f8   :  { %v7165_v55 = vpop.eup %5874 }
 0x3f9   :  { %1636 = vadd.xlane.f32.xlu0 %v7165_v55 }
 0x3fa   :  { %v7168_v62 = vpop.eup %5876 }
 0x3fb   :  { %1642 = vadd.xlane.f32.xlu1 %v7168_v62 }
 0x3fc   :  { %v7176_v29 = vpop.eup %5878 }
 0x3fd   :  { %1640 = vadd.xlane.f32.xlu0 %v7176_v29 }
 0x400   :  { %v7180_v1 = vpop.f32.mrf.mxu1 }
 0x402   :  { %v7182_v2 = vpop.f32.mrf.mxu1 }
 0x404   :  { %v7184_v53 = vpop.f32.mrf.mxu1 }
 0x406   :  { %v7186_v52 = vpop.f32.mrf.mxu1 }
 0x408   :  { %v7188_v17 = vpop.f32.mrf.mxu1 }
 0x409   :  { %8251 = vst [vmem:[#allocation9_spill] sm:$0xff] %v7188_v17 }
 0x40a   :  { %v7190_v35 = vpop.f32.mrf.mxu1 }
 0x40b   :  { %8252 = vst [vmem:[#allocation8_spill] sm:$0xff] %v7190_v35 }
 0x40c   :  { %v7192_v47 = vpop.f32.mrf.mxu1 }
 0x40d   :  { %8253 = vst [vmem:[#allocation11_spill] sm:$0xff] %v7192_v47 }
 0x40e   :  { %v7194_v27 = vpop.f32.mrf.mxu1 }
 0x40f   :  { %8254 = vst [vmem:[#allocation10_spill] sm:$0xff] %v7194_v27 }
 0x410   :  { %v7196_v30 = vpop.f32.mrf.mxu1 }
 0x411   :  { %8255 = vst [vmem:[#allocation13_spill] sm:$0xff] %v7196_v30 }
 0x412   :  { %v7198_v15 = vpop.f32.mrf.mxu1 }
 0x413   :  { %8256 = vst [vmem:[#allocation12_spill] sm:$0xff] %v7198_v15 }
 0x414   :  { %v7200_v41 = vpop.f32.mrf.mxu1 }
 0x415   :  { %8257 = vst [vmem:[#allocation15_spill] sm:$0xff] %v7200_v41 }
 0x416   :  { %v7202_v40 = vpop.f32.mrf.mxu1 }
 0x417   :  { %8258 = vst [vmem:[#allocation14_spill] sm:$0xff] %v7202_v40 }
 0x418   :  { %v7204_v31 = vpop.f32.mrf.mxu1 }
 0x419   :  { %8259 = vst [vmem:[#allocation16_spill] sm:$0xff] %v7204_v31 }
 0x41a   :  { %v7206_v37 = vpop.f32.mrf.mxu1 }
 0x41b   :  { %8260 = vst [vmem:[#allocation17_spill] sm:$0xff] %v7206_v37 }
 0x41c   :  { %v7208_v61 = vpop.f32.mrf.mxu1 }
 0x41d   :  { %8261 = vst [vmem:[#allocation18_spill] sm:$0xff] %v7208_v61 }
 0x41e   :  { %v7210_v25 = vpop.f32.mrf.mxu1 }
 0x41f   :  { %8262 = vst [vmem:[#allocation19_spill] sm:$0xff] %v7210_v25 }
 0x420   :  { %v5420_v21 = vpop.f32.mrf.mxu1 }
 0x421   :  { %v7215_v14 = vadd.f32 %v5420_v21, %v7212_v26 }
 0x422   :  { %v2347_v18 = vpop.f32.mrf.mxu1 }
 0x423   :  { %v7218_v58 = vadd.f32 %v7212_v26, %v2347_v18 }
 0x424   :  { %v5423_v57 = vpop.f32.mrf.mxu1 }
 0x425   :  { %v7221_v56 = vadd.f32 %v5423_v57, %v7212_v26 }
 0x426   :  { %v2357_v33 = vpop.f32.mrf.mxu1 }
 0x427   :  { %v7224_v11 = vadd.f32 %v7212_v26, %v2357_v33 }
 0x428   :  { %v5426_v38 = vpop.f32.mrf.mxu1 }
 0x429   :  { %v7227_v3 = vadd.f32 %v5426_v38, %v7212_v26 }
 0x42a   :  { %v2367_v50 = vpop.f32.mrf.mxu1 }
 0x42b   :  { %v7230_v54 = vadd.f32 %v7212_v26, %v2367_v50 }
 0x42c   :  { %v7232_v4 = vpop.f32.mrf.mxu1 }
 0x42e   :  { %v7234_v39 = vpop.f32.mrf.mxu1 }
 0x430   :  { %v7236_v21 = vpop.f32.mrf.mxu1 }
 0x432   :  { %v7238_v18 = vpop.f32.mrf.mxu1 }
 0x434   :  { %v7240_v25 = vpop.f32.mrf.mxu1 }
 0x436   :  { %v7242_v61 = vpop.f32.mrf.mxu1 }
 0x438   :  { %v7244_v31 = vpop.f32.mrf.mxu1 }
 0x43a   :  { %v7246_v15 = vpop.f32.mrf.mxu1 }
 0x468   :  { %v1615_v57 = vpop.xlane.xlu1 %1614 }
 0x469   :  { %5880 = vrcp.f32 %v1615_v57 }
 0x46a   :  { %v1613_v33 = vpop.xlane.xlu0 %1612 }
 0x46b   :  { %5882 = vrcp.f32 %v1613_v33 }
 0x46c   :  { %v1619_v38 = vpop.xlane.xlu1 %1618 }
 0x46d   :  { %5884 = vrcp.f32 %v1619_v38  ;;  %v5441_v38 = vpop.f32.mrf.mxu1 }
 0x46e   :  { %v1617_v50 = vpop.xlane.xlu0 %1616 }
 0x46f   :  { %5886 = vrcp.f32 %v1617_v50 }
 0x470   :  { %v1623_v37 = vpop.xlane.xlu1 %1622 }
 0x471   :  { %5888 = vrcp.f32 %v1623_v37 }
 0x472   :  { %v1621_v40 = vpop.xlane.xlu0 %1620 }
 0x473   :  { %5890 = vrcp.f32 %v1621_v40  ;;  %v4343_v40 = vld [vmem:[%s8204_s2 + $0x20] sm:$0xff] }
 0x474   :  { %v1627_v41 = vpop.xlane.xlu1 %1626 }
 0x475   :  { %5892 = vrcp.f32 %v1627_v41 }
 0x476   :  { %v1625_v30 = vpop.xlane.xlu0 %1624  ;;  %v5881_v57 = vpop.eup %5880 }
 0x477   :  { %5894 = vrcp.f32 %v1625_v30  ;;  %v1647_v35 = vmul.f32 %v5881_v57, %v7119_v49  ;;  %v2423_v30 = vadd.f32 %v5441_v38, %v7212_v26 }
 0x478   :  { %v5883_v33 = vpop.eup %5882  ;;  %v1631_v27 = vpop.xlane.xlu1 %1630 }
 0x479   :  { %v1645_v47 = vmul.f32 %v5883_v33, %v7123_v34  ;;  %5896 = vrcp.f32 %v1631_v27 }
 0x47a   :  { %v1629_v50 = vpop.xlane.xlu0 %1628  ;;  %v5885_v17 = vpop.eup %5884 }
 0x47b   :  { %5898 = vrcp.f32 %v1629_v50  ;;  %5306 = vmatprep.mubr.f32.mxu0 %v1645_v47  ;;  %v1651_v49 = vmul.f32 %v5885_v17, %v7127_v32 }
 0x47c   :  { %v5887_v41 = vpop.eup %5886  ;;  %v1635_v37 = vpop.xlane.xlu1 %1634  ;;  %5307 = vmatmul.mubr.f32.vlgmr.msra.gmra.mxu0 %v1647_v35 }
 0x47d   :  { %5387 = vmatpush3.msra.mxu0 %v7174_v19  ;;  %v1649_v34 = vmul.f32 %v5887_v41, %v7131_v7  ;;  %5900 = vrcp.f32 %v1635_v37 }
 0x47e   :  { %v1633_v27 = vpop.xlane.xlu0 %1632  ;;  %5388 = vmatprep.subr.mxu0 %v4343_v40  ;;  %v5889_v57 = vpop.eup %5888 }
 0x47f   :  { %5902 = vrcp.f32 %v1633_v27  ;;  %5309 = vmatprep.mubr.f32.mxu0 %v1649_v34  ;;  %5389 = vmatpush3.msra.mxu0 %v4343_v40  ;;  %v1655_v7 = vmul.f32 %v5889_v57, %v7135_v48 }
 0x480   :  { %v5891_v47 = vpop.eup %5890  ;;  %v1639_v33 = vpop.xlane.xlu1 %1638  ;;  %5310 = vmatmul.mubr.f32.gmra.mxu0 %v1651_v49  ;;  %5442 = vmatprep.subr.msk.mxu0 %vm446_vm1, %v2423_v30 }
 0x481   :  { %v1653_v35 = vmul.f32 %v5891_v47, %v7139_v44  ;;  %5904 = vrcp.f32 %v1639_v33 }
 0x482   :  { %v1637_v19 = vpop.xlane.xlu0 %1636  ;;  %v5893_v38 = vpop.eup %5892 }
 0x483   :  { %5906 = vrcp.f32 %v1637_v19  ;;  %5312 = vmatprep.mubr.f32.mxu0 %v1653_v35  ;;  %v1659_v41 = vmul.f32 %v5893_v38, %v7143_v51 }
 0x484   :  { %v5895_v32 = vpop.eup %5894  ;;  %v1643_v17 = vpop.xlane.xlu1 %1642  ;;  %5313 = vmatmul.mubr.f32.gmra.mxu0 %v1655_v7 }
 0x485   :  { %v1657_v50 = vmul.f32 %v5895_v32, %v7147_v59  ;;  %5908 = vrcp.f32 %v1643_v17 }
 0x486   :  { %v1641_v40 = vpop.xlane.xlu0 %1640  ;;  %v5897_v37 = vpop.eup %5896 }
 0x487   :  { %5910 = vrcp.f32 %v1641_v40  ;;  %5315 = vmatprep.mubr.f32.mxu0 %v1657_v50  ;;  %v1663_v48 = vmul.f32 %v5897_v37, %v7150_v13 }
 0x488   :  { %v5899_v44 = vpop.eup %5898  ;;  %5316 = vmatmul.mubr.f32.gmra.mxu0 %v1659_v41 }
 0x489   :  { %v1661_v34 = vmul.f32 %v5899_v44, %v7153_v46 }
 0x48a   :  { %v5901_v27 = vpop.eup %5900 }
 0x48b   :  { %5318 = vmatprep.mubr.f32.mxu0 %v1661_v34  ;;  %v1667_v59 = vmul.f32 %v5901_v27, %v7156_v12 }
 0x48c   :  { %v5903_v49 = vpop.eup %5902  ;;  %5319 = vmatmul.mubr.f32.gmra.mxu0 %v1663_v48 }
 0x48d   :  { %v1665_v57 = vmul.f32 %v5903_v49, %v7159_v16  ;;  %v2417_v16 = vpop.f32.mrf.mxu1 }
 0x48e   :  { %v5905_v47 = vpop.eup %5904  ;;  %v2418_v12 = vadd.f32 %v7212_v26, %v2417_v16  ;;  %v4415_v16 = vld [vmem:[%s8208_s6 + $0x28] sm:$0xff] }
 0x48f   :  { %5321 = vmatprep.mubr.f32.mxu0 %v1665_v57  ;;  %v1671_v35 = vmul.f32 %v5905_v47, %v7162_v28  ;;  %v2413_v28 = vadd.f32 %v7244_v31, %v7212_v26  ;;  %5498 = vmatprep.subr.mxu1 %v4415_v16 }
 0x490   :  { %v5907_v51 = vpop.eup %5906  ;;  %5322 = vmatmul.mubr.f32.gmra.mxu0 %v1667_v59  ;;  %5499 = vmatpush3.msra.mxu1 %v4415_v16 }
 0x491   :  { %v1669_v33 = vmul.f32 %v5907_v51, %v7165_v55 }
 0x492   :  { %v5909_v19 = vpop.eup %5908 }
 0x493   :  { %5324 = vmatprep.mubr.f32.mxu0 %v1669_v33  ;;  %v1675_v7 = vmul.f32 %v5909_v19, %v7168_v62 }
 0x494   :  { %v5911_v46 = vpop.eup %5910  ;;  %5325 = vmatmul.mubr.f32.gmra.mxu0 %v1671_v35 }
 0x495   :  { %v1673_v13 = vmul.f32 %v5911_v46, %v7176_v29 }
 0x497   :  { %5327 = vmatprep.mubr.f32.mxu0 %v1673_v13 }
 0x498   :  { %5328 = vmatmul.mubr.f32.gmra.mxu0 %v1675_v7 }
 0x499   :  { %5390 = vmatprep.mubr.msk.f32.mxu0 %vm98_vm0, %v7063_v42 }
 0x49c   :  { %5391 = vmatmul.mubr.msk.f32.vlgmr.msra.gmra.mxu0 %vm98_vm0, %v6883_v45  ;;  %v2408_v45 = vadd.f32 %v7212_v26, %v7246_v15 }
 0x49d   :  { %5393 = vmatprep.mubr.msk.f32.mxu0 %vm98_vm0, %v6890_v6  ;;  %5443 = vmatpush3.xpose.msk.msra.mxu0 %vm446_vm1, %v2423_v30  ;;  %v2403_v6 = vadd.f32 %v7240_v25, %v7212_v26 }
 0x49e   :  { %5444 = vmatprep.subr.msk.mxu0 %vm446_vm1, %v2418_v12 }
 0x4a0   :  { %5394 = vmatmul.mubr.msk.f32.gmra.mxu0 %vm98_vm0, %v6897_v9  ;;  %v2398_v9 = vadd.f32 %v7212_v26, %v7242_v61 }
 0x4a1   :  { %5396 = vmatprep.mubr.msk.f32.mxu0 %vm98_vm0, %v6904_v43  ;;  %5445 = vmatpush3.xpose.msk.msra.mxu0 %vm446_vm1, %v2418_v12  ;;  %v2393_v43 = vadd.f32 %v7236_v21, %v7212_v26  ;;  %v4414_v12 = vld [vmem:[%s8208_s6 + $0x20] sm:$0xff] }
 0x4a2   :  { %5446 = vmatprep.subr.msk.mxu0 %vm446_vm1, %v2413_v28  ;;  %5500 = vmatprep.subr.mxu1 %v4414_v12 }
 0x4a3   :  { %5501 = vmatpush3.msra.mxu1 %v4414_v12  ;;  %v7579_v12 = vld [vmem:[#allocation2 + $0x40] sm:$0xff] }
 0x4a4   :  { %5397 = vmatmul.mubr.msk.f32.gmra.mxu0 %vm98_vm0, %v6911_v10  ;;  %v2388_v10 = vadd.f32 %v7212_v26, %v7238_v18  ;;  %8275 = vst [vmem:[#allocation32_spill] sm:$0xff] %v7579_v12 }
 0x4a5   :  { %5399 = vmatprep.mubr.msk.f32.mxu0 %vm98_vm0, %v6918_v63  ;;  %5447 = vmatpush3.xpose.msk.msra.mxu0 %vm446_vm1, %v2413_v28  ;;  %v2383_v63 = vadd.f32 %v7232_v4, %v7212_v26  ;;  %v7424_v28 = vld [vmem:[%s8202_s0 + $0x8] sm:$0xff] }
 0x4a6   :  { %5448 = vmatprep.subr.msk.mxu0 %vm446_vm1, %v2408_v45  ;;  %5503 = vmatmul.mubr.msk.f32.vlgmr.msra.gmra.mxu1 %vm98_vm0, %v7424_v28 }
 0x4a8   :  { %5400 = vmatmul.mubr.msk.f32.gmra.mxu0 %vm98_vm0, %v6925_v22  ;;  %v2378_v22 = vadd.f32 %v7212_v26, %v7234_v39 }
 0x4a9   :  { %5402 = vmatprep.mubr.msk.f32.mxu0 %vm98_vm0, %v6932_v0  ;;  %5449 = vmatpush3.xpose.msk.msra.mxu0 %vm446_vm1, %v2408_v45  ;;  %v7438_v45 = vld [vmem:[%s8202_s0 + $0x18] sm:$0xff] }
 0x4aa   :  { %5450 = vmatprep.subr.msk.mxu0 %vm446_vm1, %v2403_v6 }
 0x4ac   :  { %5403 = vmatmul.mubr.msk.f32.gmra.mxu0 %vm98_vm0, %v6939_v60 }
 0x4ad   :  { %5405 = vmatprep.mubr.msk.f32.mxu0 %vm98_vm0, %v6946_v5  ;;  %5451 = vmatpush3.xpose.msk.msra.mxu0 %vm446_vm1, %v2403_v6  ;;  %v7445_v6 = vld [vmem:[%s8202_s0 + $0x20] sm:$0xff] }
 0x4ae   :  { %5452 = vmatprep.subr.msk.mxu0 %vm446_vm1, %v2398_v9 }
 0x4b0   :  { %5406 = vmatmul.mubr.msk.f32.gmra.mxu0 %vm98_vm0, %v6953_v23 }
 0x4b1   :  { %5408 = vmatprep.mubr.msk.f32.mxu0 %vm98_vm0, %v6960_v8  ;;  %5453 = vmatpush3.xpose.msk.msra.mxu0 %vm446_vm1, %v2398_v9  ;;  %v7452_v9 = vld [vmem:[%s8202_s0 + $0x28] sm:$0xff] }
 0x4b2   :  { %5454 = vmatprep.subr.msk.mxu0 %vm446_vm1, %v2393_v43 }
 0x4b4   :  { %5409 = vmatmul.mubr.msk.f32.gmra.mxu0 %vm98_vm0, %v6967_v36 }
 0x4b5   :  { %5411 = vmatprep.mubr.msk.f32.mxu0 %vm98_vm0, %v6974_v20  ;;  %5455 = vmatpush3.xpose.msk.msra.mxu0 %vm446_vm1, %v2393_v43  ;;  %v7459_v43 = vld [vmem:[%s8202_s0 + $0x30] sm:$0xff] }
 0x4b6   :  { %5456 = vmatprep.subr.msk.mxu0 %vm446_vm1, %v2388_v10 }
 0x4b8   :  { %5412 = vmatmul.mubr.msk.f32.gmra.mxu0 %vm98_vm0, %v6981_v24 }
 0x4b9   :  { %5457 = vmatpush3.xpose.msk.msra.mxu0 %vm446_vm1, %v2388_v10  ;;  %v7466_v10 = vld [vmem:[%s8202_s0 + $0x38] sm:$0xff] }
 0x4ba   :  { %5458 = vmatprep.subr.msk.mxu0 %vm446_vm1, %v2383_v63 }
 0x4bd   :  { %5459 = vmatpush3.xpose.msk.msra.mxu0 %vm446_vm1, %v2383_v63  ;;  %v7473_v63 = vld [vmem:[%s8202_s0 + $0x40] sm:$0xff] }
 0x4be   :  { %5460 = vmatprep.subr.msk.mxu0 %vm446_vm1, %v2378_v22 }
 0x4c1   :  { %5461 = vmatpush3.xpose.msk.msra.mxu0 %vm446_vm1, %v2378_v22  ;;  %v7480_v22 = vld [vmem:[%s8202_s0 + $0x48] sm:$0xff] }
 0x4c2   :  { %5462 = vmatprep.subr.msk.mxu0 %vm446_vm1, %v7227_v3 }
 0x4c5   :  { %5463 = vmatpush3.xpose.msk.msra.mxu0 %vm446_vm1, %v7227_v3 }
 0x4c6   :  { %5464 = vmatprep.subr.msk.mxu0 %vm446_vm1, %v7230_v54 }
 0x4c9   :  { %5465 = vmatpush3.xpose.msk.msra.mxu0 %vm446_vm1, %v7230_v54 }
 0x4ca   :  { %5466 = vmatprep.subr.msk.mxu0 %vm446_vm1, %v7221_v56 }
 0x4cd   :  { %5467 = vmatpush3.xpose.msk.msra.mxu0 %vm446_vm1, %v7221_v56 }
 0x4ce   :  { %5468 = vmatprep.subr.msk.mxu0 %vm446_vm1, %v7224_v11 }
 0x4d1   :  { %5469 = vmatpush3.xpose.msk.msra.mxu0 %vm446_vm1, %v7224_v11 }
 0x4d2   :  { %5470 = vmatprep.subr.msk.mxu0 %vm446_vm1, %v7215_v14 }
 0x4d5   :  { %5471 = vmatpush3.xpose.msk.msra.mxu0 %vm446_vm1, %v7215_v14 }
 0x4d6   :  { %5472 = vmatprep.subr.msk.mxu0 %vm446_vm1, %v7218_v58 }
 0x4d9   :  { %5473 = vmatpush3.xpose.msk.msra.mxu0 %vm446_vm1, %v7218_v58  ;;  %v4346_v58 = vld [vmem:[%s8205_s3 + $0x2] ss:$0 sm:$0xff] }
 0x53c   :  { %v7362_v0 = vpop.f32.mrf.mxu0 }
 0x53e   :  { %v7364_v60 = vpop.f32.mrf.mxu0 }
 0x540   :  { %v7366_v5 = vpop.f32.mrf.mxu0 }
 0x542   :  { %v7368_v23 = vpop.f32.mrf.mxu0 }
 0x544   :  { %v7370_v8 = vpop.f32.mrf.mxu0 }
 0x546   :  { %v7372_v36 = vpop.f32.mrf.mxu0 }
 0x548   :  { %v7374_v20 = vpop.f32.mrf.mxu0 }
 0x54a   :  { %v7376_v24 = vpop.f32.mrf.mxu0 }
 0x54c   :  { %v7378_v55 = vpop.f32.mrf.mxu0 }
 0x54e   :  { %v7380_v62 = vpop.f32.mrf.mxu0 }
 0x550   :  { %v7382_v29 = vpop.f32.mrf.mxu0 }
 0x552   :  { %v7384_v15 = vpop.f32.mrf.mxu0 }
 0x554   :  { %v7386_v31 = vpop.f32.mrf.mxu0 }
 0x556   :  { %v7388_v61 = vpop.f32.mrf.mxu0 }
 0x557   :  { %8263 = vst [vmem:[#allocation20_spill] sm:$0xff] %v7388_v61 }
 0x558   :  { %v7390_v25 = vpop.f32.mrf.mxu0 }
 0x559   :  { %8264 = vst [vmem:[#allocation21_spill] sm:$0xff] %v7390_v25 }
 0x55a   :  { %v7392_v26 = vpop.f32.mrf.mxu0 }
 0x55b   :  { %8265 = vst [vmem:[#allocation22_spill] sm:$0xff] %v7392_v26 }
 0x55c   :  { %v5392_v14 = vpop.f32.mrf.mxu0 }
 0x55d   :  { %v2197_v3 = vadd.f32 %v5392_v14, %v4346_v58  ;;  %v7487_v14 = vld [vmem:[%s8202_s0 + $0x50] sm:$0xff] }
 0x55e   :  { %v2191_v56 = vpop.f32.mrf.mxu0 }
 0x55f   :  { %v2192_v11 = vadd.f32 %v4346_v58, %v2191_v56  ;;  %v7501_v56 = vld [vmem:[%s8202_s0 + $0x60] sm:$0xff] }
 0x560   :  { %v5395_v54 = vpop.f32.mrf.mxu0 }
 0x561   :  { %5474 = vmatprep.mubr.msk.f32.mxu0 %vm446_vm1, %v2192_v11  ;;  %v2207_v21 = vadd.f32 %v5395_v54, %v4346_v58  ;;  %v7508_v11 = vld [vmem:[%s8202_s0 + $0x68] sm:$0xff]  ;;  %v7522_v54 = vld [vmem:[%s8202_s0 + $0x78] sm:$0xff] }
 0x562   :  { %v2201_v4 = vpop.f32.mrf.mxu0  ;;  %5475 = vmatmul.mubr.msk.f32.vlgmr.msra.gmra.mxu0 %vm446_vm1, %v2197_v3  ;;  %v7515_v3 = vld [vmem:[%s8202_s0 + $0x70] sm:$0xff] }
 0x563   :  { %v2202_v39 = vadd.f32 %v4346_v58, %v2201_v4 }
 0x564   :  { %v5398_v18 = vpop.f32.mrf.mxu0 }
 0x565   :  { %5477 = vmatprep.mubr.msk.f32.mxu0 %vm446_vm1, %v2202_v39  ;;  %v2217_v32 = vadd.f32 %v5398_v18, %v4346_v58  ;;  %v7526_v39 = vld [vmem:[#allocation2 + $0x8] sm:$0xff] }
 0x566   :  { %v2211_v30 = vpop.f32.mrf.mxu0  ;;  %5478 = vmatmul.mubr.msk.f32.gmra.mxu0 %vm446_vm1, %v2207_v21  ;;  %8266 = vst [vmem:[#allocation23_spill] sm:$0xff] %v7526_v39 }
 0x567   :  { %v2212_v38 = vadd.f32 %v4346_v58, %v2211_v30  ;;  %v7531_v30 = vld [vmem:[#allocation2] sm:$0xff] }
 0x568   :  { %v5401_v17 = vpop.f32.mrf.mxu0  ;;  %8267 = vst [vmem:[#allocation24_spill] sm:$0xff] %v7531_v30 }
 0x569   :  { %5480 = vmatprep.mubr.msk.f32.mxu0 %vm446_vm1, %v2212_v38  ;;  %v2227_v41 = vadd.f32 %v5401_v17, %v4346_v58  ;;  %v7537_v17 = vld [vmem:[#allocation2 + $0x18] sm:$0xff] }
 0x56a   :  { %v2221_v50 = vpop.f32.mrf.mxu0  ;;  %5481 = vmatmul.mubr.msk.f32.gmra.mxu0 %vm446_vm1, %v2217_v32  ;;  %8268 = vst [vmem:[#allocation25_spill] sm:$0xff] %v7537_v17 }
 0x56b   :  { %v2222_v40 = vadd.f32 %v4346_v58, %v2221_v50 }
 0x56c   :  { %v5404_v37 = vpop.f32.mrf.mxu0 }
 0x56d   :  { %5483 = vmatprep.mubr.msk.f32.mxu0 %vm446_vm1, %v2222_v40  ;;  %v2237_v48 = vadd.f32 %v5404_v37, %v4346_v58 }
 0x56e   :  { %v2231_v44 = vpop.f32.mrf.mxu0  ;;  %5484 = vmatmul.mubr.msk.f32.gmra.mxu0 %vm446_vm1, %v2227_v41  ;;  %v7543_v41 = vld [vmem:[#allocation2 + $0x10] sm:$0xff] }
 0x56f   :  { %v2232_v34 = vadd.f32 %v4346_v58, %v2231_v44  ;;  %8269 = vst [vmem:[#allocation26_spill] sm:$0xff] %v7543_v41 }
 0x570   :  { %v5407_v27 = vpop.f32.mrf.mxu0 }
 0x571   :  { %5486 = vmatprep.mubr.msk.f32.mxu0 %vm446_vm1, %v2232_v34  ;;  %v2247_v59 = vadd.f32 %v5407_v27, %v4346_v58  ;;  %v7549_v34 = vld [vmem:[#allocation2 + $0x28] sm:$0xff] }
 0x572   :  { %v2241_v49 = vpop.f32.mrf.mxu0  ;;  %5487 = vmatmul.mubr.msk.f32.gmra.mxu0 %vm446_vm1, %v2237_v48  ;;  %8270 = vst [vmem:[#allocation27_spill] sm:$0xff] %v7549_v34 }
 0x573   :  { %v2242_v57 = vadd.f32 %v4346_v58, %v2241_v49  ;;  %v7555_v49 = vld [vmem:[#allocation2 + $0x20] sm:$0xff] }
 0x574   :  { %v5410_v47 = vpop.f32.mrf.mxu0  ;;  %8271 = vst [vmem:[#allocation28_spill] sm:$0xff] %v7555_v49 }
 0x575   :  { %5489 = vmatprep.mubr.msk.f32.mxu0 %vm446_vm1, %v2242_v57  ;;  %v2257_v35 = vadd.f32 %v5410_v47, %v4346_v58  ;;  %v7561_v47 = vld [vmem:[#allocation2 + $0x38] sm:$0xff] }
 0x576   :  { %v2251_v51 = vpop.f32.mrf.mxu0  ;;  %5490 = vmatmul.mubr.msk.f32.gmra.mxu0 %vm446_vm1, %v2247_v59  ;;  %8272 = vst [vmem:[#allocation29_spill] sm:$0xff] %v7561_v47 }
 0x577   :  { %v2252_v33 = vadd.f32 %v4346_v58, %v2251_v51 }
 0x578   :  { %v5413_v19 = vpop.f32.mrf.mxu0 }
 0x579   :  { %5492 = vmatprep.mubr.msk.f32.mxu0 %vm446_vm1, %v2252_v33  ;;  %v2267_v7 = vadd.f32 %v5413_v19, %v4346_v58 }
 0x57a   :  { %v2261_v46 = vpop.f32.mrf.mxu0  ;;  %5493 = vmatmul.mubr.msk.f32.gmra.mxu0 %vm446_vm1, %v2257_v35  ;;  %v7567_v35 = vld [vmem:[#allocation2 + $0x30] sm:$0xff] }
 0x57b   :  { %v2262_v13 = vadd.f32 %v4346_v58, %v2261_v46  ;;  %v7494_v58 = vld [vmem:[%s8202_s0 + $0x58] sm:$0xff]  ;;  %8273 = vst [vmem:[#allocation30_spill] sm:$0xff] %v7567_v35 }
 0x57d   :  { %5495 = vmatprep.mubr.msk.f32.mxu0 %vm446_vm1, %v2262_v13  ;;  %v7573_v13 = vld [vmem:[#allocation2 + $0x48] sm:$0xff] }
 0x57e   :  { %5496 = vmatmul.mubr.msk.f32.gmra.mxu0 %vm446_vm1, %v2267_v7  ;;  %8274 = vst [vmem:[#allocation31_spill] sm:$0xff] %v7573_v13 }
 0x57f   :  { %5586 = vmatprep.mubr.msk.f32.mxu0 %vm98_vm0, %v7063_v42  ;;  %v7431_v42 = vld [vmem:[%s8202_s0 + $0x10] sm:$0xff] }
 0x580   :  { %5505 = vmatprep.mubr.msk.f32.mxu1 %vm98_vm0, %v7431_v42 }
 0x581   :  { %5506 = vmatmul.mubr.msk.f32.gmra.mxu1 %vm98_vm0, %v7438_v45 }
 0x582   :  { %5508 = vmatprep.mubr.msk.f32.mxu1 %vm98_vm0, %v7445_v6 }
 0x585   :  { %5509 = vmatmul.mubr.msk.f32.gmra.mxu1 %vm98_vm0, %v7452_v9 }
 0x586   :  { %5511 = vmatprep.mubr.msk.f32.mxu1 %vm98_vm0, %v7459_v43 }
 0x589   :  { %5512 = vmatmul.mubr.msk.f32.gmra.mxu1 %vm98_vm0, %v7466_v10 }
 0x58a   :  { %5514 = vmatprep.mubr.msk.f32.mxu1 %vm98_vm0, %v7473_v63 }
 0x58d   :  { %5515 = vmatmul.mubr.msk.f32.gmra.mxu1 %vm98_vm0, %v7480_v22 }
 0x58e   :  { %5517 = vmatprep.mubr.msk.f32.mxu1 %vm98_vm0, %v7487_v14 }
 0x591   :  { %5518 = vmatmul.mubr.msk.f32.gmra.mxu1 %vm98_vm0, %v7494_v58 }
 0x592   :  { %5520 = vmatprep.mubr.msk.f32.mxu1 %vm98_vm0, %v7501_v56 }
 0x595   :  { %5521 = vmatmul.mubr.msk.f32.gmra.mxu1 %vm98_vm0, %v7508_v11 }
 0x596   :  { %5523 = vmatprep.mubr.msk.f32.mxu1 %vm98_vm0, %v7515_v3 }
 0x599   :  { %5524 = vmatmul.mubr.msk.f32.gmra.mxu1 %vm98_vm0, %v7522_v54 }
 0x622   :  { %v5476_v4 = vpop.f32.mrf.mxu0 }
 0x623   :  { %v7529_v21 = vadd.f32 %v7526_v39, %v5476_v4 }
 0x624   :  { %v2588_v18 = vpop.f32.mrf.mxu0 }
 0x625   :  { %v7534_v38 = vadd.f32 %v7531_v30, %v2588_v18  ;;  %2669 = vmax.xlane.f32.xlu1 %v7529_v21 }
 0x626   :  { %v5479_v32 = vpop.f32.mrf.mxu0 }
 0x627   :  { %v7540_v50 = vadd.f32 %v7537_v17, %v5479_v32  ;;  %2667 = vmax.xlane.f32.xlu0 %v7534_v38  ;;  %v7585_v32 = vld [vmem:[#allocation2 + $0x58] sm:$0xff] }
 0x628   :  { %v2598_v40 = vpop.f32.mrf.mxu0  ;;  %8276 = vst [vmem:[#allocation33_spill] sm:$0xff] %v7585_v32 }
 0x629   :  { %v7546_v37 = vadd.f32 %v7543_v41, %v2598_v40  ;;  %2673 = vmax.xlane.f32.xlu1 %v7540_v50 }
 0x62a   :  { %v5482_v44 = vpop.f32.mrf.mxu0 }
 0x62b   :  { %v7552_v48 = vadd.f32 %v7549_v34, %v5482_v44  ;;  %2671 = vmax.xlane.f32.xlu0 %v7546_v37 }
 0x62c   :  { %v2608_v27 = vpop.f32.mrf.mxu0 }
 0x62d   :  { %v7558_v57 = vadd.f32 %v7555_v49, %v2608_v27  ;;  %2677 = vmax.xlane.f32.xlu1 %v7552_v48  ;;  %v7591_v27 = vld [vmem:[#allocation2 + $0x50] sm:$0xff] }
 0x62e   :  { %v5485_v59 = vpop.f32.mrf.mxu0  ;;  %8277 = vst [vmem:[#allocation34_spill] sm:$0xff] %v7591_v27 }
 0x62f   :  { %v7564_v51 = vadd.f32 %v7561_v47, %v5485_v59  ;;  %2675 = vmax.xlane.f32.xlu0 %v7558_v57 }
 0x630   :  { %v2618_v33 = vpop.f32.mrf.mxu0 }
 0x631   :  { %v7570_v19 = vadd.f32 %v7567_v35, %v2618_v33  ;;  %2681 = vmax.xlane.f32.xlu1 %v7564_v51 }
 0x632   :  { %v5488_v46 = vpop.f32.mrf.mxu0 }
 0x633   :  { %v7576_v7 = vadd.f32 %v7573_v13, %v5488_v46  ;;  %2679 = vmax.xlane.f32.xlu0 %v7570_v19  ;;  %v7597_v46 = vld [vmem:[#allocation2 + $0x68] sm:$0xff] }
 0x634   :  { %v2628_v16 = vpop.f32.mrf.mxu0  ;;  %8278 = vst [vmem:[#allocation35_spill] sm:$0xff] %v7597_v46 }
 0x635   :  { %v7582_v4 = vadd.f32 %v7579_v12, %v2628_v16  ;;  %2685 = vmax.xlane.f32.xlu1 %v7576_v7 }
 0x636   :  { %v5491_v18 = vpop.f32.mrf.mxu0 }
 0x637   :  { %v7588_v40 = vadd.f32 %v7585_v32, %v5491_v18  ;;  %2683 = vmax.xlane.f32.xlu0 %v7582_v4  ;;  %v7603_v32 = vld [vmem:[#allocation2 + $0x60] sm:$0xff] }
 0x638   :  { %v2638_v44 = vpop.f32.mrf.mxu0  ;;  %8279 = vst [vmem:[#allocation36_spill] sm:$0xff] %v7603_v32 }
 0x639   :  { %v7594_v59 = vadd.f32 %v7591_v27, %v2638_v44  ;;  %2689 = vmax.xlane.f32.xlu1 %v7588_v40  ;;  %v7609_v27 = vld [vmem:[#allocation2 + $0x78] sm:$0xff] }
 0x63a   :  { %v5494_v33 = vpop.f32.mrf.mxu0  ;;  %8280 = vst [vmem:[#allocation37_spill] sm:$0xff] %v7609_v27 }
 0x63b   :  { %v7600_v16 = vadd.f32 %v7597_v46, %v5494_v33  ;;  %2687 = vmax.xlane.f32.xlu0 %v7594_v59  ;;  %v7615_v46 = vld [vmem:[#allocation2 + $0x70] sm:$0xff] }
 0x63c   :  { %v2648_v18 = vpop.f32.mrf.mxu0  ;;  %8281 = vst [vmem:[#allocation38_spill] sm:$0xff] %v7615_v46 }
 0x63d   :  { %v7606_v12 = vadd.f32 %v7603_v32, %v2648_v18  ;;  %2693 = vmax.xlane.f32.xlu1 %v7600_v16  ;;  %v5504_v18 = vpop.f32.mrf.mxu1 }
 0x63e   :  { %v5497_v44 = vpop.f32.mrf.mxu0 }
 0x63f   :  { %v7612_v13 = vadd.f32 %v7609_v27, %v5497_v44  ;;  %2691 = vmax.xlane.f32.xlu0 %v7606_v12  ;;  %v2880_v32 = vpop.f32.mrf.mxu1 }
 0x640   :  { %v2658_v33 = vpop.f32.mrf.mxu0 }
 0x641   :  { %v7618_v35 = vadd.f32 %v7615_v46, %v2658_v33  ;;  %2697 = vmax.xlane.f32.xlu1 %v7612_v13  ;;  %v5507_v47 = vpop.f32.mrf.mxu1 }
 0x643   :  { %2695 = vmax.xlane.f32.xlu0 %v7618_v35  ;;  %v2890_v49 = vpop.f32.mrf.mxu1 }
 0x645   :  { %v5510_v34 = vpop.f32.mrf.mxu1 }
 0x647   :  { %v2900_v41 = vpop.f32.mrf.mxu1 }
 0x649   :  { %v5513_v44 = vpop.f32.mrf.mxu1 }
 0x64b   :  { %v2910_v27 = vpop.f32.mrf.mxu1 }
 0x64d   :  { %v5516_v17 = vpop.f32.mrf.mxu1 }
 0x64f   :  { %v2920_v30 = vpop.f32.mrf.mxu1 }
 0x651   :  { %v5519_v39 = vpop.f32.mrf.mxu1 }
 0x653   :  { %v2930_v26 = vpop.f32.mrf.mxu1 }
 0x655   :  { %v5522_v25 = vpop.f32.mrf.mxu1 }
 0x657   :  { %v2940_v61 = vpop.f32.mrf.mxu1 }
 0x659   :  { %v5525_v33 = vpop.f32.mrf.mxu1 }
 0x65a   :  { %5526 = vmatprep.subr.mxu1 %v5525_v33 }
 0x65b   :  { %v2950_v46 = vpop.f32.mrf.mxu1  ;;  %5527 = vmatpush3.msra.mxu1 %v5525_v33 }
 0x65c   :  { %5528 = vmatprep.subr.mxu1 %v2950_v46 }
 0x65d   :  { %5529 = vmatpush3.msra.mxu1 %v2950_v46 }
 0x65e   :  { %5530 = vmatprep.subr.mxu1 %v5522_v25 }
 0x65f   :  { %5531 = vmatpush3.msra.mxu1 %v5522_v25 }
 0x660   :  { %5532 = vmatprep.subr.mxu1 %v2940_v61 }
 0x661   :  { %5533 = vmatpush3.msra.mxu1 %v2940_v61 }
 0x662   :  { %5534 = vmatprep.subr.mxu1 %v5519_v39 }
 0x663   :  { %5535 = vmatpush3.msra.mxu1 %v5519_v39 }
 0x664   :  { %5536 = vmatprep.subr.mxu1 %v2930_v26 }
 0x665   :  { %5537 = vmatpush3.msra.mxu1 %v2930_v26 }
 0x666   :  { %5538 = vmatprep.subr.mxu1 %v5516_v17 }
 0x667   :  { %5539 = vmatpush3.msra.mxu1 %v5516_v17 }
 0x668   :  { %5540 = vmatprep.subr.mxu1 %v2920_v30 }
 0x669   :  { %5541 = vmatpush3.msra.mxu1 %v2920_v30 }
 0x66a   :  { %5542 = vmatprep.subr.mxu1 %v5513_v44 }
 0x66b   :  { %5543 = vmatpush3.msra.mxu1 %v5513_v44 }
 0x66c   :  { %5544 = vmatprep.subr.mxu1 %v2910_v27 }
 0x66d   :  { %5545 = vmatpush3.msra.mxu1 %v2910_v27 }
 0x66e   :  { %5546 = vmatprep.subr.mxu1 %v5510_v34 }
 0x66f   :  { %5547 = vmatpush3.msra.mxu1 %v5510_v34 }
 0x670   :  { %5548 = vmatprep.subr.mxu1 %v2900_v41 }
 0x671   :  { %5549 = vmatpush3.msra.mxu1 %v2900_v41 }
 0x672   :  { %5550 = vmatprep.subr.mxu1 %v5507_v47 }
 0x673   :  { %5551 = vmatpush3.msra.mxu1 %v5507_v47 }
 0x674   :  { %5552 = vmatprep.subr.mxu1 %v2890_v49 }
 0x675   :  { %5553 = vmatpush3.msra.mxu1 %v2890_v49 }
 0x676   :  { %5554 = vmatprep.subr.mxu1 %v5504_v18 }
 0x677   :  { %5555 = vmatpush3.msra.mxu1 %v5504_v18 }
 0x678   :  { %5556 = vmatprep.subr.mxu1 %v2880_v32 }
 0x679   :  { %5557 = vmatpush3.msra.mxu1 %v2880_v32 }
 0x6ae   :  { %v2670_v61 = vpop.xlane.xlu1 %2669 }
 0x6af   :  { %v2700_v25 = vsub.f32 %v7529_v21, %v2670_v61 }
 0x6b0   :  { %v2668_v26 = vpop.xlane.xlu0 %2667 }
 0x6b1   :  { %v2717_v39 = vmul.f32 1.442695, %v2700_v25  ;;  %v2699_v30 = vsub.f32 %v7534_v38, %v2668_v26 }
 0x6b2   :  { %v2674_v17 = vpop.xlane.xlu1 %2673 }
 0x6b3   :  { %5912 = vpow2.f32 %v2717_v39  ;;  %v2715_v34 = vmul.f32 1.442695, %v2699_v30  ;;  %v2702_v41 = vsub.f32 %v7540_v50, %v2674_v17 }
 0x6b4   :  { %v2672_v27 = vpop.xlane.xlu0 %2671 }
 0x6b5   :  { %5914 = vpow2.f32 %v2715_v34  ;;  %v2721_v47 = vmul.f32 1.442695, %v2702_v41  ;;  %v2701_v49 = vsub.f32 %v7546_v37, %v2672_v27 }
 0x6b6   :  { %v2678_v46 = vpop.xlane.xlu1 %2677 }
 0x6b7   :  { %5916 = vpow2.f32 %v2721_v47  ;;  %v2719_v32 = vmul.f32 1.442695, %v2701_v49  ;;  %v2704_v18 = vsub.f32 %v7552_v48, %v2678_v46 }
 0x6b8   :  { %v2676_v21 = vpop.xlane.xlu0 %2675 }
 0x6b9   :  { %5918 = vpow2.f32 %v2719_v32  ;;  %v2725_v44 = vmul.f32 1.442695, %v2704_v18  ;;  %v2703_v38 = vsub.f32 %v7558_v57, %v2676_v21 }
 0x6ba   :  { %v2682_v33 = vpop.xlane.xlu1 %2681 }
 0x6bb   :  { %5920 = vpow2.f32 %v2725_v44  ;;  %v2723_v61 = vmul.f32 1.442695, %v2703_v38  ;;  %v2706_v50 = vsub.f32 %v7564_v51, %v2682_v33 }
 0x6bc   :  { %v2680_v25 = vpop.xlane.xlu0 %2679 }
 0x6bd   :  { %5922 = vpow2.f32 %v2723_v61  ;;  %v2729_v26 = vmul.f32 1.442695, %v2706_v50  ;;  %v2705_v37 = vsub.f32 %v7570_v19, %v2680_v25 }
 0x6be   :  { %v2686_v39 = vpop.xlane.xlu1 %2685 }
 0x6bf   :  { %5924 = vpow2.f32 %v2729_v26  ;;  %v2727_v30 = vmul.f32 1.442695, %v2705_v37  ;;  %v2708_v48 = vsub.f32 %v7576_v7, %v2686_v39 }
 0x6c0   :  { %v7631_v17 = vpop.eup %5912  ;;  %v2684_v34 = vpop.xlane.xlu0 %2683 }
 0x6c1   :  { %5926 = vpow2.f32 %v2727_v30  ;;  %v2733_v57 = vmul.f32 1.442695, %v2708_v48  ;;  %v2707_v41 = vsub.f32 %v7582_v4, %v2684_v34  ;;  %2749 = vadd.xlane.f32.xlu1 %v7631_v17 }
 0x6c2   :  { %v7635_v51 = vpop.eup %5914  ;;  %v2690_v27 = vpop.xlane.xlu1 %2689 }
 0x6c3   :  { %5928 = vpow2.f32 %v2733_v57  ;;  %v2731_v47 = vmul.f32 1.442695, %v2707_v41  ;;  %v2710_v19 = vsub.f32 %v7588_v40, %v2690_v27  ;;  %2747 = vadd.xlane.f32.xlu0 %v7635_v51 }
 0x6c4   :  { %v7639_v49 = vpop.eup %5916  ;;  %v2688_v7 = vpop.xlane.xlu0 %2687 }
 0x6c5   :  { %5930 = vpow2.f32 %v2731_v47  ;;  %v2737_v46 = vmul.f32 1.442695, %v2710_v19  ;;  %v2709_v32 = vsub.f32 %v7594_v59, %v2688_v7  ;;  %2753 = vadd.xlane.f32.xlu1 %v7639_v49  ;;  %v4453_v19 = vld [vmem:[%s8206_s4 + $0x38] sm:$0xff] }
 0x6c6   :  { %v7643_v4 = vpop.eup %5918  ;;  %v2694_v18 = vpop.xlane.xlu1 %2693  ;;  %5610 = vmatprep.subr.mxu1 %v4453_v19 }
 0x6c7   :  { %5932 = vpow2.f32 %v2737_v46  ;;  %v2735_v21 = vmul.f32 1.442695, %v2709_v32  ;;  %v2712_v44 = vsub.f32 %v7600_v16, %v2694_v18  ;;  %2751 = vadd.xlane.f32.xlu0 %v7643_v4  ;;  %v4433_v46 = vld [vmem:[%s8204_s2 + $0x38] sm:$0xff]  ;;  %v4432_v32 = vld [vmem:[%s8204_s2 + $0x30] sm:$0xff] }
 0x6c8   :  { %v7647_v40 = vpop.eup %5920  ;;  %v2692_v38 = vpop.xlane.xlu0 %2691  ;;  %5582 = vmatprep.subr.mxu0 %v4433_v46 }
 0x6c9   :  { %5934 = vpow2.f32 %v2735_v21  ;;  %v2741_v33 = vmul.f32 1.442695, %v2712_v44  ;;  %v2711_v61 = vsub.f32 %v7606_v12, %v2692_v38  ;;  %2757 = vadd.xlane.f32.xlu1 %v7647_v40  ;;  %5583 = vmatpush3.msra.mxu0 %v4433_v46 }
 0x6ca   :  { %v7651_v59 = vpop.eup %5922  ;;  %v2698_v50 = vpop.xlane.xlu1 %2697  ;;  %5584 = vmatprep.subr.mxu0 %v4432_v32 }
 0x6cb   :  { %5936 = vpow2.f32 %v2741_v33  ;;  %v2739_v25 = vmul.f32 1.442695, %v2711_v61  ;;  %v2714_v26 = vsub.f32 %v7612_v13, %v2698_v50  ;;  %2755 = vadd.xlane.f32.xlu0 %v7651_v59  ;;  %5585 = vmatpush3.msra.mxu0 %v4432_v32 }
 0x6cc   :  { %v7655_v16 = vpop.eup %5924  ;;  %v2696_v37 = vpop.xlane.xlu0 %2695  ;;  %5587 = vmatmul.mubr.msk.f32.vlgmr.msra.gmra.mxu0 %vm98_vm0, %v7424_v28 }
 0x6cd   :  { %5938 = vpow2.f32 %v2739_v25  ;;  %v2745_v39 = vmul.f32 1.442695, %v2714_v26  ;;  %v2713_v30 = vsub.f32 %v7618_v35, %v2696_v37  ;;  %2761 = vadd.xlane.f32.xlu1 %v7655_v16  ;;  %5589 = vmatprep.mubr.msk.f32.mxu0 %vm98_vm0, %v7431_v42 }
 0x6ce   :  { %v7659_v12 = vpop.eup %5926 }
 0x6cf   :  { %5940 = vpow2.f32 %v2745_v39  ;;  %v2743_v48 = vmul.f32 1.442695, %v2713_v30  ;;  %2759 = vadd.xlane.f32.xlu0 %v7659_v12 }
 0x6d0   :  { %v7662_v34 = vpop.eup %5928  ;;  %5590 = vmatmul.mubr.msk.f32.gmra.mxu0 %vm98_vm0, %v7438_v45 }
 0x6d1   :  { %5942 = vpow2.f32 %v2743_v48  ;;  %2765 = vadd.xlane.f32.xlu1 %v7662_v34  ;;  %5592 = vmatprep.mubr.msk.f32.mxu0 %vm98_vm0, %v7445_v6 }
 0x6d2   :  { %v7665_v13 = vpop.eup %5930 }
 0x6d3   :  { %2763 = vadd.xlane.f32.xlu0 %v7665_v13 }
 0x6d4   :  { %v7668_v57 = vpop.eup %5932  ;;  %5593 = vmatmul.mubr.msk.f32.gmra.mxu0 %vm98_vm0, %v7452_v9 }
 0x6d5   :  { %2769 = vadd.xlane.f32.xlu1 %v7668_v57  ;;  %5595 = vmatprep.mubr.msk.f32.mxu0 %vm98_vm0, %v7459_v43 }
 0x6d6   :  { %v7671_v35 = vpop.eup %5934 }
 0x6d7   :  { %2767 = vadd.xlane.f32.xlu0 %v7671_v35 }
 0x6d8   :  { %v7674_v41 = vpop.eup %5936  ;;  %5596 = vmatmul.mubr.msk.f32.gmra.mxu0 %vm98_vm0, %v7466_v10 }
 0x6d9   :  { %2773 = vadd.xlane.f32.xlu1 %v7674_v41  ;;  %5598 = vmatprep.mubr.msk.f32.mxu0 %vm98_vm0, %v7473_v63 }
 0x6da   :  { %v7677_v27 = vpop.eup %5938 }
 0x6db   :  { %2771 = vadd.xlane.f32.xlu0 %v7677_v27 }
 0x6dc   :  { %v7680_v47 = vpop.eup %5940  ;;  %5599 = vmatmul.mubr.msk.f32.gmra.mxu0 %vm98_vm0, %v7480_v22 }
 0x6dd   :  { %2777 = vadd.xlane.f32.xlu1 %v7680_v47  ;;  %5601 = vmatprep.mubr.msk.f32.mxu0 %vm98_vm0, %v7487_v14 }
 0x6de   :  { %v7686_v7 = vpop.eup %5942 }
 0x6df   :  { %2775 = vadd.xlane.f32.xlu0 %v7686_v7 }
 0x6e0   :  { %5602 = vmatmul.mubr.msk.f32.gmra.mxu0 %vm98_vm0, %v7494_v58 }
 0x6e1   :  { %5604 = vmatprep.mubr.msk.f32.mxu0 %vm98_vm0, %v7501_v56 }
 0x6e4   :  { %5605 = vmatmul.mubr.msk.f32.gmra.mxu0 %vm98_vm0, %v7508_v11 }
 0x6e5   :  { %5607 = vmatprep.mubr.msk.f32.mxu0 %vm98_vm0, %v7515_v3 }
 0x6e8   :  { %5608 = vmatmul.mubr.msk.f32.gmra.mxu0 %vm98_vm0, %v7522_v54 }
 0x74a   :  { %v2750_v18 = vpop.xlane.xlu1 %2749 }
 0x74b   :  { %5944 = vrcp.f32 %v2750_v18  ;;  %v4452_v18 = vld [vmem:[%s8206_s4 + $0x30] sm:$0xff] }
 0x74c   :  { %v2748_v21 = vpop.xlane.xlu0 %2747 }
 0x74d   :  { %5946 = vrcp.f32 %v2748_v21 }
 0x74e   :  { %v2754_v44 = vpop.xlane.xlu1 %2753 }
 0x74f   :  { %5948 = vrcp.f32 %v2754_v44 }
 0x750   :  { %v2752_v38 = vpop.xlane.xlu0 %2751 }
 0x751   :  { %5950 = vrcp.f32 %v2752_v38 }
 0x752   :  { %v2758_v33 = vpop.xlane.xlu1 %2757 }
 0x753   :  { %5952 = vrcp.f32 %v2758_v33 }
 0x754   :  { %v2756_v61 = vpop.xlane.xlu0 %2755 }
 0x755   :  { %5954 = vrcp.f32 %v2756_v61 }
 0x756   :  { %v2762_v50 = vpop.xlane.xlu1 %2761 }
 0x757   :  { %5956 = vrcp.f32 %v2762_v50 }
 0x758   :  { %v2760_v25 = vpop.xlane.xlu0 %2759  ;;  %v5945_v26 = vpop.eup %5944 }
 0x759   :  { %5958 = vrcp.f32 %v2760_v25  ;;  %v2782_v48 = vmul.f32 %v5945_v26, %v7631_v17 }
 0x75a   :  { %v5947_v37 = vpop.eup %5946  ;;  %v2766_v39 = vpop.xlane.xlu1 %2765 }
 0x75b   :  { %v2780_v30 = vmul.f32 %v5947_v37, %v7635_v51  ;;  %5960 = vrcp.f32 %v2766_v39 }
 0x75c   :  { %v2764_v46 = vpop.xlane.xlu0 %2763  ;;  %v5949_v32 = vpop.eup %5948 }
 0x75d   :  { %5962 = vrcp.f32 %v2764_v46  ;;  %5558 = vmatprep.mubr.f32.mxu1 %v2780_v30  ;;  %v2786_v51 = vmul.f32 %v5949_v32, %v7639_v49 }
 0x75e   :  { %v5951_v21 = vpop.eup %5950  ;;  %v2770_v44 = vpop.xlane.xlu1 %2769  ;;  %5559 = vmatmul.mubr.f32.vlgmr.msra.gmra.mxu1 %v2782_v48 }
 0x75f   :  { %5611 = vmatpush3.msra.mxu1 %v4453_v19  ;;  %v2784_v38 = vmul.f32 %v5951_v21, %v7643_v4  ;;  %5964 = vrcp.f32 %v2770_v44 }
 0x760   :  { %v2768_v33 = vpop.xlane.xlu0 %2767  ;;  %5612 = vmatprep.subr.mxu1 %v4452_v18  ;;  %v5953_v17 = vpop.eup %5952 }
 0x761   :  { %5966 = vrcp.f32 %v2768_v33  ;;  %5561 = vmatprep.mubr.f32.mxu1 %v2784_v38  ;;  %5613 = vmatpush3.msra.mxu1 %v4452_v18  ;;  %v2790_v19 = vmul.f32 %v5953_v17, %v7647_v40 }
 0x762   :  { %v5955_v61 = vpop.eup %5954  ;;  %v2774_v50 = vpop.xlane.xlu1 %2773  ;;  %5562 = vmatmul.mubr.f32.gmra.mxu1 %v2786_v51 }
 0x763   :  { %v2788_v25 = vmul.f32 %v5955_v61, %v7651_v59  ;;  %5968 = vrcp.f32 %v2774_v50  ;;  %v2041_v50 = vadd.f32 %v7180_v1, %v7362_v0  ;;  %v8282_v1 = vld [vmem:[#allocation9_spill] sm:$0xff] }
 0x764   :  { %v2772_v26 = vpop.xlane.xlu0 %2771  ;;  %v5957_v37 = vpop.eup %5956  ;;  %v2061_v0 = vadd.f32 %v8282_v1, %v7370_v8  ;;  %v8294_v1 = vld [vmem:[#allocation18_spill] sm:$0xff] }
 0x765   :  { %5970 = vrcp.f32 %v2772_v26  ;;  %5564 = vmatprep.mubr.f32.mxu1 %v2788_v25  ;;  %v2794_v48 = vmul.f32 %v5957_v37, %v7655_v16  ;;  %v2036_v26 = vadd.f32 %v7182_v2, %v7364_v60  ;;  %v8283_v60 = vld [vmem:[#allocation8_spill] sm:$0xff] }
 0x766   :  { %v5959_v4 = vpop.eup %5958  ;;  %v2778_v39 = vpop.xlane.xlu1 %2777  ;;  %5565 = vmatmul.mubr.f32.gmra.mxu1 %v2790_v19 }
 0x767   :  { %v2792_v49 = vmul.f32 %v5959_v4, %v7659_v12  ;;  %5972 = vrcp.f32 %v2778_v39  ;;  %v2051_v4 = vadd.f32 %v7184_v53, %v7366_v5  ;;  %v8284_v5 = vld [vmem:[#allocation11_spill] sm:$0xff] }
 0x768   :  { %v2776_v30 = vpop.xlane.xlu0 %2775  ;;  %v5961_v46 = vpop.eup %5960 }
 0x769   :  { %5974 = vrcp.f32 %v2776_v30  ;;  %5567 = vmatprep.mubr.f32.mxu1 %v2792_v49  ;;  %v2798_v40 = vmul.f32 %v5961_v46, %v7662_v34  ;;  %v2046_v30 = vadd.f32 %v7186_v52, %v7368_v23  ;;  %v8285_v23 = vld [vmem:[#allocation10_spill] sm:$0xff] }
 0x76a   :  { %v5963_v59 = vpop.eup %5962  ;;  %5568 = vmatmul.mubr.f32.gmra.mxu1 %v2794_v48 }
 0x76b   :  { %v2796_v32 = vmul.f32 %v5963_v59, %v7665_v13 }
 0x76c   :  { %v5965_v18 = vpop.eup %5964 }
 0x76d   :  { %5570 = vmatprep.mubr.f32.mxu1 %v2796_v32  ;;  %v2802_v12 = vmul.f32 %v5965_v18, %v7668_v57  ;;  %v6087_v57 = vld [vmem:[%s8202_s0] sm:$0xff]  ;;  %v2056_v32 = vadd.f32 %v8283_v60, %v7372_v36  ;;  %v2071_v18 = vadd.f32 %v8284_v5, %v7374_v20  ;;  %v8295_v60 = vld [vmem:[#allocation22_spill] sm:$0xff] }
 0x76e   :  { %v5967_v21 = vpop.eup %5966  ;;  %5571 = vmatmul.mubr.f32.gmra.mxu1 %v2798_v40 }
 0x76f   :  { %v2800_v44 = vmul.f32 %v5967_v21, %v7671_v35 }
 0x770   :  { %v5969_v38 = vpop.eup %5968 }
 0x771   :  { %5573 = vmatprep.mubr.f32.mxu1 %v2800_v44  ;;  %v2806_v51 = vmul.f32 %v5969_v38, %v7674_v41  ;;  %v7782_v41 = vld [vmem:[%s8205_s3 + $0x3] ss:$0 sm:$0xff]  ;;  %v2066_v44 = vadd.f32 %v8285_v23, %v7376_v24  ;;  %v8286_v38 = vld [vmem:[#allocation13_spill] sm:$0xff] }
 0x772   :  { %v5971_v16 = vpop.eup %5970  ;;  %5574 = vmatmul.mubr.f32.gmra.mxu1 %v2802_v12 }
 0x773   :  { %v2804_v33 = vmul.f32 %v5971_v16, %v7677_v27  ;;  %v2081_v16 = vadd.f32 %v8286_v38, %v7378_v55 }
 0x774   :  { %v5973_v17 = vpop.eup %5972 }
 0x775   :  { %5576 = vmatprep.mubr.f32.mxu1 %v2804_v33  ;;  %v2810_v61 = vmul.f32 %v5973_v17, %v7680_v47 }
 0x776   :  { %v5975_v13 = vpop.eup %5974  ;;  %5577 = vmatmul.mubr.f32.gmra.mxu1 %v2806_v51  ;;  %v8287_v51 = vld [vmem:[#allocation12_spill] sm:$0xff] }
 0x777   :  { %v2808_v34 = vmul.f32 %v5975_v13, %v7686_v7  ;;  %v2076_v17 = vadd.f32 %v8287_v51, %v7380_v62 }
 0x779   :  { %5579 = vmatprep.mubr.f32.mxu1 %v2808_v34  ;;  %v8288_v34 = vld [vmem:[#allocation15_spill] sm:$0xff] }
 0x77a   :  { %5580 = vmatmul.mubr.f32.gmra.mxu1 %v2810_v61  ;;  %v2091_v61 = vadd.f32 %v8288_v34, %v7382_v29 }
 0x77b   :  { %5614 = vmatprep.mubr.msk.f32.mxu1 %vm98_vm0, %v6087_v57 }
 0x77e   :  { %5615 = vmatmul.mubr.msk.f32.vlgmr.msra.gmra.mxu1 %vm98_vm0, %v7424_v28 }
 0x77f   :  { %5617 = vmatprep.mubr.msk.f32.mxu1 %vm98_vm0, %v7431_v42 }
 0x782   :  { %5618 = vmatmul.mubr.msk.f32.gmra.mxu1 %vm98_vm0, %v7438_v45 }
 0x783   :  { %5620 = vmatprep.mubr.msk.f32.mxu1 %vm98_vm0, %v7445_v6 }
 0x786   :  { %5621 = vmatmul.mubr.msk.f32.gmra.mxu1 %vm98_vm0, %v7452_v9 }
 0x787   :  { %5623 = vmatprep.mubr.msk.f32.mxu1 %vm98_vm0, %v7459_v43 }
 0x78a   :  { %5624 = vmatmul.mubr.msk.f32.gmra.mxu1 %vm98_vm0, %v7466_v10 }
 0x78b   :  { %5626 = vmatprep.mubr.msk.f32.mxu1 %vm98_vm0, %v7473_v63 }
 0x78c   :  { %v5588_v35 = vpop.f32.mrf.mxu0 }
 0x78d   :  { %v7785_v27 = vadd.f32 %v5588_v35, %v7782_v41  ;;  %v8289_v35 = vld [vmem:[#allocation14_spill] sm:$0xff] }
 0x78e   :  { %5627 = vmatmul.mubr.msk.f32.gmra.mxu1 %vm98_vm0, %v7480_v22  ;;  %v3197_v47 = vpop.f32.mrf.mxu0 }
 0x78f   :  { %5629 = vmatprep.mubr.msk.f32.mxu1 %vm98_vm0, %v7487_v14  ;;  %v3198_v7 = vadd.f32 %v7782_v41, %v3197_v47  ;;  %v2086_v47 = vadd.f32 %v8289_v35, %v7384_v15 }
 0x791   :  { %5670 = vmatprep.mubr.msk.f32.mxu0 %vm446_vm1, %v3198_v7 }
 0x792   :  { %5630 = vmatmul.mubr.msk.f32.gmra.mxu1 %vm98_vm0, %v7494_v58 }
 0x793   :  { %5632 = vmatprep.mubr.msk.f32.mxu1 %vm98_vm0, %v7501_v56 }
 0x796   :  { %5633 = vmatmul.mubr.msk.f32.gmra.mxu1 %vm98_vm0, %v7508_v11 }
 0x797   :  { %5635 = vmatprep.mubr.msk.f32.mxu1 %vm98_vm0, %v7515_v3 }
 0x79a   :  { %5636 = vmatmul.mubr.msk.f32.gmra.mxu1 %vm98_vm0, %v7522_v54 }
 0x79b   :  { %5698 = vmatprep.mubr.msk.f32.mxu1 %vm98_vm0, %v6087_v57 }
 0x81e   :  { %v5560_v25 = vpop.f32.mrf.mxu1 }
 0x81f   :  { %v7793_v19 = vadd.f32 %v5560_v25, %v2041_v50  ;;  %v8290_v50 = vld [vmem:[#allocation16_spill] sm:$0xff] }
 0x820   :  { %v3025_v37 = vpop.f32.mrf.mxu1  ;;  %v2101_v25 = vadd.f32 %v8290_v50, %v7386_v31 }
 0x821   :  { %v7797_v39 = vadd.f32 %v3025_v37, %v2036_v26  ;;  %v8291_v37 = vld [vmem:[#allocation20_spill] sm:$0xff] }
 0x822   :  { %v5563_v49 = vpop.f32.mrf.mxu1 }
 0x823   :  { %v7801_v48 = vadd.f32 %v5563_v49, %v2051_v4  ;;  %v8292_v4 = vld [vmem:[#allocation17_spill] sm:$0xff] }
 0x824   :  { %v3035_v46 = vpop.f32.mrf.mxu1  ;;  %v2096_v49 = vadd.f32 %v8292_v4, %v8291_v37 }
 0x825   :  { %v7805_v59 = vadd.f32 %v3035_v46, %v2046_v30  ;;  %v8293_v46 = vld [vmem:[#allocation21_spill] sm:$0xff] }
 0x826   :  { %v5566_v2 = vpop.f32.mrf.mxu1 }
 0x827   :  { %v7809_v40 = vadd.f32 %v5566_v2, %v2061_v0  ;;  %v2111_v0 = vadd.f32 %v8294_v1, %v8293_v46 }
 0x828   :  { %v3045_v53 = vpop.f32.mrf.mxu1 }
 0x829   :  { %v7813_v21 = vadd.f32 %v3045_v53, %v2056_v32  ;;  %v8296_v32 = vld [vmem:[#allocation19_spill] sm:$0xff] }
 0x82a   :  { %v5569_v52 = vpop.f32.mrf.mxu1  ;;  %v2106_v53 = vadd.f32 %v8296_v32, %v8295_v60 }
 0x82b   :  { %v7817_v12 = vadd.f32 %v5569_v52, %v2071_v18 }
 0x82c   :  { %v3055_v8 = vpop.f32.mrf.mxu1 }
 0x82d   :  { %v7821_v33 = vadd.f32 %v3055_v8, %v2066_v44 }
 0x82e   :  { %v5572_v36 = vpop.f32.mrf.mxu1 }
 0x82f   :  { %v7825_v13 = vadd.f32 %v5572_v36, %v2081_v16 }
 0x830   :  { %v3065_v20 = vpop.f32.mrf.mxu1 }
 0x831   :  { %v7829_v57 = vadd.f32 %v3065_v20, %v2076_v17 }
 0x832   :  { %v5575_v24 = vpop.f32.mrf.mxu1 }
 0x833   :  { %v7833_v7 = vadd.f32 %v5575_v24, %v2091_v61 }
 0x834   :  { %v3075_v55 = vpop.f32.mrf.mxu1 }
 0x835   :  { %v7837_v26 = vadd.f32 %v3075_v55, %v2086_v47  ;;  %v4454_v47 = vld [vmem:[#allocation4 + $0x3] ss:$0 sm:$0xff] }
 0x836   :  { %v5578_v62 = vpop.f32.mrf.mxu1 }
 0x837   :  { %v7841_v30 = vadd.f32 %v5578_v62, %v2101_v25 }
 0x838   :  { %v3085_v29 = vpop.f32.mrf.mxu1 }
 0x839   :  { %v7845_v2 = vadd.f32 %v3085_v29, %v2096_v49 }
 0x83a   :  { %v5581_v15 = vpop.f32.mrf.mxu1 }
 0x83b   :  { %v7849_v5 = vadd.f32 %v5581_v15, %v2111_v0  ;;  %v5591_v15 = vpop.f32.mrf.mxu0 }
 0x83c   :  { %v3095_v31 = vpop.f32.mrf.mxu1 }
 0x83d   :  { %v7851_v18 = vadd.f32 %v3095_v31, %v2106_v53  ;;  %v3207_v32 = vpop.f32.mrf.mxu0 }
 0x83e   :  { %v7853_v52 = vpop.f32.mrf.mxu1 }
 0x83f   :  { %v5594_v31 = vpop.f32.mrf.mxu0 }
 0x840   :  { %v7855_v23 = vpop.f32.mrf.mxu1 }
 0x842   :  { %v5619_v44 = vpop.f32.mrf.mxu1 }
 0x844   :  { %v3363_v8 = vpop.f32.mrf.mxu1 }
 0x846   :  { %v5622_v38 = vpop.f32.mrf.mxu1 }
 0x847   :  { %v3379_v53 = vadd.f32 %v5622_v38, %v4454_v47 }
 0x848   :  { %v3373_v16 = vpop.f32.mrf.mxu1 }
 0x84a   :  { %v5625_v36 = vpop.f32.mrf.mxu1 }
 0x84b   :  { %v3389_v0 = vadd.f32 %v5625_v36, %v4454_v47  ;;  %v3217_v36 = vpop.f32.mrf.mxu0 }
 0x84c   :  { %v3383_v51 = vpop.f32.mrf.mxu1 }
 0x84d   :  { %v3384_v60 = vadd.f32 %v4454_v47, %v3383_v51  ;;  %v5597_v51 = vpop.f32.mrf.mxu0 }
 0x84e   :  { %v5628_v17 = vpop.f32.mrf.mxu1 }
 0x84f   :  { %v3399_v46 = vadd.f32 %v5628_v17, %v4454_v47  ;;  %v3374_v17 = vadd.f32 %v4454_v47, %v3373_v16  ;;  %v3227_v38 = vpop.f32.mrf.mxu0 }
 0x850   :  { %v3393_v20 = vpop.f32.mrf.mxu1 }
 0x851   :  { %v3394_v1 = vadd.f32 %v4454_v47, %v3393_v20  ;;  %v3369_v20 = vadd.f32 %v5619_v44, %v4454_v47  ;;  %v5600_v16 = vpop.f32.mrf.mxu0  ;;  %v3354_v44 = vadd.f32 %v4454_v47, %v7855_v23 }
 0x852   :  { %v5631_v34 = vpop.f32.mrf.mxu1 }
 0x853   :  { %v3409_v49 = vadd.f32 %v5631_v34, %v4454_v47  ;;  %v3364_v34 = vadd.f32 %v4454_v47, %v3363_v8  ;;  %v3208_v8 = vadd.f32 %v7782_v41, %v3207_v32 }
 0x854   :  { %v3403_v61 = vpop.f32.mrf.mxu1 }
 0x855   :  { %v3404_v29 = vadd.f32 %v4454_v47, %v3403_v61  ;;  %v3359_v61 = vadd.f32 %v7853_v52, %v4454_v47  ;;  %v3218_v52 = vadd.f32 %v7782_v41, %v3217_v36 }
 0x856   :  { %v5634_v24 = vpop.f32.mrf.mxu1 }
 0x857   :  { %v3419_v37 = vadd.f32 %v5634_v24, %v4454_v47  ;;  %v3237_v24 = vpop.f32.mrf.mxu0 }
 0x858   :  { %v3413_v35 = vpop.f32.mrf.mxu1 }
 0x859   :  { %v3414_v4 = vadd.f32 %v4454_v47, %v3413_v35  ;;  %v5603_v35 = vpop.f32.mrf.mxu0 }
 0x85a   :  { %v5637_v55 = vpop.f32.mrf.mxu1 }
 0x85b   :  { %v3429_v50 = vadd.f32 %v5637_v55, %v4454_v47  ;;  %v3213_v55 = vadd.f32 %v5591_v15, %v7782_v41  ;;  %v3247_v23 = vpop.f32.mrf.mxu0 }
 0x85c   :  { %v3423_v25 = vpop.f32.mrf.mxu1 }
 0x85d   :  { %v3424_v62 = vadd.f32 %v4454_v47, %v3423_v25  ;;  %5638 = vmatprep.subr.msk.mxu0 %vm446_vm1, %v3429_v50  ;;  %v3228_v47 = vadd.f32 %v7782_v41, %v3227_v38  ;;  %v5606_v25 = vpop.f32.mrf.mxu0 }
 0x85e   :  { %5639 = vmatpush3.xpose.msk.msra.mxu0 %vm446_vm1, %v3429_v50  ;;  %v3223_v50 = vadd.f32 %v5594_v31, %v7782_v41  ;;  %v4503_v31 = vld [vmem:[%s8208_s6 + $0x30] sm:$0xff] }
 0x85f   :  { %5640 = vmatprep.subr.msk.mxu0 %vm446_vm1, %v3424_v62 }
 0x862   :  { %5641 = vmatpush3.xpose.msk.msra.mxu0 %vm446_vm1, %v3424_v62  ;;  %v3233_v62 = vadd.f32 %v5597_v51, %v7782_v41  ;;  %v8303_v51 = vld [vmem:[#allocation29_spill] sm:$0xff] }
 0x863   :  { %5642 = vmatprep.subr.msk.mxu0 %vm446_vm1, %v3419_v37 }
 0x866   :  { %5643 = vmatpush3.xpose.msk.msra.mxu0 %vm446_vm1, %v3419_v37  ;;  %v3257_v37 = vpop.f32.mrf.mxu0 }
 0x867   :  { %5644 = vmatprep.subr.msk.mxu0 %vm446_vm1, %v3414_v4 }
 0x86a   :  { %5645 = vmatpush3.xpose.msk.msra.mxu0 %vm446_vm1, %v3414_v4  ;;  %v3248_v4 = vadd.f32 %v7782_v41, %v3247_v23 }
 0x86b   :  { %5646 = vmatprep.subr.msk.mxu0 %vm446_vm1, %v3409_v49 }
 0x86e   :  { %5647 = vmatpush3.xpose.msk.msra.mxu0 %vm446_vm1, %v3409_v49  ;;  %v3243_v49 = vadd.f32 %v5600_v16, %v7782_v41 }
 0x86f   :  { %5648 = vmatprep.subr.msk.mxu0 %vm446_vm1, %v3404_v29 }
 0x872   :  { %5649 = vmatpush3.xpose.msk.msra.mxu0 %vm446_vm1, %v3404_v29  ;;  %v5609_v29 = vpop.f32.mrf.mxu0 }
 0x873   :  { %5650 = vmatprep.subr.msk.mxu0 %vm446_vm1, %v3399_v46  ;;  %v3273_v32 = vadd.f32 %v5609_v29, %v7782_v41 }
 0x876   :  { %5651 = vmatpush3.xpose.msk.msra.mxu0 %vm446_vm1, %v3399_v46  ;;  %v3258_v46 = vadd.f32 %v7782_v41, %v3257_v37 }
 0x877   :  { %5652 = vmatprep.subr.msk.mxu0 %vm446_vm1, %v3394_v1 }
 0x87a   :  { %5653 = vmatpush3.xpose.msk.msra.mxu0 %vm446_vm1, %v3394_v1  ;;  %v3253_v1 = vadd.f32 %v5603_v35, %v7782_v41 }
 0x87b   :  { %5654 = vmatprep.subr.msk.mxu0 %vm446_vm1, %v3389_v0 }
 0x87e   :  { %5655 = vmatpush3.xpose.msk.msra.mxu0 %vm446_vm1, %v3389_v0  ;;  %v3267_v0 = vpop.f32.mrf.mxu0 }
 0x87f   :  { %5656 = vmatprep.subr.msk.mxu0 %vm446_vm1, %v3384_v60  ;;  %v3268_v15 = vadd.f32 %v7782_v41, %v3267_v0 }
 0x882   :  { %5657 = vmatpush3.xpose.msk.msra.mxu0 %vm446_vm1, %v3384_v60  ;;  %v3263_v60 = vadd.f32 %v5606_v25, %v7782_v41 }
 0x883   :  { %5658 = vmatprep.subr.msk.mxu0 %vm446_vm1, %v3379_v53 }
 0x886   :  { %5659 = vmatpush3.xpose.msk.msra.mxu0 %vm446_vm1, %v3379_v53  ;;  %v4504_v53 = vld [vmem:[%s8208_s6 + $0x38] sm:$0xff] }
 0x887   :  { %5660 = vmatprep.subr.msk.mxu0 %vm446_vm1, %v3374_v17  ;;  %5694 = vmatprep.subr.mxu1 %v4504_v53 }
 0x888   :  { %5695 = vmatpush3.msra.mxu1 %v4504_v53  ;;  %v8312_v53 = vld [vmem:[#allocation38_spill] sm:$0xff] }
 0x889   :  { %5696 = vmatprep.subr.mxu1 %v4503_v31 }
 0x88a   :  { %5661 = vmatpush3.xpose.msk.msra.mxu0 %vm446_vm1, %v3374_v17  ;;  %5697 = vmatpush3.msra.mxu1 %v4503_v31  ;;  %v8302_v17 = vld [vmem:[#allocation28_spill] sm:$0xff] }
 0x88b   :  { %5662 = vmatprep.subr.msk.mxu0 %vm446_vm1, %v3369_v20  ;;  %5699 = vmatmul.mubr.msk.f32.vlgmr.msra.gmra.mxu1 %vm98_vm0, %v7424_v28 }
 0x88c   :  { %5701 = vmatprep.mubr.msk.f32.mxu1 %vm98_vm0, %v7431_v42  ;;  %v8297_v42 = vld [vmem:[#allocation23_spill] sm:$0xff] }
 0x88e   :  { %5663 = vmatpush3.xpose.msk.msra.mxu0 %vm446_vm1, %v3369_v20 }
 0x88f   :  { %5664 = vmatprep.subr.msk.mxu0 %vm446_vm1, %v3364_v34  ;;  %5702 = vmatmul.mubr.msk.f32.gmra.mxu1 %vm98_vm0, %v7438_v45 }
 0x890   :  { %5704 = vmatprep.mubr.msk.f32.mxu1 %vm98_vm0, %v7445_v6 }
 0x892   :  { %5665 = vmatpush3.xpose.msk.msra.mxu0 %vm446_vm1, %v3364_v34 }
 0x893   :  { %5666 = vmatprep.subr.msk.mxu0 %vm446_vm1, %v3359_v61  ;;  %5705 = vmatmul.mubr.msk.f32.gmra.mxu1 %vm98_vm0, %v7452_v9  ;;  %v8298_v9 = vld [vmem:[#allocation24_spill] sm:$0xff] }
 0x894   :  { %5707 = vmatprep.mubr.msk.f32.mxu1 %vm98_vm0, %v7459_v43 }
 0x896   :  { %5667 = vmatpush3.xpose.msk.msra.mxu0 %vm446_vm1, %v3359_v61  ;;  %v8304_v61 = vld [vmem:[#allocation30_spill] sm:$0xff] }
 0x897   :  { %5668 = vmatprep.subr.msk.mxu0 %vm446_vm1, %v3354_v44  ;;  %5708 = vmatmul.mubr.msk.f32.gmra.mxu1 %vm98_vm0, %v7466_v10 }
 0x898   :  { %5710 = vmatprep.mubr.msk.f32.mxu1 %vm98_vm0, %v7473_v63  ;;  %v8299_v63 = vld [vmem:[#allocation25_spill] sm:$0xff] }
 0x89a   :  { %5669 = vmatpush3.xpose.msk.msra.mxu0 %vm446_vm1, %v3354_v44 }
 0x89b   :  { %5711 = vmatmul.mubr.msk.f32.gmra.mxu1 %vm98_vm0, %v7480_v22 }
 0x89c   :  { %5713 = vmatprep.mubr.msk.f32.mxu1 %vm98_vm0, %v7487_v14 }
 0x89d   :  { %5671 = vmatmul.mubr.msk.f32.vlgmr.msra.gmra.mxu0 %vm446_vm1, %v7785_v27  ;;  %v3238_v27 = vadd.f32 %v7782_v41, %v3237_v24  ;;  %v8305_v24 = vld [vmem:[#allocation31_spill] sm:$0xff] }
 0x89e   :  { %5673 = vmatprep.mubr.msk.f32.mxu0 %vm446_vm1, %v3208_v8 }
 0x89f   :  { %5714 = vmatmul.mubr.msk.f32.gmra.mxu1 %vm98_vm0, %v7494_v58  ;;  %v8300_v58 = vld [vmem:[#allocation26_spill] sm:$0xff] }
 0x8a0   :  { %5716 = vmatprep.mubr.msk.f32.mxu1 %vm98_vm0, %v7501_v56 }
 0x8a1   :  { %5674 = vmatmul.mubr.msk.f32.gmra.mxu0 %vm446_vm1, %v3213_v55 }
 0x8a2   :  { %5676 = vmatprep.mubr.msk.f32.mxu0 %vm446_vm1, %v3218_v52  ;;  %v8306_v52 = vld [vmem:[#allocation32_spill] sm:$0xff] }
 0x8a3   :  { %5717 = vmatmul.mubr.msk.f32.gmra.mxu1 %vm98_vm0, %v7508_v11 }
 0x8a4   :  { %5719 = vmatprep.mubr.msk.f32.mxu1 %vm98_vm0, %v7515_v3  ;;  %v8301_v3 = vld [vmem:[#allocation27_spill] sm:$0xff] }
 0x8a5   :  { %5677 = vmatmul.mubr.msk.f32.gmra.mxu0 %vm446_vm1, %v3223_v50 }
 0x8a6   :  { %5679 = vmatprep.mubr.msk.f32.mxu0 %vm446_vm1, %v3228_v47  ;;  %v8307_v47 = vld [vmem:[#allocation33_spill] sm:$0xff] }
 0x8a7   :  { %5720 = vmatmul.mubr.msk.f32.gmra.mxu1 %vm98_vm0, %v7522_v54 }
 0x8a9   :  { %5680 = vmatmul.mubr.msk.f32.gmra.mxu0 %vm446_vm1, %v3233_v62 }
 0x8aa   :  { %5682 = vmatprep.mubr.msk.f32.mxu0 %vm446_vm1, %v3238_v27  ;;  %v8308_v27 = vld [vmem:[#allocation34_spill] sm:$0xff] }
 0x8ad   :  { %5683 = vmatmul.mubr.msk.f32.gmra.mxu0 %vm446_vm1, %v3243_v49 }
 0x8ae   :  { %5685 = vmatprep.mubr.msk.f32.mxu0 %vm446_vm1, %v3248_v4  ;;  %v8309_v4 = vld [vmem:[#allocation35_spill] sm:$0xff] }
 0x8b1   :  { %5686 = vmatmul.mubr.msk.f32.gmra.mxu0 %vm446_vm1, %v3253_v1 }
 0x8b2   :  { %5688 = vmatprep.mubr.msk.f32.mxu0 %vm446_vm1, %v3258_v46  ;;  %v8310_v46 = vld [vmem:[#allocation36_spill] sm:$0xff] }
 0x8b5   :  { %5689 = vmatmul.mubr.msk.f32.gmra.mxu0 %vm446_vm1, %v3263_v60 }
 0x8b6   :  { %5691 = vmatprep.mubr.msk.f32.mxu0 %vm446_vm1, %v3268_v15  ;;  %v8311_v15 = vld [vmem:[#allocation37_spill] sm:$0xff] }
 0x8b9   :  { %5692 = vmatmul.mubr.msk.f32.gmra.mxu0 %vm446_vm1, %v3273_v32 }
 0x95d   :  { %v5672_v28 = vpop.f32.mrf.mxu0 }
 0x95e   :  { %v7958_v45 = vadd.f32 %v8297_v42, %v5672_v28  ;;  %v5700_v28 = vpop.f32.mrf.mxu1 }
 0x95f   :  { %v3594_v6 = vpop.f32.mrf.mxu0 }
 0x960   :  { %v7961_v43 = vadd.f32 %v8298_v9, %v3594_v6  ;;  %3675 = vmax.xlane.f32.xlu1 %v7958_v45  ;;  %v3886_v42 = vpop.f32.mrf.mxu1 }
 0x961   :  { %v5675_v10 = vpop.f32.mrf.mxu0 }
 0x962   :  { %v7965_v22 = vadd.f32 %v8299_v63, %v5675_v10  ;;  %3673 = vmax.xlane.f32.xlu0 %v7961_v43  ;;  %v5703_v6 = vpop.f32.mrf.mxu1 }
 0x963   :  { %v3604_v14 = vpop.f32.mrf.mxu0 }
 0x964   :  { %v7969_v56 = vadd.f32 %v8300_v58, %v3604_v14  ;;  %3679 = vmax.xlane.f32.xlu1 %v7965_v22  ;;  %v3896_v9 = vpop.f32.mrf.mxu1 }
 0x965   :  { %v5678_v11 = vpop.f32.mrf.mxu0 }
 0x966   :  { %v7973_v54 = vadd.f32 %v8301_v3, %v5678_v11  ;;  %3677 = vmax.xlane.f32.xlu0 %v7969_v56  ;;  %v5706_v10 = vpop.f32.mrf.mxu1 }
 0x967   :  { %v3614_v41 = vpop.f32.mrf.mxu0 }
 0x968   :  { %v7977_v36 = vadd.f32 %v8302_v17, %v3614_v41  ;;  %3683 = vmax.xlane.f32.xlu1 %v7973_v54  ;;  %v3906_v63 = vpop.f32.mrf.mxu1 }
 0x969   :  { %v5681_v20 = vpop.f32.mrf.mxu0 }
 0x96a   :  { %v7981_v34 = vadd.f32 %v8303_v51, %v5681_v20  ;;  %3681 = vmax.xlane.f32.xlu0 %v7977_v36  ;;  %v5709_v14 = vpop.f32.mrf.mxu1 }
 0x96b   :  { %v3624_v38 = vpop.f32.mrf.mxu0 }
 0x96c   :  { %v7985_v16 = vadd.f32 %v8304_v61, %v3624_v38  ;;  %3687 = vmax.xlane.f32.xlu1 %v7981_v34  ;;  %v3916_v58 = vpop.f32.mrf.mxu1 }
 0x96d   :  { %v5684_v44 = vpop.f32.mrf.mxu0 }
 0x96e   :  { %v7989_v8 = vadd.f32 %v8305_v24, %v5684_v44  ;;  %3685 = vmax.xlane.f32.xlu0 %v7985_v16  ;;  %v5712_v11 = vpop.f32.mrf.mxu1 }
 0x96f   :  { %v3634_v35 = vpop.f32.mrf.mxu0 }
 0x970   :  { %v7993_v55 = vadd.f32 %v8306_v52, %v3634_v35  ;;  %3691 = vmax.xlane.f32.xlu1 %v7989_v8  ;;  %v3926_v3 = vpop.f32.mrf.mxu1 }
 0x971   :  { %v5687_v23 = vpop.f32.mrf.mxu0 }
 0x972   :  { %v7997_v50 = vadd.f32 %v8307_v47, %v5687_v23  ;;  %3689 = vmax.xlane.f32.xlu0 %v7993_v55  ;;  %v5715_v41 = vpop.f32.mrf.mxu1 }
 0x973   :  { %v3644_v25 = vpop.f32.mrf.mxu0 }
 0x974   :  { %v8001_v62 = vadd.f32 %v8308_v27, %v3644_v25  ;;  %3695 = vmax.xlane.f32.xlu1 %v7997_v50  ;;  %v3936_v17 = vpop.f32.mrf.mxu1 }
 0x975   :  { %v5690_v37 = vpop.f32.mrf.mxu0 }
 0x976   :  { %v8005_v49 = vadd.f32 %v8309_v4, %v5690_v37  ;;  %3693 = vmax.xlane.f32.xlu0 %v8001_v62  ;;  %v5718_v20 = vpop.f32.mrf.mxu1 }
 0x977   :  { %v3654_v29 = vpop.f32.mrf.mxu0 }
 0x978   :  { %v8009_v1 = vadd.f32 %v8310_v46, %v3654_v29  ;;  %3699 = vmax.xlane.f32.xlu1 %v8005_v49  ;;  %v3946_v51 = vpop.f32.mrf.mxu1 }
 0x979   :  { %v5693_v0 = vpop.f32.mrf.mxu0 }
 0x97a   :  { %v8013_v60 = vadd.f32 %v8311_v15, %v5693_v0  ;;  %3697 = vmax.xlane.f32.xlu0 %v8009_v1  ;;  %v5721_v38 = vpop.f32.mrf.mxu1 }
 0x97b   :  { %v3664_v32 = vpop.f32.mrf.mxu0  ;;  %5722 = vmatprep.subr.mxu1 %v5721_v38 }
 0x97c   :  { %v8017_v31 = vadd.f32 %v8312_v53, %v3664_v32  ;;  %3703 = vmax.xlane.f32.xlu1 %v8013_v60  ;;  %v3956_v61 = vpop.f32.mrf.mxu1  ;;  %5723 = vmatpush3.msra.mxu1 %v5721_v38 }
 0x97d   :  { %5724 = vmatprep.subr.mxu1 %v3956_v61 }
 0x97e   :  { %3701 = vmax.xlane.f32.xlu0 %v8017_v31  ;;  %5725 = vmatpush3.msra.mxu1 %v3956_v61 }
 0x97f   :  { %5726 = vmatprep.subr.mxu1 %v5718_v20 }
 0x980   :  { %5727 = vmatpush3.msra.mxu1 %v5718_v20 }
 0x981   :  { %5728 = vmatprep.subr.mxu1 %v3946_v51 }
 0x982   :  { %5729 = vmatpush3.msra.mxu1 %v3946_v51 }
 0x983   :  { %5730 = vmatprep.subr.mxu1 %v5715_v41 }
 0x984   :  { %5731 = vmatpush3.msra.mxu1 %v5715_v41 }
 0x985   :  { %5732 = vmatprep.subr.mxu1 %v3936_v17 }
 0x986   :  { %5733 = vmatpush3.msra.mxu1 %v3936_v17 }
 0x987   :  { %5734 = vmatprep.subr.mxu1 %v5712_v11 }
 0x988   :  { %5735 = vmatpush3.msra.mxu1 %v5712_v11 }
 0x989   :  { %5736 = vmatprep.subr.mxu1 %v3926_v3 }
 0x98a   :  { %5737 = vmatpush3.msra.mxu1 %v3926_v3 }
 0x98b   :  { %5738 = vmatprep.subr.mxu1 %v5709_v14 }
 0x98c   :  { %5739 = vmatpush3.msra.mxu1 %v5709_v14 }
 0x98d   :  { %5740 = vmatprep.subr.mxu1 %v3916_v58 }
 0x98e   :  { %5741 = vmatpush3.msra.mxu1 %v3916_v58 }
 0x98f   :  { %5742 = vmatprep.subr.mxu1 %v5706_v10 }
 0x990   :  { %5743 = vmatpush3.msra.mxu1 %v5706_v10 }
 0x991   :  { %5744 = vmatprep.subr.mxu1 %v3906_v63 }
 0x992   :  { %5745 = vmatpush3.msra.mxu1 %v3906_v63 }
 0x993   :  { %5746 = vmatprep.subr.mxu1 %v5703_v6 }
 0x994   :  { %5747 = vmatpush3.msra.mxu1 %v5703_v6 }
 0x995   :  { %5748 = vmatprep.subr.mxu1 %v3896_v9 }
 0x996   :  { %5749 = vmatpush3.msra.mxu1 %v3896_v9 }
 0x997   :  { %5750 = vmatprep.subr.mxu1 %v5700_v28 }
 0x998   :  { %5751 = vmatpush3.msra.mxu1 %v5700_v28 }
 0x999   :  { %5752 = vmatprep.subr.mxu1 %v3886_v42 }
 0x99a   :  { %5753 = vmatpush3.msra.mxu1 %v3886_v42 }
 0x9e9   :  { %v3676_v44 = vpop.xlane.xlu1 %3675 }
 0x9ea   :  { %v3706_v24 = vsub.f32 %v7958_v45, %v3676_v44 }
 0x9eb   :  { %v3674_v35 = vpop.xlane.xlu0 %3673 }
 0x9ec   :  { %v3723_v52 = vmul.f32 1.442695, %v3706_v24  ;;  %v3705_v23 = vsub.f32 %v7961_v43, %v3674_v35 }
 0x9ed   :  { %v3680_v47 = vpop.xlane.xlu1 %3679 }
 0x9ee   :  { %5976 = vpow2.f32 %v3723_v52  ;;  %v3721_v25 = vmul.f32 1.442695, %v3705_v23  ;;  %v3708_v27 = vsub.f32 %v7965_v22, %v3680_v47 }
 0x9ef   :  { %v3678_v37 = vpop.xlane.xlu0 %3677 }
 0x9f0   :  { %5978 = vpow2.f32 %v3721_v25  ;;  %v3727_v4 = vmul.f32 1.442695, %v3708_v27  ;;  %v3707_v29 = vsub.f32 %v7969_v56, %v3678_v37 }
 0x9f1   :  { %v3684_v46 = vpop.xlane.xlu1 %3683 }
 0x9f2   :  { %5980 = vpow2.f32 %v3727_v4  ;;  %v3725_v0 = vmul.f32 1.442695, %v3707_v29  ;;  %v3710_v15 = vsub.f32 %v7973_v54, %v3684_v46 }
 0x9f3   :  { %v3682_v45 = vpop.xlane.xlu0 %3681 }
 0x9f4   :  { %5982 = vpow2.f32 %v3725_v0  ;;  %v3731_v32 = vmul.f32 1.442695, %v3710_v15  ;;  %v3709_v43 = vsub.f32 %v7977_v36, %v3682_v45 }
 0x9f5   :  { %v3688_v53 = vpop.xlane.xlu1 %3687 }
 0x9f6   :  { %5984 = vpow2.f32 %v3731_v32  ;;  %v3729_v28 = vmul.f32 1.442695, %v3709_v43  ;;  %v3712_v22 = vsub.f32 %v7981_v34, %v3688_v53 }
 0x9f7   :  { %v3686_v42 = vpop.xlane.xlu0 %3685 }
 0x9f8   :  { %5986 = vpow2.f32 %v3729_v28  ;;  %v3735_v6 = vmul.f32 1.442695, %v3712_v22  ;;  %v3711_v56 = vsub.f32 %v7985_v16, %v3686_v42 }
 0x9f9   :  { %v3692_v9 = vpop.xlane.xlu1 %3691 }
 0x9fa   :  { %5988 = vpow2.f32 %v3735_v6  ;;  %v3733_v10 = vmul.f32 1.442695, %v3711_v56  ;;  %v3714_v54 = vsub.f32 %v7989_v8, %v3692_v9 }
 0x9fb   :  { %v8030_v63 = vpop.eup %5976  ;;  %v3690_v14 = vpop.xlane.xlu0 %3689 }
 0x9fc   :  { %5990 = vpow2.f32 %v3733_v10  ;;  %v3739_v36 = vmul.f32 1.442695, %v3714_v54  ;;  %v3713_v58 = vsub.f32 %v7993_v55, %v3690_v14  ;;  %3755 = vadd.xlane.f32.xlu1 %v8030_v63 }
 0x9fd   :  { %v8034_v34 = vpop.eup %5978  ;;  %v3696_v11 = vpop.xlane.xlu1 %3695 }
 0x9fe   :  { %5992 = vpow2.f32 %v3739_v36  ;;  %v3737_v3 = vmul.f32 1.442695, %v3713_v58  ;;  %v3716_v16 = vsub.f32 %v7997_v50, %v3696_v11  ;;  %3753 = vadd.xlane.f32.xlu0 %v8034_v34 }
 0x9ff   :  { %v8038_v41 = vpop.eup %5980  ;;  %v3694_v8 = vpop.xlane.xlu0 %3693 }
 0xa00   :  { %5994 = vpow2.f32 %v3737_v3  ;;  %v3743_v17 = vmul.f32 1.442695, %v3716_v16  ;;  %v3715_v20 = vsub.f32 %v8001_v62, %v3694_v8  ;;  %3759 = vadd.xlane.f32.xlu1 %v8038_v41 }
 0xa01   :  { %v8042_v55 = vpop.eup %5982  ;;  %v3700_v51 = vpop.xlane.xlu1 %3699 }
 0xa02   :  { %5996 = vpow2.f32 %v3743_v17  ;;  %v3741_v38 = vmul.f32 1.442695, %v3715_v20  ;;  %v3718_v61 = vsub.f32 %v8005_v49, %v3700_v51  ;;  %3757 = vadd.xlane.f32.xlu0 %v8042_v55 }
 0xa03   :  { %v8046_v50 = vpop.eup %5984  ;;  %v3698_v44 = vpop.xlane.xlu0 %3697 }
 0xa04   :  { %5998 = vpow2.f32 %v3741_v38  ;;  %v3747_v24 = vmul.f32 1.442695, %v3718_v61  ;;  %v3717_v35 = vsub.f32 %v8009_v1, %v3698_v44  ;;  %3763 = vadd.xlane.f32.xlu1 %v8046_v50 }
 0xa05   :  { %v8050_v62 = vpop.eup %5986  ;;  %v3704_v52 = vpop.xlane.xlu1 %3703 }
 0xa06   :  { %6000 = vpow2.f32 %v3747_v24  ;;  %v3745_v23 = vmul.f32 1.442695, %v3717_v35  ;;  %v3720_v47 = vsub.f32 %v8013_v60, %v3704_v52  ;;  %3761 = vadd.xlane.f32.xlu0 %v8050_v62 }
 0xa07   :  { %v8054_v49 = vpop.eup %5988  ;;  %v3702_v25 = vpop.xlane.xlu0 %3701 }
 0xa08   :  { %6002 = vpow2.f32 %v3745_v23  ;;  %v3751_v27 = vmul.f32 1.442695, %v3720_v47  ;;  %v3719_v37 = vsub.f32 %v8017_v31, %v3702_v25  ;;  %3767 = vadd.xlane.f32.xlu1 %v8054_v49 }
 0xa09   :  { %v8058_v1 = vpop.eup %5990 }
 0xa0a   :  { %6004 = vpow2.f32 %v3751_v27  ;;  %v3749_v4 = vmul.f32 1.442695, %v3719_v37  ;;  %3765 = vadd.xlane.f32.xlu0 %v8058_v1 }
 0xa0b   :  { %v8061_v29 = vpop.eup %5992 }
 0xa0c   :  { %6006 = vpow2.f32 %v3749_v4  ;;  %3771 = vadd.xlane.f32.xlu1 %v8061_v29 }
 0xa0d   :  { %v8064_v60 = vpop.eup %5994 }
 0xa0e   :  { %3769 = vadd.xlane.f32.xlu0 %v8064_v60 }
 0xa0f   :  { %v8067_v46 = vpop.eup %5996 }
 0xa10   :  { %3775 = vadd.xlane.f32.xlu1 %v8067_v46 }
 0xa11   :  { %v8070_v31 = vpop.eup %5998 }
 0xa12   :  { %3773 = vadd.xlane.f32.xlu0 %v8070_v31 }
 0xa13   :  { %v8073_v0 = vpop.eup %6000 }
 0xa14   :  { %3779 = vadd.xlane.f32.xlu1 %v8073_v0 }
 0xa15   :  { %v8076_v15 = vpop.eup %6002 }
 0xa16   :  { %3777 = vadd.xlane.f32.xlu0 %v8076_v15 }
 0xa17   :  { %v8079_v45 = vpop.eup %6004 }
 0xa18   :  { %3783 = vadd.xlane.f32.xlu1 %v8079_v45 }
 0xa19   :  { %v8082_v32 = vpop.eup %6006 }
 0xa1a   :  { %3781 = vadd.xlane.f32.xlu0 %v8082_v32 }
 0xa85   :  { %v3756_v43 = vpop.xlane.xlu1 %3755 }
 0xa86   :  { %6008 = vrcp.f32 %v3756_v43 }
 0xa87   :  { %v3754_v53 = vpop.xlane.xlu0 %3753 }
 0xa88   :  { %6010 = vrcp.f32 %v3754_v53 }
 0xa89   :  { %v3760_v28 = vpop.xlane.xlu1 %3759 }
 0xa8a   :  { %6012 = vrcp.f32 %v3760_v28 }
 0xa8b   :  { %v3758_v22 = vpop.xlane.xlu0 %3757 }
 0xa8c   :  { %6014 = vrcp.f32 %v3758_v22 }
 0xa8d   :  { %v3764_v42 = vpop.xlane.xlu1 %3763 }
 0xa8e   :  { %6016 = vrcp.f32 %v3764_v42 }
 0xa8f   :  { %v3762_v6 = vpop.xlane.xlu0 %3761 }
 0xa90   :  { %6018 = vrcp.f32 %v3762_v6 }
 0xa91   :  { %v3768_v56 = vpop.xlane.xlu1 %3767 }
 0xa92   :  { %6020 = vrcp.f32 %v3768_v56 }
 0xa93   :  { %v3766_v9 = vpop.xlane.xlu0 %3765  ;;  %v6009_v10 = vpop.eup %6008 }
 0xa94   :  { %6022 = vrcp.f32 %v3766_v9  ;;  %v3788_v58 = vmul.f32 %v6009_v10, %v8030_v63 }
 0xa95   :  { %v6011_v54 = vpop.eup %6010  ;;  %v3772_v14 = vpop.xlane.xlu1 %3771 }
 0xa96   :  { %v3786_v36 = vmul.f32 %v6011_v54, %v8034_v34  ;;  %6024 = vrcp.f32 %v3772_v14 }
 0xa97   :  { %v3770_v11 = vpop.xlane.xlu0 %3769  ;;  %v6013_v3 = vpop.eup %6012 }
 0xa98   :  { %6026 = vrcp.f32 %v3770_v11  ;;  %5754 = vmatprep.mubr.f32.mxu1 %v3786_v36  ;;  %v3792_v51 = vmul.f32 %v6013_v3, %v8038_v41 }
 0xa99   :  { %v6015_v16 = vpop.eup %6014  ;;  %v3776_v8 = vpop.xlane.xlu1 %3775  ;;  %5755 = vmatmul.mubr.f32.vlgmr.msra.gmra.mxu1 %v3788_v58 }
 0xa9a   :  { %v3790_v17 = vmul.f32 %v6015_v16, %v8042_v55  ;;  %6028 = vrcp.f32 %v3776_v8 }
 0xa9b   :  { %v3774_v20 = vpop.xlane.xlu0 %3773  ;;  %v6017_v38 = vpop.eup %6016 }
 0xa9c   :  { %6030 = vrcp.f32 %v3774_v20  ;;  %5757 = vmatprep.mubr.f32.mxu1 %v3790_v17  ;;  %v3796_v24 = vmul.f32 %v6017_v38, %v8046_v50 }
 0xa9d   :  { %v6019_v34 = vpop.eup %6018  ;;  %v3780_v61 = vpop.xlane.xlu1 %3779  ;;  %5758 = vmatmul.mubr.f32.gmra.mxu1 %v3792_v51 }
 0xa9e   :  { %v3794_v63 = vmul.f32 %v6019_v34, %v8050_v62  ;;  %6032 = vrcp.f32 %v3780_v61 }
 0xa9f   :  { %v3778_v44 = vpop.xlane.xlu0 %3777  ;;  %v6021_v35 = vpop.eup %6020 }
 0xaa0   :  { %6034 = vrcp.f32 %v3778_v44  ;;  %5760 = vmatprep.mubr.f32.mxu1 %v3794_v63  ;;  %v3800_v47 = vmul.f32 %v6021_v35, %v8054_v49 }
 0xaa1   :  { %v6023_v55 = vpop.eup %6022  ;;  %v3784_v52 = vpop.xlane.xlu1 %3783  ;;  %5761 = vmatmul.mubr.f32.gmra.mxu1 %v3796_v24 }
 0xaa2   :  { %v3798_v41 = vmul.f32 %v6023_v55, %v8058_v1  ;;  %6036 = vrcp.f32 %v3784_v52 }
 0xaa3   :  { %v3782_v23 = vpop.xlane.xlu0 %3781  ;;  %v6025_v25 = vpop.eup %6024 }
 0xaa4   :  { %6038 = vrcp.f32 %v3782_v23  ;;  %5763 = vmatprep.mubr.f32.mxu1 %v3798_v41  ;;  %v3804_v50 = vmul.f32 %v6025_v25, %v8061_v29 }
 0xaa5   :  { %v6027_v62 = vpop.eup %6026  ;;  %5764 = vmatmul.mubr.f32.gmra.mxu1 %v3800_v47 }
 0xaa6   :  { %v3802_v27 = vmul.f32 %v6027_v62, %v8064_v60 }
 0xaa7   :  { %v6029_v37 = vpop.eup %6028 }
 0xaa8   :  { %5766 = vmatprep.mubr.f32.mxu1 %v3802_v27  ;;  %v3808_v1 = vmul.f32 %v6029_v37, %v8067_v46  ;;  %v8104_v46 = vld [vmem:[%s8209_s7] ss:$0 sm:$0xff] }
 0xaa9   :  { %v6031_v4 = vpop.eup %6030  ;;  %5767 = vmatmul.mubr.f32.gmra.mxu1 %v3804_v50 }
 0xaaa   :  { %v3806_v43 = vmul.f32 %v6031_v4, %v8070_v31 }
 0xaab   :  { %v6033_v53 = vpop.eup %6032 }
 0xaac   :  { %5769 = vmatprep.mubr.f32.mxu1 %v3806_v43  ;;  %v3812_v22 = vmul.f32 %v6033_v53, %v8073_v0 }
 0xaad   :  { %v6035_v49 = vpop.eup %6034  ;;  %5770 = vmatmul.mubr.f32.gmra.mxu1 %v3808_v1 }
 0xaae   :  { %v3810_v28 = vmul.f32 %v6035_v49, %v8076_v15 }
 0xaaf   :  { %v6037_v42 = vpop.eup %6036 }
 0xab0   :  { %5772 = vmatprep.mubr.f32.mxu1 %v3810_v28  ;;  %v3816_v6 = vmul.f32 %v6037_v42, %v8079_v45 }
 0xab1   :  { %v6039_v60 = vpop.eup %6038  ;;  %5773 = vmatmul.mubr.f32.gmra.mxu1 %v3812_v22 }
 0xab2   :  { %v3814_v29 = vmul.f32 %v6039_v60, %v8082_v32 }
 0xab4   :  { %5775 = vmatprep.mubr.f32.mxu1 %v3814_v29 }
 0xab5   :  { %5776 = vmatmul.mubr.f32.gmra.mxu1 %v3816_v6 }
 0xb59   :  { %v5756_v31 = vpop.f32.mrf.mxu1 }
 0xb5a   :  { %v4111_v15 = vadd.f32 %v5756_v31, %v7793_v19 }
 0xb5b   :  { %v4031_v0 = vpop.f32.mrf.mxu1 }
 0xb5c   :  { %v4134_v56 = vadd.f32 %v8104_v46, %v4111_v15  ;;  %v4110_v9 = vadd.f32 %v4031_v0, %v7797_v39 }
 0xb5d   :  { %v5759_v10 = vpop.f32.mrf.mxu1 }
 0xb5e   :  { %4151 = vst.msk [vmem:[%s8210_s8 + $0x8] sm:$0xff] %vm4149_vm2, %v4134_v56  ;;  %v4133_v45 = vadd.f32 %v8104_v46, %v4110_v9  ;;  %v4113_v32 = vadd.f32 %v5759_v10, %v7801_v48 }
 0xb5f   :  { %v4041_v54 = vpop.f32.mrf.mxu1 }
 0xb60   :  { %4150 = vst.msk [vmem:[%s8210_s8] sm:$0xff] %vm4149_vm2, %v4133_v45  ;;  %v4136_v19 = vadd.f32 %v8104_v46, %v4113_v32  ;;  %v4112_v39 = vadd.f32 %v4041_v54, %v7805_v59 }
 0xb61   :  { %v5762_v14 = vpop.f32.mrf.mxu1 }
 0xb62   :  { %4153 = vst.msk [vmem:[%s8210_s8 + $0x18] sm:$0xff] %vm4149_vm2, %v4136_v19  ;;  %v4135_v36 = vadd.f32 %v8104_v46, %v4112_v39  ;;  %v4115_v48 = vadd.f32 %v5762_v14, %v7809_v40 }
 0xb63   :  { %v4051_v58 = vpop.f32.mrf.mxu1 }
 0xb64   :  { %4152 = vst.msk [vmem:[%s8210_s8 + $0x10] sm:$0xff] %vm4149_vm2, %v4135_v36  ;;  %v4138_v11 = vadd.f32 %v8104_v46, %v4115_v48  ;;  %v4114_v59 = vadd.f32 %v4051_v58, %v7813_v21 }
 0xb65   :  { %v5765_v3 = vpop.f32.mrf.mxu1 }
 0xb66   :  { %4155 = vst.msk [vmem:[%s8210_s8 + $0x28] sm:$0xff] %vm4149_vm2, %v4138_v11  ;;  %v4137_v16 = vadd.f32 %v8104_v46, %v4114_v59  ;;  %v4117_v40 = vadd.f32 %v5765_v3, %v7817_v12 }
 0xb67   :  { %v4061_v8 = vpop.f32.mrf.mxu1 }
 0xb68   :  { %4154 = vst.msk [vmem:[%s8210_s8 + $0x20] sm:$0xff] %vm4149_vm2, %v4137_v16  ;;  %v4140_v17 = vadd.f32 %v8104_v46, %v4117_v40  ;;  %v4116_v21 = vadd.f32 %v4061_v8, %v7821_v33 }
 0xb69   :  { %v5768_v20 = vpop.f32.mrf.mxu1 }
 0xb6a   :  { %4157 = vst.msk [vmem:[%s8210_s8 + $0x38] sm:$0xff] %vm4149_vm2, %v4140_v17  ;;  %v4139_v51 = vadd.f32 %v8104_v46, %v4116_v21  ;;  %v4119_v12 = vadd.f32 %v5768_v20, %v7825_v13 }
 0xb6b   :  { %v4071_v38 = vpop.f32.mrf.mxu1 }
 0xb6c   :  { %4156 = vst.msk [vmem:[%s8210_s8 + $0x30] sm:$0xff] %vm4149_vm2, %v4139_v51  ;;  %v4142_v34 = vadd.f32 %v8104_v46, %v4119_v12  ;;  %v4118_v33 = vadd.f32 %v4071_v38, %v7829_v57 }
 0xb6d   :  { %v5771_v61 = vpop.f32.mrf.mxu1 }
 0xb6e   :  { %4159 = vst.msk [vmem:[%s8210_s8 + $0x48] sm:$0xff] %vm4149_vm2, %v4142_v34  ;;  %v4141_v63 = vadd.f32 %v8104_v46, %v4118_v33  ;;  %v4121_v13 = vadd.f32 %v5771_v61, %v7833_v7 }
 0xb6f   :  { %v4081_v44 = vpop.f32.mrf.mxu1 }
 0xb70   :  { %4158 = vst.msk [vmem:[%s8210_s8 + $0x40] sm:$0xff] %vm4149_vm2, %v4141_v63  ;;  %v4144_v24 = vadd.f32 %v8104_v46, %v4121_v13  ;;  %v4120_v57 = vadd.f32 %v4081_v44, %v7837_v26 }
 0xb71   :  { %v5774_v35 = vpop.f32.mrf.mxu1 }
 0xb72   :  { %4161 = vst.msk [vmem:[%s8210_s8 + $0x58] sm:$0xff] %vm4149_vm2, %v4144_v24  ;;  %v4143_v55 = vadd.f32 %v8104_v46, %v4120_v57  ;;  %v4123_v7 = vadd.f32 %v5774_v35, %v7841_v30 }
 0xb73   :  { %v4091_v52 = vpop.f32.mrf.mxu1 }
 0xb74   :  { %4160 = vst.msk [vmem:[%s8210_s8 + $0x50] sm:$0xff] %vm4149_vm2, %v4143_v55  ;;  %v4146_v41 = vadd.f32 %v8104_v46, %v4123_v7  ;;  %v4122_v26 = vadd.f32 %v4091_v52, %v7845_v2 }
 0xb75   :  { %v5777_v23 = vpop.f32.mrf.mxu1 }
 0xb76   :  { %4163 = vst.msk [vmem:[%s8210_s8 + $0x68] sm:$0xff] %vm4149_vm2, %v4146_v41  ;;  %v4145_v47 = vadd.f32 %v8104_v46, %v4122_v26  ;;  %v4125_v30 = vadd.f32 %v5777_v23, %v7849_v5 }
 0xb77   :  { %v4101_v25 = vpop.f32.mrf.mxu1 }
 0xb78   :  { %4162 = vst.msk [vmem:[%s8210_s8 + $0x60] sm:$0xff] %vm4149_vm2, %v4145_v47  ;;  %v4148_v62 = vadd.f32 %v8104_v46, %v4125_v30  ;;  %v4124_v2 = vadd.f32 %v4101_v25, %v7851_v18 }
 0xb7a   :  { %4165 = vst.msk [vmem:[%s8210_s8 + $0x78] sm:$0xff] %vm4149_vm2, %v4148_v62  ;;  %v4147_v27 = vadd.f32 %v8104_v46, %v4124_v2 }
 0xb7c   :  { %4164 = vst.msk [vmem:[%s8210_s8 + $0x70] sm:$0xff] %vm4149_vm2, %v4147_v27 }
 0xb7d   :  { %4170 = vsyncpa [#allocation3], 1 }
 0xb7e   :  { %4171 = vsyncpa [#allocation5], 1 }

</bundles_post_ra>
